<compile_context>
chip_gen: v6e
topology: v6e:2x2x1
jax: 0.10.0
libtpu: 0.0.40
codegen_flags: <defaults>
</compile_context>

<pallas_src>
import functools

import jax
import jax.numpy as jnp
from jax.experimental import pallas as pl
from jax.experimental.pallas import tpu as pltpu


def _round_up(x: int, m: int) -> int:
    return ((x + m - 1) // m) * m


def _pad_to(arr, axis, target):
    pad = target - arr.shape[axis]
    if pad <= 0:
        return arr
    widths = [(0, 0)] * arr.ndim
    widths[axis] = (0, pad)
    return jnp.pad(arr, widths)


def _linear_single_kernel(x_ref, w_ref, b_ref, o_ref):
    """Whole problem in one shot: logits = x @ W_t + b (f32 accumulation)."""
    o_ref[...] = (
        jnp.dot(x_ref[...], w_ref[...], preferred_element_type=jnp.float32)
        + b_ref[...]
    )


def _linear_tiled_kernel(x_ref, w_ref, b_ref, o_ref):
    """K-tiled fallback for very large D.

    Grid = (batch tiles [parallel], K tiles [arbitrary, last]).
    x_ref: (TB, TK) bf16   current (batch, K) slice of flattened images
    w_ref: (TK, Np) bf16   current K slice of the transposed weight
    b_ref: (1, Np)  f32    bias (same block every step)
    o_ref: (TB, Np) f32    output block, resident across the K sweep;
                           init with bias at k==0, accumulate directly.
    """
    k = pl.program_id(1)

    @pl.when(k == 0)
    def _():
        o_ref[...] = jnp.broadcast_to(b_ref[...], o_ref.shape)

    o_ref[...] += jnp.dot(
        x_ref[...], w_ref[...], preferred_element_type=jnp.float32
    )


@functools.partial(jax.jit, static_argnames=("tk", "tb", "force_tiled"))
def linear_classifier_forward(x, weight, bias, *, tk=2048, tb=256,
                              force_tiled=False):
    """x: (B, 3, H, W) f32; weight: (num_classes, D) f32 (PyTorch layout);
    bias: (num_classes,) f32. Returns (B, num_classes) f32 logits."""
    B = x.shape[0]
    N = weight.shape[0]
    x_flat = x.reshape(B, -1)                 # same semantics as torch .view(b, -1)
    D = x_flat.shape[1]

    # Lane-dense output (N -> multiple of 128) and sublane-dense batch (B -> x8).
    Np = _round_up(max(N, 1), 128)
    Bp = _round_up(max(B, 1), 8)

    w_t = weight.T                            # (D, N)

    # Cast the streamed operands to bf16 (HBM-bound kernel); accumulate in f32.
    x16 = _pad_to(x_flat, 0, Bp).astype(jnp.bfloat16)       # (Bp, D)
    w16 = _pad_to(w_t, 1, Np).astype(jnp.bfloat16)          # (D, Np)
    b2 = _pad_to(bias, 0, Np).reshape(1, Np).astype(jnp.float32)

    # --- Single-shot path: whole problem resident in VMEM, no K grid. -------
    vmem_bytes = (Bp * D + D * Np) * 2 + (Bp * Np + Np) * 4
    if (not force_tiled) and vmem_bytes <= (8 << 20):
        out = pl.pallas_call(
            _linear_single_kernel,
            out_shape=jax.ShapeDtypeStruct((Bp, Np), jnp.float32),
            grid=(1,),
            in_specs=[
                pl.BlockSpec((Bp, D), lambda i: (0, 0)),
                pl.BlockSpec((D, Np), lambda i: (0, 0)),
                pl.BlockSpec((1, Np), lambda i: (0, 0)),
            ],
            out_specs=pl.BlockSpec((Bp, Np), lambda i: (0, 0)),
            compiler_params=pltpu.CompilerParams(
                dimension_semantics=("arbitrary",),
                vmem_limit_bytes=32 * 1024 * 1024,
            ),
        )(x16, w16, b2)
        return out[:B, :N]

    # --- K-tiled fallback for large D (with optional batch tiling). ---------
    tk = min(tk, _round_up(D, 128))           # keep tk a multiple of 128
    Dp = _round_up(D, tk)
    if Bp > tb:
        Bp = _round_up(Bp, tb)
        tb_eff = tb
    else:
        tb_eff = Bp

    x16 = _pad_to(_pad_to(x16, 1, Dp), 0, Bp)  # zero-pad K and batch (no-op if equal)
    w16 = _pad_to(w16, 0, Dp)

    nb = Bp // tb_eff
    nk = Dp // tk

    out = pl.pallas_call(
        _linear_tiled_kernel,
        out_shape=jax.ShapeDtypeStruct((Bp, Np), jnp.float32),
        grid_spec=pltpu.PrefetchScalarGridSpec(
            num_scalar_prefetch=0,
            grid=(nb, nk),                      # batch parallel, K (reduction) last
            in_specs=[
                pl.BlockSpec((tb_eff, tk), lambda i, k: (i, k)),   # x slice
                pl.BlockSpec((tk, Np), lambda i, k: (k, 0)),       # W_t slice
                pl.BlockSpec((1, Np), lambda i, k: (0, 0)),        # bias
            ],
            out_specs=pl.BlockSpec((tb_eff, Np), lambda i, k: (i, 0)),
        ),
        compiler_params=pltpu.CompilerParams(
            dimension_semantics=("parallel", "arbitrary"),
            vmem_limit_bytes=32 * 1024 * 1024,
        ),
        # Note: pl.Buffered(3) on the x spec is an optional single-digit-% sweep.
    )(x16, w16, b2)
    return out[:B, :N]


if __name__ == "__main__":
    # Module defaults: h = w = 64, 3 channels -> input_dim = 3*64*64 = 12288.
    B, C, H, W = 2, 3, 64, 64
    NUM_CLASSES = 6
    D = C * H * W

    key = jax.random.PRNGKey(0)
    kx, kw, kb = jax.random.split(key, 3)

    x = jax.random.normal(kx, (B, C, H, W), dtype=jnp.float32)

    # Deterministic PyTorch-like uniform(-1/sqrt(D), 1/sqrt(D)) init.
    bound = 1.0 / jnp.sqrt(jnp.float32(D))
    weight = jax.random.uniform(kw, (NUM_CLASSES, D), jnp.float32, -bound, bound)
    bias = jax.random.uniform(kb, (NUM_CLASSES,), jnp.float32, -bound, bound)

    # Primary (single-shot) path.
    logits = linear_classifier_forward(x, weight, bias)
    logits = jax.block_until_ready(logits)

    # Also exercise the K-tiled fallback path used for very large D.
    logits_tiled = linear_classifier_forward(x, weight, bias, force_tiled=True)
    logits_tiled = jax.block_until_ready(logits_tiled)

    # Reference with the same numerics as the kernel (bf16 operands, f32 accum).
    x_flat = x.reshape(B, -1)
    xb = x_flat.astype(jnp.bfloat16).astype(jnp.float32)
    wb = weight.astype(jnp.bfloat16).astype(jnp.float32)
    ref_bf16 = xb @ wb.T + bias
    ref_f32 = x_flat @ weight.T + bias

    assert logits.shape == (B, NUM_CLASSES)
    assert logits_tiled.shape == (B, NUM_CLASSES)
    assert jnp.allclose(logits, ref_bf16, atol=1e-3, rtol=1e-3)
    assert jnp.allclose(logits_tiled, ref_bf16, atol=1e-3, rtol=1e-3)
    # Sanity vs. full-f32 reference (bf16 input rounding only).
    assert jnp.allclose(logits, ref_f32, atol=5e-2, rtol=5e-2)

    print("KERNEL_OK")
</pallas_src>

<mosaic_0001>
module attributes {stable_mosaic.version = 11 : i64} {
  func.func @_linear_single_kernel(%arg0: i32, %arg1: memref<8x12288xbf16, #tpu.memory_space<vmem>>, %arg2: memref<12288x128xbf16, #tpu.memory_space<vmem>>, %arg3: memref<1x128xf32, #tpu.memory_space<vmem>>, %arg4: memref<8x128xf32, #tpu.memory_space<vmem>>) attributes {dimension_semantics = [#tpu.dimension_semantics<arbitrary>], iteration_bounds = array<i64: 1>, scalar_prefetch = 0 : i64, scratch_operands = 0 : i64, tpu.core_type = #tpu.core_type<tc>, window_params = [{pipeline_mode = #tpu.pipeline_mode<synchronous>, transform_indices = @transform_0, window_bounds = array<i64: 8, 12288>}, {pipeline_mode = #tpu.pipeline_mode<synchronous>, transform_indices = @transform_1, window_bounds = array<i64: 12288, 128>}, {pipeline_mode = #tpu.pipeline_mode<synchronous>, transform_indices = @transform_2, window_bounds = array<i64: 1, 128>}, {pipeline_mode = #tpu.pipeline_mode<synchronous>, transform_indices = @transform_3, window_bounds = array<i64: 8, 128>}]} {
    %c0 = arith.constant 0 : index
    %c0_0 = arith.constant 0 : index
    %0 = vector.load %arg1[%c0, %c0_0] : memref<8x12288xbf16, #tpu.memory_space<vmem>>, vector<8x12288xbf16>
    %c0_1 = arith.constant 0 : index
    %c0_2 = arith.constant 0 : index
    %1 = vector.load %arg2[%c0_1, %c0_2] : memref<12288x128xbf16, #tpu.memory_space<vmem>>, vector<12288x128xbf16>
    %cst = arith.constant dense<0.000000e+00> : vector<8x128xf32>
    %2 = tpu.matmul %0, %1, %cst {dimension_numbers = #tpu.dot_dimension_numbers<[1], [0], [0], [1], [0, 0, 1, 1], [], []>} : vector<8x12288xbf16>, vector<12288x128xbf16>, vector<8x128xf32> -> vector<8x128xf32>
    %c0_3 = arith.constant 0 : index
    %c0_4 = arith.constant 0 : index
    %3 = vector.load %arg3[%c0_3, %c0_4] : memref<1x128xf32, #tpu.memory_space<vmem>>, vector<1x128xf32>
    %4 = vector.broadcast %3 : vector<1x128xf32> to vector<8x128xf32>
    %5 = arith.addf %2, %4 : vector<8x128xf32>
    %c0_5 = arith.constant 0 : index
    %c0_6 = arith.constant 0 : index
    %6 = vector.load %arg4[%c0_5, %c0_6] : memref<8x128xf32, #tpu.memory_space<vmem>>, vector<8x128xf32>
    tpu.vector_store %arg4[%c0_5, %c0_6], %5 {strides = array<i32>} : memref<8x128xf32, #tpu.memory_space<vmem>>, vector<8x128xf32>,
    return
  }
  func.func @transform_0(%arg0: i32) -> (i32, i32) {
    %c0_i32 = arith.constant 0 : i32
    %c0_i32_0 = arith.constant 0 : i32
    %c0_i32_1 = arith.constant 0 : i32
    return %c0_i32, %c0_i32_0 : i32, i32
  }
  func.func @transform_1(%arg0: i32) -> (i32, i32) {
    %c0_i32 = arith.constant 0 : i32
    %c0_i32_0 = arith.constant 0 : i32
    %c0_i32_1 = arith.constant 0 : i32
    return %c0_i32, %c0_i32_0 : i32, i32
  }
  func.func @transform_2(%arg0: i32) -> (i32, i32) {
    %c0_i32 = arith.constant 0 : i32
    %c0_i32_0 = arith.constant 0 : i32
    %c0_i32_1 = arith.constant 0 : i32
    return %c0_i32, %c0_i32_0 : i32, i32
  }
  func.func @transform_3(%arg0: i32) -> (i32, i32) {
    %c0_i32 = arith.constant 0 : i32
    %c0_i32_0 = arith.constant 0 : i32
    %c0_i32_1 = arith.constant 0 : i32
    return %c0_i32, %c0_i32_0 : i32, i32
  }
}

</mosaic_0001>

<bundles_post_ra>
// kernel: linear_classifier_forward.1
= control target key start
LH: loop header
LB: loop body
LE: loop exit
PB: predicated region body
PF: predicated region fallthrough
CT: control target
= control target key end

     0   :  { %s13785_s1 = inlined_call_operand.vmem [shape: bf16[12288,128], index: 1, kind: input, shape index: {}]   ;;  %s13786_s0 = inlined_call_operand.vmem [shape: bf16[8,12288], index: 0, kind: input, shape index: {}]   ;;  %s13787_s2 = inlined_call_operand.vmem [shape: f32[1,128], index: 2, kind: input, shape index: {}]   ;;  %s13788_s3 = inlined_call_operand.vmem [shape: f32[8,128], index: 3, kind: output, shape index: {}]  }
   0x1   :  { %v10396_v0 = vld [vmem:[%s13785_s1 + $0x78] sm:$0xff]   ;;  %v10400_v4 = vld [vmem:[%s13785_s1 + $0x70] sm:$0xff]   ;;  %v10404_v8 = vld [vmem:[%s13785_s1 + $0x68] sm:$0xff]  }
   0x2   :  { %v10397_v1 = vld [vmem:[%s13785_s1 + $0xf8] sm:$0xff]   ;;  %9340 = vmatprep.subr.bf16.mxu0 %v10396_v0  ;;  %v10401_v5 = vld [vmem:[%s13785_s1 + $0xf0] sm:$0xff]   ;;  %v10405_v9 = vld [vmem:[%s13785_s1 + $0xe8] sm:$0xff]  }
   0x3   :  { %v10398_v2 = vld [vmem:[%s13785_s1 + $0x38] sm:$0xff]   ;;  %9362 = vmatprep.subr.bf16.mxu1 %v10397_v1  ;;  %v10402_v6 = vld [vmem:[%s13785_s1 + $0x30] sm:$0xff]   ;;  %v10406_v10 = vld [vmem:[%s13785_s1 + $0x28] sm:$0xff]  }
   0x4   :  { %v10399_v3 = vld [vmem:[%s13785_s1 + $0xb8] sm:$0xff]   ;;  %9341 = vmatpush3.bf16.msra.mxu0 %v10398_v2  ;;  %v10403_v7 = vld [vmem:[%s13785_s1 + $0xb0] sm:$0xff]   ;;  %v10407_v11 = vld [vmem:[%s13785_s1 + $0xa8] sm:$0xff]  }
   0x5   :  { %9363 = vmatpush3.bf16.msra.mxu1 %v10399_v3  ;;  %9342 = vmatprep.subr.bf16.mxu0 %v10400_v4  ;;  %v10408_v12 = vld [vmem:[%s13785_s1 + $0x60] sm:$0xff]   ;;  %v10412_v16 = vld [vmem:[%s13785_s1 + $0x58] sm:$0xff]   ;;  %v10416_v20 = vld [vmem:[%s13785_s1 + $0x50] sm:$0xff]  }
   0x6   :  { %9364 = vmatprep.subr.bf16.mxu1 %v10401_v5  ;;  %v10409_v13 = vld [vmem:[%s13785_s1 + $0xe0] sm:$0xff]   ;;  %v10413_v17 = vld [vmem:[%s13785_s1 + $0xd8] sm:$0xff]   ;;  %v10417_v21 = vld [vmem:[%s13785_s1 + $0xd0] sm:$0xff]  }
   0x7   :  { %v10410_v14 = vld [vmem:[%s13785_s1 + $0x20] sm:$0xff]   ;;  %v10414_v18 = vld [vmem:[%s13785_s1 + $0x18] sm:$0xff]   ;;  %v10418_v22 = vld [vmem:[%s13785_s1 + $0x10] sm:$0xff]  }
   0x8   :  { %9343 = vmatpush3.bf16.msra.mxu0 %v10402_v6  ;;  %v10411_v15 = vld [vmem:[%s13785_s1 + $0xa0] sm:$0xff]   ;;  %v10415_v19 = vld [vmem:[%s13785_s1 + $0x98] sm:$0xff]   ;;  %v10419_v23 = vld [vmem:[%s13785_s1 + $0x90] sm:$0xff]  }
   0x9   :  { %9365 = vmatpush3.bf16.msra.mxu1 %v10403_v7  ;;  %9344 = vmatprep.subr.bf16.mxu0 %v10404_v8  ;;  %v10420_v24 = vld [vmem:[%s13785_s1 + $0x48] sm:$0xff]   ;;  %v10424_v28 = vld [vmem:[%s13785_s1 + $0x40] sm:$0xff]   ;;  %v10432_v38 = vld [vmem:[%s13785_s1 + $0x178] sm:$0xff]  }
   0xa   :  { %9366 = vmatprep.subr.bf16.mxu1 %v10405_v9  ;;  %v10421_v25 = vld [vmem:[%s13785_s1 + $0xc8] sm:$0xff]   ;;  %v10425_v29 = vld [vmem:[%s13785_s1 + $0xc0] sm:$0xff]   ;;  %v10433_v39 = vld [vmem:[%s13785_s1 + $0x1f8] sm:$0xff]  }
   0xb   :  { %v10422_v26 = vld [vmem:[%s13785_s1 + $0x8] sm:$0xff]   ;;  %v10426_v30 = vld [vmem:[%s13785_s1] sm:$0xff]   ;;  %v10434_v40 = vld [vmem:[%s13785_s1 + $0x138] sm:$0xff]  }
   0xc   :  { %9345 = vmatpush3.bf16.msra.mxu0 %v10406_v10  ;;  %v10423_v27 = vld [vmem:[%s13785_s1 + $0x88] sm:$0xff]   ;;  %v10427_v31 = vld [vmem:[%s13785_s1 + $0x80] sm:$0xff]   ;;  %v10435_v41 = vld [vmem:[%s13785_s1 + $0x1b8] sm:$0xff]  }
   0xd   :  { %9367 = vmatpush3.bf16.msra.mxu1 %v10407_v11  ;;  %9346 = vmatprep.subr.bf16.mxu0 %v10408_v12  ;;  %v15_v32 = vld [vmem:[%s13786_s0] sm:$0xff]  ;;  %v16_v33 = vld [vmem:[%s13786_s0 + $0x8] sm:$0xff]  ;;  %v10436_v42 = vld [vmem:[%s13785_s1 + $0x170] sm:$0xff]  }
   0xe   :  { %9368 = vmatprep.subr.bf16.mxu1 %v10409_v13  ;;  %v8476_v34 = vcombine.low %v15_v32, %v15_v32  ;;  %v8477_v35 = vcombine.high %v15_v32, %v15_v32  ;;  %v8478_v36 = vcombine.low %v16_v33, %v16_v33  ;;  %v8479_v37 = vcombine.high %v16_v33, %v16_v33  ;;  %v10437_v43 = vld [vmem:[%s13785_s1 + $0x1f0] sm:$0xff]   ;;  %v10440_v46 = vld [vmem:[%s13785_s1 + $0x168] sm:$0xff]   ;;  %v10444_v50 = vld [vmem:[%s13785_s1 + $0x160] sm:$0xff]  }
   0xf   :  { %v10438_v44 = vld [vmem:[%s13785_s1 + $0x130] sm:$0xff]   ;;  %v10441_v47 = vld [vmem:[%s13785_s1 + $0x1e8] sm:$0xff]   ;;  %v10445_v51 = vld [vmem:[%s13785_s1 + $0x1e0] sm:$0xff]  }
  0x10   :  { %9347 = vmatpush3.bf16.msra.mxu0 %v10410_v14  ;;  %6582 = vmatprep.mubr.bf16.mxu0 %v8477_v35  ;;  %v10439_v45 = vld [vmem:[%s13785_s1 + $0x1b0] sm:$0xff]   ;;  %v10442_v48 = vld [vmem:[%s13785_s1 + $0x128] sm:$0xff]   ;;  %v10446_v52 = vld [vmem:[%s13785_s1 + $0x120] sm:$0xff]  }
  0x11   :  { %9369 = vmatpush3.bf16.msra.mxu1 %v10411_v15  ;;  %9348 = vmatprep.subr.bf16.mxu0 %v10412_v16  ;;  %v10443_v49 = vld [vmem:[%s13785_s1 + $0x1a8] sm:$0xff]   ;;  %v10447_v53 = vld [vmem:[%s13785_s1 + $0x1a0] sm:$0xff]   ;;  %v10448_v54 = vld [vmem:[%s13785_s1 + $0x158] sm:$0xff]  }
  0x12   :  { %9370 = vmatprep.subr.bf16.mxu1 %v10413_v17  ;;  %6622 = vmatprep.mubr.bf16.mxu1 %v8479_v37  ;;  %v10449_v55 = vld [vmem:[%s13785_s1 + $0x1d8] sm:$0xff]   ;;  %v10452_v58 = vld [vmem:[%s13785_s1 + $0x150] sm:$0xff]   ;;  %v10456_v62 = vld [vmem:[%s13785_s1 + $0x148] sm:$0xff]  }
  0x13   :  { %v10450_v56 = vld [vmem:[%s13785_s1 + $0x118] sm:$0xff]   ;;  %v10453_v59 = vld [vmem:[%s13785_s1 + $0x1d0] sm:$0xff]   ;;  %v10457_v63 = vld [vmem:[%s13785_s1 + $0x1c8] sm:$0xff]  }
  0x14   :  { %9349 = vmatpush3.bf16.msra.mxu0 %v10414_v18  ;;  %v10451_v57 = vld [vmem:[%s13785_s1 + $0x198] sm:$0xff]   ;;  %v10454_v60 = vld [vmem:[%s13785_s1 + $0x110] sm:$0xff]   ;;  %v10458_v0 = vld [vmem:[%s13785_s1 + $0x108] sm:$0xff]  }
  0x15   :  { %9371 = vmatpush3.bf16.msra.mxu1 %v10415_v19  ;;  %9350 = vmatprep.subr.bf16.mxu0 %v10416_v20  ;;  %v10455_v61 = vld [vmem:[%s13785_s1 + $0x190] sm:$0xff]   ;;  %v10459_v1 = vld [vmem:[%s13785_s1 + $0x188] sm:$0xff]   ;;  %v10460_v2 = vld [vmem:[%s13785_s1 + $0x140] sm:$0xff]  }
  0x16   :  { %9372 = vmatprep.subr.bf16.mxu1 %v10417_v21  ;;  %v10461_v3 = vld [vmem:[%s13785_s1 + $0x1c0] sm:$0xff]   ;;  %v17_v6 = vld [vmem:[%s13786_s0 + $0x10] sm:$0xff]  ;;  %v18_v9 = vld [vmem:[%s13786_s0 + $0x18] sm:$0xff] }
  0x17   :  { %v10462_v4 = vld [vmem:[%s13785_s1 + $0x100] sm:$0xff]   ;;  %v8480_v7 = vcombine.low %v17_v6, %v17_v6  ;;  %v8481_v8 = vcombine.high %v17_v6, %v17_v6  ;;  %v8482_v10 = vcombine.low %v18_v9, %v18_v9  ;;  %v8483_v11 = vcombine.high %v18_v9, %v18_v9  ;;  %v10468_v12 = vld [vmem:[%s13785_s1 + $0x278] sm:$0xff]   ;;  %v10472_v16 = vld [vmem:[%s13785_s1 + $0x270] sm:$0xff]  }
  0x18   :  { %9351 = vmatpush3.bf16.msra.mxu0 %v10418_v22  ;;  %v10463_v5 = vld [vmem:[%s13785_s1 + $0x180] sm:$0xff]   ;;  %v10469_v13 = vld [vmem:[%s13785_s1 + $0x2f8] sm:$0xff]   ;;  %v10473_v17 = vld [vmem:[%s13785_s1 + $0x2f0] sm:$0xff]  }
  0x19   :  { %9373 = vmatpush3.bf16.msra.mxu1 %v10419_v23  ;;  %9352 = vmatprep.subr.bf16.mxu0 %v10420_v24  ;;  %v10470_v14 = vld [vmem:[%s13785_s1 + $0x238] sm:$0xff]   ;;  %v10474_v18 = vld [vmem:[%s13785_s1 + $0x230] sm:$0xff]   ;;  %v10476_v20 = vld [vmem:[%s13785_s1 + $0x268] sm:$0xff]  }
  0x1a   :  { %9374 = vmatprep.subr.bf16.mxu1 %v10421_v25  ;;  %v10471_v15 = vld [vmem:[%s13785_s1 + $0x2b8] sm:$0xff]   ;;  %v10475_v19 = vld [vmem:[%s13785_s1 + $0x2b0] sm:$0xff]   ;;  %v10477_v21 = vld [vmem:[%s13785_s1 + $0x2e8] sm:$0xff]  }
  0x1b   :  { %v10478_v22 = vld [vmem:[%s13785_s1 + $0x228] sm:$0xff]   ;;  %v10480_v24 = vld [vmem:[%s13785_s1 + $0x260] sm:$0xff]   ;;  %v10488_v32 = vld [vmem:[%s13785_s1 + $0x250] sm:$0xff]  }
  0x1c   :  { %9353 = vmatpush3.bf16.msra.mxu0 %v10422_v26  ;;  %v10479_v23 = vld [vmem:[%s13785_s1 + $0x2a8] sm:$0xff]   ;;  %v10481_v25 = vld [vmem:[%s13785_s1 + $0x2e0] sm:$0xff]   ;;  %v10489_v33 = vld [vmem:[%s13785_s1 + $0x2d0] sm:$0xff]  }
  0x1d   :  { %9375 = vmatpush3.bf16.msra.mxu1 %v10423_v27  ;;  %9354 = vmatprep.subr.bf16.mxu0 %v10424_v28  ;;  %v10482_v26 = vld [vmem:[%s13785_s1 + $0x220] sm:$0xff]   ;;  %v10484_v28 = vld [vmem:[%s13785_s1 + $0x258] sm:$0xff]   ;;  %v10491_v35 = vld [vmem:[%s13785_s1 + $0x290] sm:$0xff]  }
  0x1e   :  { %9376 = vmatprep.subr.bf16.mxu1 %v10425_v29  ;;  %v10483_v27 = vld [vmem:[%s13785_s1 + $0x2a0] sm:$0xff]   ;;  %v10485_v29 = vld [vmem:[%s13785_s1 + $0x2d8] sm:$0xff]   ;;  %v10493_v37 = vld [vmem:[%s13785_s1 + $0x2c8] sm:$0xff]  }
  0x1f   :  { %v10524_v6 = vld [vmem:[%s13785_s1 + $0x350] sm:$0xff]  }
  0x20   :  { %9355 = vmatpush3.bf16.msra.mxu0 %v10426_v30  ;;  %v10486_v30 = vld [vmem:[%s13785_s1 + $0x218] sm:$0xff]   ;;  %v10527_v9 = vld [vmem:[%s13785_s1 + $0x390] sm:$0xff]  }
  0x21   :  { %9377 = vmatpush3.bf16.msra.mxu1 %v10427_v31  ;;  %9384 = vmatprep.subr.bf16.mxu0 %v10432_v38  ;;  %v10487_v31 = vld [vmem:[%s13785_s1 + $0x298] sm:$0xff]   ;;  %v10494_v38 = vld [vmem:[%s13785_s1 + $0x208] sm:$0xff]  }
  0x22   :  { %9406 = vmatprep.subr.bf16.mxu1 %v10433_v39  ;;  %v10495_v39 = vld [vmem:[%s13785_s1 + $0x288] sm:$0xff]  }
  0x23   :  { %6583 = vmatmul.mubr.bf16.vlgmr.msra.gmra.mxu0 %v8476_v34  ;;  %v10490_v34 = vld [vmem:[%s13785_s1 + $0x210] sm:$0xff]  }
  0x24   :  { %6623 = vmatmul.mubr.bf16.vlgmr.msra.gmra.mxu1 %v8478_v36  ;;  %9385 = vmatpush3.bf16.msra.mxu0 %v10434_v40  ;;  %v10492_v36 = vld [vmem:[%s13785_s1 + $0x248] sm:$0xff]   ;;  %v10496_v40 = vld [vmem:[%s13785_s1 + $0x240] sm:$0xff]  }
  0x25   :  { %9407 = vmatpush3.bf16.msra.mxu1 %v10435_v41  ;;  %9386 = vmatprep.subr.bf16.mxu0 %v10436_v42  ;;  %v10497_v41 = vld [vmem:[%s13785_s1 + $0x2c0] sm:$0xff]  }
  0x26   :  { %9408 = vmatprep.subr.bf16.mxu1 %v10437_v43  ;;  %6662 = vmatprep.mubr.bf16.mxu0 %v8481_v8  ;;  %v10498_v42 = vld [vmem:[%s13785_s1 + $0x200] sm:$0xff]   ;;  %v10526_v8 = vld [vmem:[%s13785_s1 + $0x310] sm:$0xff]  }
  0x27   :  { %6702 = vmatprep.mubr.bf16.mxu1 %v8483_v11  ;;  %v10499_v43 = vld [vmem:[%s13785_s1 + $0x280] sm:$0xff]   ;;  %v10529_v11 = vld [vmem:[%s13785_s1 + $0x3c8] sm:$0xff]  }
  0x28   :  { %9387 = vmatpush3.bf16.msra.mxu0 %v10438_v44  ;;  %v19_v44 = vld [vmem:[%s13786_s0 + $0x20] sm:$0xff] }
  0x29   :  { %9409 = vmatpush3.bf16.msra.mxu1 %v10439_v45  ;;  %9388 = vmatprep.subr.bf16.mxu0 %v10440_v46  ;;  %v20_v45 = vld [vmem:[%s13786_s0 + $0x28] sm:$0xff]  ;;  %v8484_v46 = vcombine.low %v19_v44, %v19_v44 }
  0x2a   :  { %9410 = vmatprep.subr.bf16.mxu1 %v10441_v47  ;;  %v8485_v47 = vcombine.high %v19_v44, %v19_v44  ;;  %v10560_v44 = vld [vmem:[%s13785_s1 + $0x450] sm:$0xff]  }
  0x2c   :  { %9389 = vmatpush3.bf16.msra.mxu0 %v10442_v48  ;;  %v8486_v48 = vcombine.low %v20_v45, %v20_v45 }
  0x2d   :  { %9411 = vmatpush3.bf16.msra.mxu1 %v10443_v49  ;;  %9390 = vmatprep.subr.bf16.mxu0 %v10444_v50  ;;  %v8487_v49 = vcombine.high %v20_v45, %v20_v45  ;;  %v10504_v50 = vld [vmem:[%s13785_s1 + $0x378] sm:$0xff]   ;;  %v10561_v45 = vld [vmem:[%s13785_s1 + $0x4d0] sm:$0xff]  }
  0x2e   :  { %9412 = vmatprep.subr.bf16.mxu1 %v10445_v51  ;;  %v10505_v51 = vld [vmem:[%s13785_s1 + $0x3f8] sm:$0xff]  }
  0x30   :  { %9391 = vmatpush3.bf16.msra.mxu0 %v10446_v52  ;;  %v10506_v52 = vld [vmem:[%s13785_s1 + $0x338] sm:$0xff]  }
  0x31   :  { %9413 = vmatpush3.bf16.msra.mxu1 %v10447_v53  ;;  %9392 = vmatprep.subr.bf16.mxu0 %v10448_v54  ;;  %v10507_v53 = vld [vmem:[%s13785_s1 + $0x3b8] sm:$0xff]   ;;  %v10508_v54 = vld [vmem:[%s13785_s1 + $0x370] sm:$0xff]  }
  0x32   :  { %9414 = vmatprep.subr.bf16.mxu1 %v10449_v55  ;;  %v10509_v55 = vld [vmem:[%s13785_s1 + $0x3f0] sm:$0xff]  }
  0x34   :  { %9393 = vmatpush3.bf16.msra.mxu0 %v10450_v56  ;;  %v10510_v56 = vld [vmem:[%s13785_s1 + $0x330] sm:$0xff]  }
  0x35   :  { %9415 = vmatpush3.bf16.msra.mxu1 %v10451_v57  ;;  %9394 = vmatprep.subr.bf16.mxu0 %v10452_v58  ;;  %v10511_v57 = vld [vmem:[%s13785_s1 + $0x3b0] sm:$0xff]   ;;  %v10512_v58 = vld [vmem:[%s13785_s1 + $0x368] sm:$0xff]  }
  0x36   :  { %9416 = vmatprep.subr.bf16.mxu1 %v10453_v59  ;;  %v10513_v59 = vld [vmem:[%s13785_s1 + $0x3e8] sm:$0xff]  }
  0x38   :  { %9395 = vmatpush3.bf16.msra.mxu0 %v10454_v60  ;;  %v10514_v60 = vld [vmem:[%s13785_s1 + $0x328] sm:$0xff]  }
  0x39   :  { %9417 = vmatpush3.bf16.msra.mxu1 %v10455_v61  ;;  %9396 = vmatprep.subr.bf16.mxu0 %v10456_v62  ;;  %v10515_v61 = vld [vmem:[%s13785_s1 + $0x3a8] sm:$0xff]   ;;  %v10516_v62 = vld [vmem:[%s13785_s1 + $0x360] sm:$0xff]  }
  0x3a   :  { %9418 = vmatprep.subr.bf16.mxu1 %v10457_v63  ;;  %v10517_v63 = vld [vmem:[%s13785_s1 + $0x3e0] sm:$0xff]  }
  0x3c   :  { %9397 = vmatpush3.bf16.msra.mxu0 %v10458_v0  ;;  %v10518_v0 = vld [vmem:[%s13785_s1 + $0x320] sm:$0xff]  }
  0x3d   :  { %9419 = vmatpush3.bf16.msra.mxu1 %v10459_v1  ;;  %9398 = vmatprep.subr.bf16.mxu0 %v10460_v2  ;;  %v10519_v1 = vld [vmem:[%s13785_s1 + $0x3a0] sm:$0xff]   ;;  %v10520_v2 = vld [vmem:[%s13785_s1 + $0x358] sm:$0xff]  }
  0x3e   :  { %9420 = vmatprep.subr.bf16.mxu1 %v10461_v3  ;;  %v10521_v3 = vld [vmem:[%s13785_s1 + $0x3d8] sm:$0xff]  }
  0x40   :  { %9399 = vmatpush3.bf16.msra.mxu0 %v10462_v4  ;;  %v10522_v4 = vld [vmem:[%s13785_s1 + $0x318] sm:$0xff]  }
  0x41   :  { %9421 = vmatpush3.bf16.msra.mxu1 %v10463_v5  ;;  %9428 = vmatprep.subr.bf16.mxu0 %v10468_v12  ;;  %v10523_v5 = vld [vmem:[%s13785_s1 + $0x398] sm:$0xff]   ;;  %v10530_v12 = vld [vmem:[%s13785_s1 + $0x308] sm:$0xff]  }
  0x42   :  { %9450 = vmatprep.subr.bf16.mxu1 %v10469_v13  ;;  %v10531_v13 = vld [vmem:[%s13785_s1 + $0x388] sm:$0xff]  }
  0x43   :  { %6663 = vmatmul.mubr.bf16.vlgmr.msra.gmra.mxu0 %v8480_v7  ;;  %v10525_v7 = vld [vmem:[%s13785_s1 + $0x3d0] sm:$0xff]  }
  0x44   :  { %6703 = vmatmul.mubr.bf16.vlgmr.msra.gmra.mxu1 %v8482_v10  ;;  %9429 = vmatpush3.bf16.msra.mxu0 %v10470_v14  ;;  %v10528_v10 = vld [vmem:[%s13785_s1 + $0x348] sm:$0xff]   ;;  %v10532_v14 = vld [vmem:[%s13785_s1 + $0x340] sm:$0xff]  }
  0x45   :  { %9451 = vmatpush3.bf16.msra.mxu1 %v10471_v15  ;;  %9430 = vmatprep.subr.bf16.mxu0 %v10472_v16  ;;  %v10533_v15 = vld [vmem:[%s13785_s1 + $0x3c0] sm:$0xff]  }
  0x46   :  { %9452 = vmatprep.subr.bf16.mxu1 %v10473_v17  ;;  %6742 = vmatprep.mubr.bf16.mxu0 %v8485_v47  ;;  %v10534_v16 = vld [vmem:[%s13785_s1 + $0x300] sm:$0xff]   ;;  %v10563_v47 = vld [vmem:[%s13785_s1 + $0x490] sm:$0xff]  }
  0x47   :  { %6782 = vmatprep.mubr.bf16.mxu1 %v8487_v49  ;;  %v10535_v17 = vld [vmem:[%s13785_s1 + $0x380] sm:$0xff]   ;;  %v10565_v49 = vld [vmem:[%s13785_s1 + $0x4c8] sm:$0xff]  }
  0x48   :  { %9431 = vmatpush3.bf16.msra.mxu0 %v10474_v18  ;;  %v21_v18 = vld [vmem:[%s13786_s0 + $0x30] sm:$0xff] }
  0x49   :  { %9453 = vmatpush3.bf16.msra.mxu1 %v10475_v19  ;;  %9432 = vmatprep.subr.bf16.mxu0 %v10476_v20  ;;  %v22_v19 = vld [vmem:[%s13786_s0 + $0x38] sm:$0xff]  ;;  %v8488_v20 = vcombine.low %v21_v18, %v21_v18 }
  0x4a   :  { %9454 = vmatprep.subr.bf16.mxu1 %v10477_v21  ;;  %v8489_v21 = vcombine.high %v21_v18, %v21_v18  ;;  %v10596_v18 = vld [vmem:[%s13785_s1 + $0x550] sm:$0xff]  }
  0x4c   :  { %9433 = vmatpush3.bf16.msra.mxu0 %v10478_v22  ;;  %v8490_v22 = vcombine.low %v22_v19, %v22_v19 }
  0x4d   :  { %9455 = vmatpush3.bf16.msra.mxu1 %v10479_v23  ;;  %9434 = vmatprep.subr.bf16.mxu0 %v10480_v24  ;;  %v10540_v23 = vld [vmem:[%s13785_s1 + $0x478] sm:$0xff]   ;;  %v8491_v24 = vcombine.high %v22_v19, %v22_v19  ;;  %v10597_v19 = vld [vmem:[%s13785_s1 + $0x5d0] sm:$0xff]  }
  0x4e   :  { %9456 = vmatprep.subr.bf16.mxu1 %v10481_v25  ;;  %v10541_v25 = vld [vmem:[%s13785_s1 + $0x4f8] sm:$0xff]  }
  0x50   :  { %9435 = vmatpush3.bf16.msra.mxu0 %v10482_v26  ;;  %v10542_v26 = vld [vmem:[%s13785_s1 + $0x438] sm:$0xff]  }
  0x51   :  { %9457 = vmatpush3.bf16.msra.mxu1 %v10483_v27  ;;  %9436 = vmatprep.subr.bf16.mxu0 %v10484_v28  ;;  %v10543_v27 = vld [vmem:[%s13785_s1 + $0x4b8] sm:$0xff]   ;;  %v10544_v28 = vld [vmem:[%s13785_s1 + $0x470] sm:$0xff]  }
  0x52   :  { %9458 = vmatprep.subr.bf16.mxu1 %v10485_v29  ;;  %v10545_v29 = vld [vmem:[%s13785_s1 + $0x4f0] sm:$0xff]  }
  0x54   :  { %9437 = vmatpush3.bf16.msra.mxu0 %v10486_v30  ;;  %v10546_v30 = vld [vmem:[%s13785_s1 + $0x430] sm:$0xff]  }
  0x55   :  { %9459 = vmatpush3.bf16.msra.mxu1 %v10487_v31  ;;  %9438 = vmatprep.subr.bf16.mxu0 %v10488_v32  ;;  %v10547_v31 = vld [vmem:[%s13785_s1 + $0x4b0] sm:$0xff]   ;;  %v10548_v32 = vld [vmem:[%s13785_s1 + $0x468] sm:$0xff]  }
  0x56   :  { %9460 = vmatprep.subr.bf16.mxu1 %v10489_v33  ;;  %v10549_v33 = vld [vmem:[%s13785_s1 + $0x4e8] sm:$0xff]  }
  0x58   :  { %9439 = vmatpush3.bf16.msra.mxu0 %v10490_v34  ;;  %v10550_v34 = vld [vmem:[%s13785_s1 + $0x428] sm:$0xff]  }
  0x59   :  { %9461 = vmatpush3.bf16.msra.mxu1 %v10491_v35  ;;  %9440 = vmatprep.subr.bf16.mxu0 %v10492_v36  ;;  %v10551_v35 = vld [vmem:[%s13785_s1 + $0x4a8] sm:$0xff]   ;;  %v10552_v36 = vld [vmem:[%s13785_s1 + $0x460] sm:$0xff]  }
  0x5a   :  { %9462 = vmatprep.subr.bf16.mxu1 %v10493_v37  ;;  %v10553_v37 = vld [vmem:[%s13785_s1 + $0x4e0] sm:$0xff]  }
  0x5c   :  { %9441 = vmatpush3.bf16.msra.mxu0 %v10494_v38  ;;  %v10554_v38 = vld [vmem:[%s13785_s1 + $0x420] sm:$0xff]  }
  0x5d   :  { %9463 = vmatpush3.bf16.msra.mxu1 %v10495_v39  ;;  %9442 = vmatprep.subr.bf16.mxu0 %v10496_v40  ;;  %v10555_v39 = vld [vmem:[%s13785_s1 + $0x4a0] sm:$0xff]   ;;  %v10556_v40 = vld [vmem:[%s13785_s1 + $0x458] sm:$0xff]  }
  0x5e   :  { %9464 = vmatprep.subr.bf16.mxu1 %v10497_v41  ;;  %v10557_v41 = vld [vmem:[%s13785_s1 + $0x4d8] sm:$0xff]  }
  0x60   :  { %9443 = vmatpush3.bf16.msra.mxu0 %v10498_v42  ;;  %v10558_v42 = vld [vmem:[%s13785_s1 + $0x418] sm:$0xff]  }
  0x61   :  { %9465 = vmatpush3.bf16.msra.mxu1 %v10499_v43  ;;  %9472 = vmatprep.subr.bf16.mxu0 %v10504_v50  ;;  %v10559_v43 = vld [vmem:[%s13785_s1 + $0x498] sm:$0xff]   ;;  %v10566_v50 = vld [vmem:[%s13785_s1 + $0x408] sm:$0xff]  }
  0x62   :  { %9494 = vmatprep.subr.bf16.mxu1 %v10505_v51  ;;  %v10567_v51 = vld [vmem:[%s13785_s1 + $0x488] sm:$0xff]  }
  0x63   :  { %6743 = vmatmul.mubr.bf16.vlgmr.msra.gmra.mxu0 %v8484_v46  ;;  %v10562_v46 = vld [vmem:[%s13785_s1 + $0x410] sm:$0xff]  }
  0x64   :  { %6783 = vmatmul.mubr.bf16.vlgmr.msra.gmra.mxu1 %v8486_v48  ;;  %9473 = vmatpush3.bf16.msra.mxu0 %v10506_v52  ;;  %v10564_v48 = vld [vmem:[%s13785_s1 + $0x448] sm:$0xff]   ;;  %v10568_v52 = vld [vmem:[%s13785_s1 + $0x440] sm:$0xff]  }
  0x65   :  { %9495 = vmatpush3.bf16.msra.mxu1 %v10507_v53  ;;  %9474 = vmatprep.subr.bf16.mxu0 %v10508_v54  ;;  %v10569_v53 = vld [vmem:[%s13785_s1 + $0x4c0] sm:$0xff]  }
  0x66   :  { %9496 = vmatprep.subr.bf16.mxu1 %v10509_v55  ;;  %6822 = vmatprep.mubr.bf16.mxu0 %v8489_v21  ;;  %v10570_v54 = vld [vmem:[%s13785_s1 + $0x400] sm:$0xff]   ;;  %v10599_v21 = vld [vmem:[%s13785_s1 + $0x590] sm:$0xff]  }
  0x67   :  { %6862 = vmatprep.mubr.bf16.mxu1 %v8491_v24  ;;  %v10571_v55 = vld [vmem:[%s13785_s1 + $0x480] sm:$0xff]   ;;  %v10602_v24 = vld [vmem:[%s13785_s1 + $0x508] sm:$0xff]  }
  0x68   :  { %9475 = vmatpush3.bf16.msra.mxu0 %v10510_v56  ;;  %v23_v56 = vld [vmem:[%s13786_s0 + $0x40] sm:$0xff] }
  0x69   :  { %9497 = vmatpush3.bf16.msra.mxu1 %v10511_v57  ;;  %9476 = vmatprep.subr.bf16.mxu0 %v10512_v58  ;;  %v8492_v57 = vcombine.low %v23_v56, %v23_v56  ;;  %v8493_v58 = vcombine.high %v23_v56, %v23_v56  ;;  %v10632_v56 = vld [vmem:[%s13785_s1 + $0x650] sm:$0xff]  }
  0x6a   :  { %9498 = vmatprep.subr.bf16.mxu1 %v10513_v59  ;;  %v24_v59 = vld [vmem:[%s13786_s0 + $0x48] sm:$0xff] }
  0x6c   :  { %9477 = vmatpush3.bf16.msra.mxu0 %v10514_v60  ;;  %v8494_v60 = vcombine.low %v24_v59, %v24_v59 }
  0x6d   :  { %9499 = vmatpush3.bf16.msra.mxu1 %v10515_v61  ;;  %9478 = vmatprep.subr.bf16.mxu0 %v10516_v62  ;;  %v8495_v61 = vcombine.high %v24_v59, %v24_v59  ;;  %v10576_v62 = vld [vmem:[%s13785_s1 + $0x578] sm:$0xff]   ;;  %v10635_v59 = vld [vmem:[%s13785_s1 + $0x690] sm:$0xff]  }
  0x6e   :  { %9500 = vmatprep.subr.bf16.mxu1 %v10517_v63  ;;  %v10577_v63 = vld [vmem:[%s13785_s1 + $0x5f8] sm:$0xff]  }
  0x70   :  { %9479 = vmatpush3.bf16.msra.mxu0 %v10518_v0  ;;  %v10578_v0 = vld [vmem:[%s13785_s1 + $0x538] sm:$0xff]  }
  0x71   :  { %9501 = vmatpush3.bf16.msra.mxu1 %v10519_v1  ;;  %9480 = vmatprep.subr.bf16.mxu0 %v10520_v2  ;;  %v10579_v1 = vld [vmem:[%s13785_s1 + $0x5b8] sm:$0xff]   ;;  %v10580_v2 = vld [vmem:[%s13785_s1 + $0x570] sm:$0xff]  }
  0x72   :  { %9502 = vmatprep.subr.bf16.mxu1 %v10521_v3  ;;  %v10581_v3 = vld [vmem:[%s13785_s1 + $0x5f0] sm:$0xff]  }
  0x74   :  { %9481 = vmatpush3.bf16.msra.mxu0 %v10522_v4  ;;  %v10582_v4 = vld [vmem:[%s13785_s1 + $0x530] sm:$0xff]  }
  0x75   :  { %9503 = vmatpush3.bf16.msra.mxu1 %v10523_v5  ;;  %9482 = vmatprep.subr.bf16.mxu0 %v10524_v6  ;;  %v10583_v5 = vld [vmem:[%s13785_s1 + $0x5b0] sm:$0xff]   ;;  %v10584_v6 = vld [vmem:[%s13785_s1 + $0x568] sm:$0xff]  }
  0x76   :  { %9504 = vmatprep.subr.bf16.mxu1 %v10525_v7  ;;  %v10585_v7 = vld [vmem:[%s13785_s1 + $0x5e8] sm:$0xff]  }
  0x78   :  { %9483 = vmatpush3.bf16.msra.mxu0 %v10526_v8  ;;  %v10586_v8 = vld [vmem:[%s13785_s1 + $0x528] sm:$0xff]  }
  0x79   :  { %9505 = vmatpush3.bf16.msra.mxu1 %v10527_v9  ;;  %9484 = vmatprep.subr.bf16.mxu0 %v10528_v10  ;;  %v10587_v9 = vld [vmem:[%s13785_s1 + $0x5a8] sm:$0xff]   ;;  %v10588_v10 = vld [vmem:[%s13785_s1 + $0x560] sm:$0xff]  }
  0x7a   :  { %9506 = vmatprep.subr.bf16.mxu1 %v10529_v11  ;;  %v10589_v11 = vld [vmem:[%s13785_s1 + $0x5e0] sm:$0xff]  }
  0x7c   :  { %9485 = vmatpush3.bf16.msra.mxu0 %v10530_v12  ;;  %v10590_v12 = vld [vmem:[%s13785_s1 + $0x520] sm:$0xff]  }
  0x7d   :  { %9507 = vmatpush3.bf16.msra.mxu1 %v10531_v13  ;;  %9486 = vmatprep.subr.bf16.mxu0 %v10532_v14  ;;  %v10591_v13 = vld [vmem:[%s13785_s1 + $0x5a0] sm:$0xff]   ;;  %v10592_v14 = vld [vmem:[%s13785_s1 + $0x558] sm:$0xff]  }
  0x7e   :  { %9508 = vmatprep.subr.bf16.mxu1 %v10533_v15  ;;  %v10593_v15 = vld [vmem:[%s13785_s1 + $0x5d8] sm:$0xff]  }
  0x80   :  { %9487 = vmatpush3.bf16.msra.mxu0 %v10534_v16  ;;  %v10594_v16 = vld [vmem:[%s13785_s1 + $0x518] sm:$0xff]  }
  0x81   :  { %9509 = vmatpush3.bf16.msra.mxu1 %v10535_v17  ;;  %9516 = vmatprep.subr.bf16.mxu0 %v10540_v23  ;;  %v10595_v17 = vld [vmem:[%s13785_s1 + $0x598] sm:$0xff]   ;;  %v10601_v23 = vld [vmem:[%s13785_s1 + $0x5c8] sm:$0xff]  }
  0x82   :  { %9538 = vmatprep.subr.bf16.mxu1 %v10541_v25  ;;  %v10603_v25 = vld [vmem:[%s13785_s1 + $0x588] sm:$0xff]  }
  0x83   :  { %6823 = vmatmul.mubr.bf16.vlgmr.msra.gmra.mxu0 %v8488_v20  ;;  %v10598_v20 = vld [vmem:[%s13785_s1 + $0x510] sm:$0xff]  }
  0x84   :  { %6863 = vmatmul.mubr.bf16.vlgmr.msra.gmra.mxu1 %v8490_v22  ;;  %9517 = vmatpush3.bf16.msra.mxu0 %v10542_v26  ;;  %v10600_v22 = vld [vmem:[%s13785_s1 + $0x548] sm:$0xff]   ;;  %v10604_v26 = vld [vmem:[%s13785_s1 + $0x540] sm:$0xff]  }
  0x85   :  { %9539 = vmatpush3.bf16.msra.mxu1 %v10543_v27  ;;  %9518 = vmatprep.subr.bf16.mxu0 %v10544_v28  ;;  %v10605_v27 = vld [vmem:[%s13785_s1 + $0x5c0] sm:$0xff]  }
  0x86   :  { %9540 = vmatprep.subr.bf16.mxu1 %v10545_v29  ;;  %6902 = vmatprep.mubr.bf16.mxu0 %v8493_v58  ;;  %v10606_v28 = vld [vmem:[%s13785_s1 + $0x500] sm:$0xff]   ;;  %v10634_v58 = vld [vmem:[%s13785_s1 + $0x610] sm:$0xff]  }
  0x87   :  { %6942 = vmatprep.mubr.bf16.mxu1 %v8495_v61  ;;  %v10607_v29 = vld [vmem:[%s13785_s1 + $0x580] sm:$0xff]   ;;  %v10637_v61 = vld [vmem:[%s13785_s1 + $0x6c8] sm:$0xff]  }
  0x88   :  { %9519 = vmatpush3.bf16.msra.mxu0 %v10546_v30  ;;  %v25_v30 = vld [vmem:[%s13786_s0 + $0x50] sm:$0xff] }
  0x89   :  { %9541 = vmatpush3.bf16.msra.mxu1 %v10547_v31  ;;  %9520 = vmatprep.subr.bf16.mxu0 %v10548_v32  ;;  %v26_v31 = vld [vmem:[%s13786_s0 + $0x58] sm:$0xff]  ;;  %v8496_v32 = vcombine.low %v25_v30, %v25_v30 }
  0x8a   :  { %9542 = vmatprep.subr.bf16.mxu1 %v10549_v33  ;;  %v8497_v33 = vcombine.high %v25_v30, %v25_v30  ;;  %v10655_v30 = vld [vmem:[%s13785_s1 + $0x7b0] sm:$0xff]  }
  0x8c   :  { %9521 = vmatpush3.bf16.msra.mxu0 %v10550_v34  ;;  %v8498_v34 = vcombine.low %v26_v31, %v26_v31 }
  0x8d   :  { %9543 = vmatpush3.bf16.msra.mxu1 %v10551_v35  ;;  %9522 = vmatprep.subr.bf16.mxu0 %v10552_v36  ;;  %v8499_v35 = vcombine.high %v26_v31, %v26_v31  ;;  %v10612_v36 = vld [vmem:[%s13785_s1 + $0x678] sm:$0xff]   ;;  %v10656_v31 = vld [vmem:[%s13785_s1 + $0x768] sm:$0xff]  }
  0x8e   :  { %9544 = vmatprep.subr.bf16.mxu1 %v10553_v37  ;;  %v10613_v37 = vld [vmem:[%s13785_s1 + $0x6f8] sm:$0xff]  }
  0x90   :  { %9523 = vmatpush3.bf16.msra.mxu0 %v10554_v38  ;;  %v10614_v38 = vld [vmem:[%s13785_s1 + $0x638] sm:$0xff]  }
  0x91   :  { %9545 = vmatpush3.bf16.msra.mxu1 %v10555_v39  ;;  %9524 = vmatprep.subr.bf16.mxu0 %v10556_v40  ;;  %v10615_v39 = vld [vmem:[%s13785_s1 + $0x6b8] sm:$0xff]   ;;  %v10616_v40 = vld [vmem:[%s13785_s1 + $0x670] sm:$0xff]  }
  0x92   :  { %9546 = vmatprep.subr.bf16.mxu1 %v10557_v41  ;;  %v10617_v41 = vld [vmem:[%s13785_s1 + $0x6f0] sm:$0xff]  }
  0x94   :  { %9525 = vmatpush3.bf16.msra.mxu0 %v10558_v42  ;;  %v10618_v42 = vld [vmem:[%s13785_s1 + $0x630] sm:$0xff]  }
  0x95   :  { %9547 = vmatpush3.bf16.msra.mxu1 %v10559_v43  ;;  %9526 = vmatprep.subr.bf16.mxu0 %v10560_v44  ;;  %v10619_v43 = vld [vmem:[%s13785_s1 + $0x6b0] sm:$0xff]   ;;  %v10620_v44 = vld [vmem:[%s13785_s1 + $0x668] sm:$0xff]  }
  0x96   :  { %9548 = vmatprep.subr.bf16.mxu1 %v10561_v45  ;;  %v10621_v45 = vld [vmem:[%s13785_s1 + $0x6e8] sm:$0xff]  }
  0x98   :  { %9527 = vmatpush3.bf16.msra.mxu0 %v10562_v46  ;;  %v10622_v46 = vld [vmem:[%s13785_s1 + $0x628] sm:$0xff]  }
  0x99   :  { %9549 = vmatpush3.bf16.msra.mxu1 %v10563_v47  ;;  %9528 = vmatprep.subr.bf16.mxu0 %v10564_v48  ;;  %v10623_v47 = vld [vmem:[%s13785_s1 + $0x6a8] sm:$0xff]   ;;  %v10624_v48 = vld [vmem:[%s13785_s1 + $0x660] sm:$0xff]  }
  0x9a   :  { %9550 = vmatprep.subr.bf16.mxu1 %v10565_v49  ;;  %v10625_v49 = vld [vmem:[%s13785_s1 + $0x6e0] sm:$0xff]  }
  0x9c   :  { %9529 = vmatpush3.bf16.msra.mxu0 %v10566_v50  ;;  %v10626_v50 = vld [vmem:[%s13785_s1 + $0x620] sm:$0xff]  }
  0x9d   :  { %9551 = vmatpush3.bf16.msra.mxu1 %v10567_v51  ;;  %9530 = vmatprep.subr.bf16.mxu0 %v10568_v52  ;;  %v10627_v51 = vld [vmem:[%s13785_s1 + $0x6a0] sm:$0xff]   ;;  %v10628_v52 = vld [vmem:[%s13785_s1 + $0x658] sm:$0xff]  }
  0x9e   :  { %9552 = vmatprep.subr.bf16.mxu1 %v10569_v53  ;;  %v10629_v53 = vld [vmem:[%s13785_s1 + $0x6d8] sm:$0xff]  }
  0xa0   :  { %9531 = vmatpush3.bf16.msra.mxu0 %v10570_v54  ;;  %v10630_v54 = vld [vmem:[%s13785_s1 + $0x618] sm:$0xff]  }
  0xa1   :  { %9553 = vmatpush3.bf16.msra.mxu1 %v10571_v55  ;;  %9560 = vmatprep.subr.bf16.mxu0 %v10576_v62  ;;  %v10631_v55 = vld [vmem:[%s13785_s1 + $0x698] sm:$0xff]   ;;  %v10638_v62 = vld [vmem:[%s13785_s1 + $0x608] sm:$0xff]  }
  0xa2   :  { %9582 = vmatprep.subr.bf16.mxu1 %v10577_v63  ;;  %v10639_v63 = vld [vmem:[%s13785_s1 + $0x688] sm:$0xff]  }
  0xa3   :  { %6903 = vmatmul.mubr.bf16.vlgmr.msra.gmra.mxu0 %v8492_v57  ;;  %v10633_v57 = vld [vmem:[%s13785_s1 + $0x6d0] sm:$0xff]  }
  0xa4   :  { %6943 = vmatmul.mubr.bf16.vlgmr.msra.gmra.mxu1 %v8494_v60  ;;  %9561 = vmatpush3.bf16.msra.mxu0 %v10578_v0  ;;  %v10636_v60 = vld [vmem:[%s13785_s1 + $0x648] sm:$0xff]   ;;  %v10640_v0 = vld [vmem:[%s13785_s1 + $0x640] sm:$0xff]  }
  0xa5   :  { %9583 = vmatpush3.bf16.msra.mxu1 %v10579_v1  ;;  %9562 = vmatprep.subr.bf16.mxu0 %v10580_v2  ;;  %v10641_v1 = vld [vmem:[%s13785_s1 + $0x6c0] sm:$0xff]  }
  0xa6   :  { %9584 = vmatprep.subr.bf16.mxu1 %v10581_v3  ;;  %6982 = vmatprep.mubr.bf16.mxu0 %v8497_v33  ;;  %v10642_v2 = vld [vmem:[%s13785_s1 + $0x600] sm:$0xff]   ;;  %v10658_v33 = vld [vmem:[%s13785_s1 + $0x728] sm:$0xff]  }
  0xa7   :  { %7022 = vmatprep.mubr.bf16.mxu1 %v8499_v35  ;;  %v10643_v3 = vld [vmem:[%s13785_s1 + $0x680] sm:$0xff]  }
  0xa8   :  { %9563 = vmatpush3.bf16.msra.mxu0 %v10582_v4  ;;  %v27_v4 = vld [vmem:[%s13786_s0 + $0x60] sm:$0xff] }
  0xa9   :  { %9585 = vmatpush3.bf16.msra.mxu1 %v10583_v5  ;;  %9564 = vmatprep.subr.bf16.mxu0 %v10584_v6  ;;  %v28_v5 = vld [vmem:[%s13786_s0 + $0x68] sm:$0xff]  ;;  %v10660_v35 = vld [vmem:[%s13785_s1 + $0x760] sm:$0xff]  }
  0xaa   :  { %9586 = vmatprep.subr.bf16.mxu1 %v10585_v7 }
  0xac   :  { %9565 = vmatpush3.bf16.msra.mxu0 %v10586_v8  ;;  %v8500_v8 = vcombine.low %v27_v4, %v27_v4 }
  0xad   :  { %9587 = vmatpush3.bf16.msra.mxu1 %v10587_v9  ;;  %9566 = vmatprep.subr.bf16.mxu0 %v10588_v10  ;;  %v8501_v9 = vcombine.high %v27_v4, %v27_v4  ;;  %v8502_v10 = vcombine.low %v28_v5, %v28_v5 }
  0xae   :  { %9588 = vmatprep.subr.bf16.mxu1 %v10589_v11  ;;  %v10648_v11 = vld [vmem:[%s13785_s1 + $0x778] sm:$0xff]  }
  0xb0   :  { %9567 = vmatpush3.bf16.msra.mxu0 %v10590_v12  ;;  %v8503_v12 = vcombine.high %v28_v5, %v28_v5 }
  0xb1   :  { %9589 = vmatpush3.bf16.msra.mxu1 %v10591_v13  ;;  %9568 = vmatprep.subr.bf16.mxu0 %v10592_v14  ;;  %v10649_v13 = vld [vmem:[%s13785_s1 + $0x7f8] sm:$0xff]  }
  0xb2   :  { %9590 = vmatprep.subr.bf16.mxu1 %v10593_v15 }
  0xb4   :  { %9569 = vmatpush3.bf16.msra.mxu0 %v10594_v16  ;;  %v10650_v16 = vld [vmem:[%s13785_s1 + $0x738] sm:$0xff]  }
  0xb5   :  { %9591 = vmatpush3.bf16.msra.mxu1 %v10595_v17  ;;  %9570 = vmatprep.subr.bf16.mxu0 %v10596_v18 }
  0xb6   :  { %9592 = vmatprep.subr.bf16.mxu1 %v10597_v19  ;;  %v10651_v19 = vld [vmem:[%s13785_s1 + $0x7b8] sm:$0xff]  }
  0xb8   :  { %9571 = vmatpush3.bf16.msra.mxu0 %v10598_v20  ;;  %v8475_v20 = vld [vmem:[%s13787_s2] ss:$0 sm:$0xff] }
  0xb9   :  { %9593 = vmatpush3.bf16.msra.mxu1 %v10599_v21  ;;  %9572 = vmatprep.subr.bf16.mxu0 %v10600_v22 }
  0xba   :  { %9594 = vmatprep.subr.bf16.mxu1 %v10601_v23 }
  0xbc   :  { %9573 = vmatpush3.bf16.msra.mxu0 %v10602_v24  ;;  %v10652_v24 = vld [vmem:[%s13785_s1 + $0x770] sm:$0xff]  }
  0xbd   :  { %9595 = vmatpush3.bf16.msra.mxu1 %v10603_v25  ;;  %9574 = vmatprep.subr.bf16.mxu0 %v10604_v26  ;;  %v10653_v25 = vld [vmem:[%s13785_s1 + $0x7f0] sm:$0xff]  }
  0xbe   :  { %9596 = vmatprep.subr.bf16.mxu1 %v10605_v27 }
  0xc0   :  { %9575 = vmatpush3.bf16.msra.mxu0 %v10606_v28 }
  0xc1   :  { %9597 = vmatpush3.bf16.msra.mxu1 %v10607_v29  ;;  %9604 = vmatprep.subr.bf16.mxu0 %v10612_v36  ;;  %v10654_v29 = vld [vmem:[%s13785_s1 + $0x730] sm:$0xff]   ;;  %v10661_v36 = vld [vmem:[%s13785_s1 + $0x7e0] sm:$0xff]  }
  0xc2   :  { %9626 = vmatprep.subr.bf16.mxu1 %v10613_v37  ;;  %v10662_v37 = vld [vmem:[%s13785_s1 + $0x720] sm:$0xff]  }
  0xc3   :  { %6983 = vmatmul.mubr.bf16.vlgmr.msra.gmra.mxu0 %v8496_v32  ;;  %v10657_v32 = vld [vmem:[%s13785_s1 + $0x7e8] sm:$0xff]  }
  0xc4   :  { %7023 = vmatmul.mubr.bf16.vlgmr.msra.gmra.mxu1 %v8498_v34  ;;  %9605 = vmatpush3.bf16.msra.mxu0 %v10614_v38  ;;  %v10659_v34 = vld [vmem:[%s13785_s1 + $0x7a8] sm:$0xff]   ;;  %v10663_v38 = vld [vmem:[%s13785_s1 + $0x7a0] sm:$0xff]  }
  0xc5   :  { %9627 = vmatpush3.bf16.msra.mxu1 %v10615_v39  ;;  %9606 = vmatprep.subr.bf16.mxu0 %v10616_v40  ;;  %v10664_v39 = vld [vmem:[%s13785_s1 + $0x758] sm:$0xff]  }
  0xc6   :  { %9628 = vmatprep.subr.bf16.mxu1 %v10617_v41  ;;  %7062 = vmatprep.mubr.bf16.mxu0 %v8501_v9  ;;  %v10665_v40 = vld [vmem:[%s13785_s1 + $0x7d8] sm:$0xff]  }
  0xc7   :  { %7102 = vmatprep.mubr.bf16.mxu1 %v8503_v12  ;;  %v10666_v41 = vld [vmem:[%s13785_s1 + $0x718] sm:$0xff]  }
  0xc8   :  { %9607 = vmatpush3.bf16.msra.mxu0 %v10618_v42  ;;  %v10667_v42 = vld [vmem:[%s13785_s1 + $0x798] sm:$0xff]  }
  0xc9   :  { %9629 = vmatpush3.bf16.msra.mxu1 %v10619_v43  ;;  %9608 = vmatprep.subr.bf16.mxu0 %v10620_v44  ;;  %v10668_v43 = vld [vmem:[%s13785_s1 + $0x750] sm:$0xff]  }
  0xca   :  { %9630 = vmatprep.subr.bf16.mxu1 %v10621_v45  ;;  %v10669_v44 = vld [vmem:[%s13785_s1 + $0x7d0] sm:$0xff]  }
  0xcb   :  { %v10670_v45 = vld [vmem:[%s13785_s1 + $0x710] sm:$0xff]  }
  0xcc   :  { %9609 = vmatpush3.bf16.msra.mxu0 %v10622_v46  ;;  %v10671_v46 = vld [vmem:[%s13785_s1 + $0x790] sm:$0xff]  }
  0xcd   :  { %9631 = vmatpush3.bf16.msra.mxu1 %v10623_v47  ;;  %9610 = vmatprep.subr.bf16.mxu0 %v10624_v48  ;;  %v10672_v47 = vld [vmem:[%s13785_s1 + $0x748] sm:$0xff]  }
  0xce   :  { %9632 = vmatprep.subr.bf16.mxu1 %v10625_v49  ;;  %v10673_v48 = vld [vmem:[%s13785_s1 + $0x7c8] sm:$0xff]  }
  0xcf   :  { %v10674_v49 = vld [vmem:[%s13785_s1 + $0x708] sm:$0xff]  }
  0xd0   :  { %9611 = vmatpush3.bf16.msra.mxu0 %v10626_v50  ;;  %v10675_v50 = vld [vmem:[%s13785_s1 + $0x788] sm:$0xff]  }
  0xd1   :  { %9633 = vmatpush3.bf16.msra.mxu1 %v10627_v51  ;;  %9612 = vmatprep.subr.bf16.mxu0 %v10628_v52  ;;  %v10676_v51 = vld [vmem:[%s13785_s1 + $0x740] sm:$0xff]  }
  0xd2   :  { %9634 = vmatprep.subr.bf16.mxu1 %v10629_v53  ;;  %v10677_v52 = vld [vmem:[%s13785_s1 + $0x7c0] sm:$0xff]  }
  0xd3   :  { %v10678_v53 = vld [vmem:[%s13785_s1 + $0x700] sm:$0xff]  }
  0xd4   :  { %9613 = vmatpush3.bf16.msra.mxu0 %v10630_v54  ;;  %v10679_v54 = vld [vmem:[%s13785_s1 + $0x780] sm:$0xff]  }
  0xd5   :  { %9635 = vmatpush3.bf16.msra.mxu1 %v10631_v55  ;;  %9614 = vmatprep.subr.bf16.mxu0 %v10632_v56  ;;  %v29_v55 = vld [vmem:[%s13786_s0 + $0x70] sm:$0xff]  ;;  %v30_v56 = vld [vmem:[%s13786_s0 + $0x78] sm:$0xff] }
  0xd6   :  { %9636 = vmatprep.subr.bf16.mxu1 %v10633_v57 }
  0xd8   :  { %9615 = vmatpush3.bf16.msra.mxu0 %v10634_v58 }
  0xd9   :  { %9637 = vmatpush3.bf16.msra.mxu1 %v10635_v59  ;;  %9616 = vmatprep.subr.bf16.mxu0 %v10636_v60  ;;  %v8504_v59 = vcombine.low %v29_v55, %v29_v55  ;;  %v8505_v60 = vcombine.high %v29_v55, %v29_v55 }
  0xda   :  { %9638 = vmatprep.subr.bf16.mxu1 %v10637_v61  ;;  %v8506_v61 = vcombine.low %v30_v56, %v30_v56 }
  0xdc   :  { %9617 = vmatpush3.bf16.msra.mxu0 %v10638_v62  ;;  %v10684_v62 = vld [vmem:[%s13785_s1 + $0x878] sm:$0xff]  }
  0xdd   :  { %9639 = vmatpush3.bf16.msra.mxu1 %v10639_v63  ;;  %9618 = vmatprep.subr.bf16.mxu0 %v10640_v0  ;;  %v8507_v63 = vcombine.high %v30_v56, %v30_v56  ;;  %v10685_v0 = vld [vmem:[%s13785_s1 + $0x8f8] sm:$0xff]  }
  0xde   :  { %9640 = vmatprep.subr.bf16.mxu1 %v10641_v1 }
  0xe0   :  { %9619 = vmatpush3.bf16.msra.mxu0 %v10642_v2 }
  0xe1   :  { %9641 = vmatpush3.bf16.msra.mxu1 %v10643_v3  ;;  %9648 = vmatprep.subr.bf16.mxu0 %v10648_v11  ;;  %v10686_v3 = vld [vmem:[%s13785_s1 + $0x838] sm:$0xff]   ;;  %v10689_v11 = vld [vmem:[%s13785_s1 + $0x8f0] sm:$0xff]  }
  0xe2   :  { %9670 = vmatprep.subr.bf16.mxu1 %v10649_v13 }
  0xe3   :  { %v9356_v6 = vpop.f32.mrf.mxu0  ;;  %7063 = vmatmul.mubr.bf16.vlgmr.msra.gmra.mxu0 %v8500_v8 }
  0xe4   :  { %v9378_v7 = vpop.f32.mrf.mxu1  ;;  %7103 = vmatmul.mubr.bf16.vlgmr.msra.gmra.mxu1 %v8502_v10  ;;  %9649 = vmatpush3.bf16.msra.mxu0 %v10650_v16  ;;  %v10688_v10 = vld [vmem:[%s13785_s1 + $0x870] sm:$0xff]  }
  0xe5   :  { %v9357_v14 = vpop.f32.mrf.mxu0  ;;  %9671 = vmatpush3.bf16.msra.mxu1 %v10651_v19  ;;  %9650 = vmatprep.subr.bf16.mxu0 %v10652_v24  ;;  %v10691_v16 = vld [vmem:[%s13785_s1 + $0x8b0] sm:$0xff]   ;;  %v10694_v19 = vld [vmem:[%s13785_s1 + $0x828] sm:$0xff]   ;;  %v10699_v24 = vld [vmem:[%s13785_s1 + $0x8a0] sm:$0xff]  }
  0xe6   :  { %v9379_v15 = vpop.f32.mrf.mxu1  ;;  %v9358_v17 = vadd.f32 %v9357_v14, %v9356_v6  ;;  %9672 = vmatprep.subr.bf16.mxu1 %v10653_v25  ;;  %7142 = vmatprep.mubr.bf16.mxu0 %v8505_v60  ;;  %v10687_v6 = vld [vmem:[%s13785_s1 + $0x8b8] sm:$0xff]   ;;  %v10724_v60 = vld [vmem:[%s13785_s1 + $0x970] sm:$0xff]  }
  0xe7   :  { %v9380_v18 = vadd.f32 %v9379_v15, %v9378_v7  ;;  %v9359_v21 = vpop.f32.mrf.mxu0  ;;  %7182 = vmatprep.mubr.bf16.mxu1 %v8507_v63  ;;  %v10690_v15 = vld [vmem:[%s13785_s1 + $0x830] sm:$0xff]   ;;  %v10700_v25 = vld [vmem:[%s13785_s1 + $0x858] sm:$0xff]  }
  0xe8   :  { %v9381_v22 = vpop.f32.mrf.mxu1  ;;  %v6585_v23 = vadd.f32 %v9358_v17, %v8475_v20  ;;  %9651 = vmatpush3.bf16.msra.mxu0 %v10654_v29  ;;  %v10692_v17 = vld [vmem:[%s13785_s1 + $0x868] sm:$0xff]   ;;  %v10696_v21 = vld [vmem:[%s13785_s1 + $0x860] sm:$0xff]   ;;  %v10704_v29 = vld [vmem:[%s13785_s1 + $0x850] sm:$0xff]  }
  0xe9   :  { %v9360_v26 = vpop.f32.mrf.mxu0  ;;  %9673 = vmatpush3.bf16.msra.mxu1 %v10655_v30  ;;  %9652 = vmatprep.subr.bf16.mxu0 %v10656_v31  ;;  %v10695_v20 = vld [vmem:[%s13785_s1 + $0x8a8] sm:$0xff]   ;;  %v10697_v22 = vld [vmem:[%s13785_s1 + $0x8e0] sm:$0xff]   ;;  %v10705_v30 = vld [vmem:[%s13785_s1 + $0x8d0] sm:$0xff]  }
  0xea   :  { %v9382_v27 = vpop.f32.mrf.mxu1  ;;  %v12015_v28 = vadd.f32 %v9380_v18, %v6585_v23  ;;  %9674 = vmatprep.subr.bf16.mxu1 %v10657_v32  ;;  %v10693_v18 = vld [vmem:[%s13785_s1 + $0x8e8] sm:$0xff]   ;;  %v10698_v23 = vld [vmem:[%s13785_s1 + $0x820] sm:$0xff]   ;;  %v10701_v26 = vld [vmem:[%s13785_s1 + $0x8d8] sm:$0xff]  }
  0xeb   :  { %v10702_v27 = vld [vmem:[%s13785_s1 + $0x818] sm:$0xff]   ;;  %v10706_v31 = vld [vmem:[%s13785_s1 + $0x810] sm:$0xff]  }
  0xec   :  { %9653 = vmatpush3.bf16.msra.mxu0 %v10658_v33  ;;  %v10707_v32 = vld [vmem:[%s13785_s1 + $0x890] sm:$0xff]   ;;  %v10708_v33 = vld [vmem:[%s13785_s1 + $0x848] sm:$0xff]  }
  0xed   :  { %9675 = vmatpush3.bf16.msra.mxu1 %v10659_v34  ;;  %9654 = vmatprep.subr.bf16.mxu0 %v10660_v35  ;;  %v10709_v34 = vld [vmem:[%s13785_s1 + $0x8c8] sm:$0xff]   ;;  %v10725_v63 = vld [vmem:[%s13785_s1 + $0x9f0] sm:$0xff]  }
  0xee   :  { %9676 = vmatprep.subr.bf16.mxu1 %v10661_v36  ;;  %v10710_v35 = vld [vmem:[%s13785_s1 + $0x808] sm:$0xff]  }
  0xef   :  { %v10711_v36 = vld [vmem:[%s13785_s1 + $0x888] sm:$0xff]  }
  0xf0   :  { %9655 = vmatpush3.bf16.msra.mxu0 %v10662_v37  ;;  %v10712_v37 = vld [vmem:[%s13785_s1 + $0x840] sm:$0xff]  }
  0xf1   :  { %9677 = vmatpush3.bf16.msra.mxu1 %v10663_v38  ;;  %9656 = vmatprep.subr.bf16.mxu0 %v10664_v39  ;;  %v10713_v38 = vld [vmem:[%s13785_s1 + $0x8c0] sm:$0xff]  }
  0xf2   :  { %9678 = vmatprep.subr.bf16.mxu1 %v10665_v40  ;;  %v10714_v39 = vld [vmem:[%s13785_s1 + $0x800] sm:$0xff]  }
  0xf3   :  { %v10715_v40 = vld [vmem:[%s13785_s1 + $0x880] sm:$0xff]  }
  0xf4   :  { %9657 = vmatpush3.bf16.msra.mxu0 %v10666_v41  ;;  %v31_v41 = vld [vmem:[%s13786_s0 + $0x80] sm:$0xff] }
  0xf5   :  { %9679 = vmatpush3.bf16.msra.mxu1 %v10667_v42  ;;  %9658 = vmatprep.subr.bf16.mxu0 %v10668_v43  ;;  %v8508_v43 = vcombine.low %v31_v41, %v31_v41 }
  0xf6   :  { %9680 = vmatprep.subr.bf16.mxu1 %v10669_v44  ;;  %v8509_v44 = vcombine.high %v31_v41, %v31_v41  ;;  %v10759_v41 = vld [vmem:[%s13785_s1 + $0xab8] sm:$0xff]  }
  0xf8   :  { %9659 = vmatpush3.bf16.msra.mxu0 %v10670_v45  ;;  %v32_v45 = vld [vmem:[%s13786_s0 + $0x88] sm:$0xff] }
  0xf9   :  { %9681 = vmatpush3.bf16.msra.mxu1 %v10671_v46  ;;  %9660 = vmatprep.subr.bf16.mxu0 %v10672_v47  ;;  %v8510_v47 = vcombine.low %v32_v45, %v32_v45 }
  0xfa   :  { %9682 = vmatprep.subr.bf16.mxu1 %v10673_v48  ;;  %v8511_v48 = vcombine.high %v32_v45, %v32_v45 }
  0xfc   :  { %9661 = vmatpush3.bf16.msra.mxu0 %v10674_v49  ;;  %v10720_v49 = vld [vmem:[%s13785_s1 + $0x978] sm:$0xff]  }
  0xfd   :  { %9683 = vmatpush3.bf16.msra.mxu1 %v10675_v50  ;;  %9662 = vmatprep.subr.bf16.mxu0 %v10676_v51  ;;  %v10721_v51 = vld [vmem:[%s13785_s1 + $0x9f8] sm:$0xff]  }
  0xfe   :  { %9684 = vmatprep.subr.bf16.mxu1 %v10677_v52 }
 0x100   :  { %9663 = vmatpush3.bf16.msra.mxu0 %v10678_v53 }
 0x101   :  { %9685 = vmatpush3.bf16.msra.mxu1 %v10679_v54  ;;  %9692 = vmatprep.subr.bf16.mxu0 %v10684_v62  ;;  %v10722_v54 = vld [vmem:[%s13785_s1 + $0x938] sm:$0xff]  }
 0x102   :  { %9714 = vmatprep.subr.bf16.mxu1 %v10685_v0 }
 0x103   :  { %v9400_v57 = vpop.f32.mrf.mxu0  ;;  %7143 = vmatmul.mubr.bf16.vlgmr.msra.gmra.mxu0 %v8504_v59 }
 0x104   :  { %v9422_v58 = vpop.f32.mrf.mxu1  ;;  %7183 = vmatmul.mubr.bf16.vlgmr.msra.gmra.mxu1 %v8506_v61  ;;  %9693 = vmatpush3.bf16.msra.mxu0 %v10686_v3  ;;  %v10728_v3 = vld [vmem:[%s13785_s1 + $0x968] sm:$0xff]  }
 0x105   :  { %v9401_v1 = vpop.f32.mrf.mxu0  ;;  %9715 = vmatpush3.bf16.msra.mxu1 %v10687_v6  ;;  %9694 = vmatprep.subr.bf16.mxu0 %v10688_v10  ;;  %v10731_v6 = vld [vmem:[%s13785_s1 + $0x9a8] sm:$0xff]   ;;  %v10735_v10 = vld [vmem:[%s13785_s1 + $0x9a0] sm:$0xff]  }
 0x106   :  { %v9423_v2 = vpop.f32.mrf.mxu1  ;;  %v9402_v4 = vadd.f32 %v9401_v1, %v9400_v57  ;;  %9716 = vmatprep.subr.bf16.mxu1 %v10689_v11  ;;  %7222 = vmatprep.mubr.bf16.mxu0 %v8509_v44  ;;  %v10723_v57 = vld [vmem:[%s13785_s1 + $0x9b8] sm:$0xff]   ;;  %v10726_v1 = vld [vmem:[%s13785_s1 + $0x930] sm:$0xff]  }
 0x107   :  { %v9424_v5 = vadd.f32 %v9423_v2, %v9422_v58  ;;  %v9403_v7 = vpop.f32.mrf.mxu0  ;;  %7262 = vmatprep.mubr.bf16.mxu1 %v8511_v48  ;;  %v10727_v2 = vld [vmem:[%s13785_s1 + $0x9b0] sm:$0xff]   ;;  %v10736_v11 = vld [vmem:[%s13785_s1 + $0x958] sm:$0xff]  }
 0x108   :  { %v9425_v8 = vpop.f32.mrf.mxu1  ;;  %v6665_v9 = vadd.f32 %v9402_v4, %v12015_v28  ;;  %9695 = vmatpush3.bf16.msra.mxu0 %v10690_v15  ;;  %v10703_v28 = vld [vmem:[%s13785_s1 + $0x898] sm:$0xff]   ;;  %v10729_v4 = vld [vmem:[%s13785_s1 + $0x9e8] sm:$0xff]   ;;  %v10732_v7 = vld [vmem:[%s13785_s1 + $0x960] sm:$0xff]  }
 0x109   :  { %v9404_v12 = vpop.f32.mrf.mxu0  ;;  %9717 = vmatpush3.bf16.msra.mxu1 %v10691_v16  ;;  %9696 = vmatprep.subr.bf16.mxu0 %v10692_v17  ;;  %v10733_v8 = vld [vmem:[%s13785_s1 + $0x9e0] sm:$0xff]   ;;  %v10740_v15 = vld [vmem:[%s13785_s1 + $0x950] sm:$0xff]  }
 0x10a   :  { %v9426_v13 = vpop.f32.mrf.mxu1  ;;  %v12120_v14 = vadd.f32 %v9424_v5, %v6665_v9  ;;  %9718 = vmatprep.subr.bf16.mxu1 %v10693_v18  ;;  %v10730_v5 = vld [vmem:[%s13785_s1 + $0x928] sm:$0xff]   ;;  %v10734_v9 = vld [vmem:[%s13785_s1 + $0x920] sm:$0xff]   ;;  %v10737_v12 = vld [vmem:[%s13785_s1 + $0x9d8] sm:$0xff]  }
 0x10b   :  { %v10738_v13 = vld [vmem:[%s13785_s1 + $0x918] sm:$0xff]   ;;  %v10741_v16 = vld [vmem:[%s13785_s1 + $0x9d0] sm:$0xff]  }
 0x10c   :  { %9697 = vmatpush3.bf16.msra.mxu0 %v10694_v19  ;;  %v10742_v17 = vld [vmem:[%s13785_s1 + $0x910] sm:$0xff]   ;;  %v10744_v19 = vld [vmem:[%s13785_s1 + $0x948] sm:$0xff]  }
 0x10d   :  { %9719 = vmatpush3.bf16.msra.mxu1 %v10695_v20  ;;  %9698 = vmatprep.subr.bf16.mxu0 %v10696_v21  ;;  %v10743_v18 = vld [vmem:[%s13785_s1 + $0x990] sm:$0xff]   ;;  %v10745_v20 = vld [vmem:[%s13785_s1 + $0x9c8] sm:$0xff]  }
 0x10e   :  { %9720 = vmatprep.subr.bf16.mxu1 %v10697_v22  ;;  %v10746_v21 = vld [vmem:[%s13785_s1 + $0x908] sm:$0xff]  }
 0x10f   :  { %v10747_v22 = vld [vmem:[%s13785_s1 + $0x988] sm:$0xff]  }
 0x110   :  { %9699 = vmatpush3.bf16.msra.mxu0 %v10698_v23  ;;  %v10748_v23 = vld [vmem:[%s13785_s1 + $0x940] sm:$0xff]  }
 0x111   :  { %9721 = vmatpush3.bf16.msra.mxu1 %v10699_v24  ;;  %9700 = vmatprep.subr.bf16.mxu0 %v10700_v25  ;;  %v10749_v24 = vld [vmem:[%s13785_s1 + $0x9c0] sm:$0xff]  }
 0x112   :  { %9722 = vmatprep.subr.bf16.mxu1 %v10701_v26  ;;  %v10750_v25 = vld [vmem:[%s13785_s1 + $0x900] sm:$0xff]  }
 0x113   :  { %v10751_v26 = vld [vmem:[%s13785_s1 + $0x980] sm:$0xff]  }
 0x114   :  { %9701 = vmatpush3.bf16.msra.mxu0 %v10702_v27  ;;  %v33_v27 = vld [vmem:[%s13786_s0 + $0x90] sm:$0xff] }
 0x115   :  { %9723 = vmatpush3.bf16.msra.mxu1 %v10703_v28  ;;  %9702 = vmatprep.subr.bf16.mxu0 %v10704_v29  ;;  %v34_v28 = vld [vmem:[%s13786_s0 + $0x98] sm:$0xff] }
 0x116   :  { %9724 = vmatprep.subr.bf16.mxu1 %v10705_v30  ;;  %v8512_v30 = vcombine.low %v33_v27, %v33_v27 }
 0x118   :  { %9703 = vmatpush3.bf16.msra.mxu0 %v10706_v31  ;;  %v8513_v31 = vcombine.high %v33_v27, %v33_v27 }
 0x119   :  { %9725 = vmatpush3.bf16.msra.mxu1 %v10707_v32  ;;  %9704 = vmatprep.subr.bf16.mxu0 %v10708_v33  ;;  %v8514_v32 = vcombine.low %v34_v28, %v34_v28  ;;  %v8515_v33 = vcombine.high %v34_v28, %v34_v28  ;;  %v10795_v28 = vld [vmem:[%s13785_s1 + $0xbb8] sm:$0xff]  }
 0x11a   :  { %9726 = vmatprep.subr.bf16.mxu1 %v10709_v34 }
 0x11c   :  { %9705 = vmatpush3.bf16.msra.mxu0 %v10710_v35  ;;  %v10756_v35 = vld [vmem:[%s13785_s1 + $0xa78] sm:$0xff]  }
 0x11d   :  { %9727 = vmatpush3.bf16.msra.mxu1 %v10711_v36  ;;  %9706 = vmatprep.subr.bf16.mxu0 %v10712_v37  ;;  %v10757_v36 = vld [vmem:[%s13785_s1 + $0xaf8] sm:$0xff]  }
 0x11e   :  { %9728 = vmatprep.subr.bf16.mxu1 %v10713_v38  ;;  %v10758_v38 = vld [vmem:[%s13785_s1 + $0xa38] sm:$0xff]  }
 0x120   :  { %9707 = vmatpush3.bf16.msra.mxu0 %v10714_v39 }
 0x121   :  { %9729 = vmatpush3.bf16.msra.mxu1 %v10715_v40  ;;  %9736 = vmatprep.subr.bf16.mxu0 %v10720_v49 }
 0x122   :  { %9758 = vmatprep.subr.bf16.mxu1 %v10721_v51 }
 0x123   :  { %v9444_v42 = vpop.f32.mrf.mxu0  ;;  %7223 = vmatmul.mubr.bf16.vlgmr.msra.gmra.mxu0 %v8508_v43 }
 0x124   :  { %v9466_v46 = vpop.f32.mrf.mxu1  ;;  %7263 = vmatmul.mubr.bf16.vlgmr.msra.gmra.mxu1 %v8510_v47  ;;  %9737 = vmatpush3.bf16.msra.mxu0 %v10722_v54  ;;  %v10761_v47 = vld [vmem:[%s13785_s1 + $0xaf0] sm:$0xff]   ;;  %v10765_v54 = vld [vmem:[%s13785_s1 + $0xae8] sm:$0xff]  }
 0x125   :  { %v9445_v50 = vpop.f32.mrf.mxu0  ;;  %9759 = vmatpush3.bf16.msra.mxu1 %v10723_v57  ;;  %9738 = vmatprep.subr.bf16.mxu0 %v10724_v60  ;;  %v10768_v57 = vld [vmem:[%s13785_s1 + $0xa60] sm:$0xff]  }
 0x126   :  { %v9446_v52 = vadd.f32 %v9445_v50, %v9444_v42  ;;  %v9467_v53 = vpop.f32.mrf.mxu1  ;;  %9760 = vmatprep.subr.bf16.mxu1 %v10725_v63  ;;  %7302 = vmatprep.mubr.bf16.mxu0 %v8513_v31  ;;  %v10762_v50 = vld [vmem:[%s13785_s1 + $0xa30] sm:$0xff]   ;;  %v10771_v60 = vld [vmem:[%s13785_s1 + $0xaa0] sm:$0xff]   ;;  %v10774_v63 = vld [vmem:[%s13785_s1 + $0xa18] sm:$0xff]  }
 0x127   :  { %v9468_v55 = vadd.f32 %v9467_v53, %v9466_v46  ;;  %v9447_v56 = vpop.f32.mrf.mxu0  ;;  %7342 = vmatprep.mubr.bf16.mxu1 %v8515_v33  ;;  %v10760_v46 = vld [vmem:[%s13785_s1 + $0xa70] sm:$0xff]   ;;  %v10764_v53 = vld [vmem:[%s13785_s1 + $0xa68] sm:$0xff]  }
 0x128   :  { %v6745_v58 = vadd.f32 %v9446_v52, %v12120_v14  ;;  %v9469_v59 = vpop.f32.mrf.mxu1  ;;  %9739 = vmatpush3.bf16.msra.mxu0 %v10726_v1  ;;  %v10739_v14 = vld [vmem:[%s13785_s1 + $0x998] sm:$0xff]   ;;  %v10763_v52 = vld [vmem:[%s13785_s1 + $0xab0] sm:$0xff]   ;;  %v10767_v56 = vld [vmem:[%s13785_s1 + $0xaa8] sm:$0xff]  }
 0x129   :  { %v9448_v61 = vpop.f32.mrf.mxu0  ;;  %9761 = vmatpush3.bf16.msra.mxu1 %v10727_v2  ;;  %9740 = vmatprep.subr.bf16.mxu0 %v10728_v3  ;;  %v10770_v59 = vld [vmem:[%s13785_s1 + $0xa20] sm:$0xff]   ;;  %v10776_v1 = vld [vmem:[%s13785_s1 + $0xa50] sm:$0xff]  }
 0x12a   :  { %v12222_v62 = vadd.f32 %v9468_v55, %v6745_v58  ;;  %v9470_v0 = vpop.f32.mrf.mxu1  ;;  %9762 = vmatprep.subr.bf16.mxu1 %v10729_v4  ;;  %v10766_v55 = vld [vmem:[%s13785_s1 + $0xa28] sm:$0xff]   ;;  %v10769_v58 = vld [vmem:[%s13785_s1 + $0xae0] sm:$0xff]   ;;  %v10772_v61 = vld [vmem:[%s13785_s1 + $0xa58] sm:$0xff]  }
 0x12b   :  { %v10775_v0 = vld [vmem:[%s13785_s1 + $0xa98] sm:$0xff]   ;;  %v10777_v2 = vld [vmem:[%s13785_s1 + $0xad0] sm:$0xff]  }
 0x12c   :  { %9741 = vmatpush3.bf16.msra.mxu0 %v10730_v5  ;;  %v10778_v3 = vld [vmem:[%s13785_s1 + $0xa10] sm:$0xff]   ;;  %v10780_v5 = vld [vmem:[%s13785_s1 + $0xa48] sm:$0xff]  }
 0x12d   :  { %9763 = vmatpush3.bf16.msra.mxu1 %v10731_v6  ;;  %9742 = vmatprep.subr.bf16.mxu0 %v10732_v7  ;;  %v10779_v4 = vld [vmem:[%s13785_s1 + $0xa90] sm:$0xff]   ;;  %v10781_v6 = vld [vmem:[%s13785_s1 + $0xac8] sm:$0xff]  }
 0x12e   :  { %9764 = vmatprep.subr.bf16.mxu1 %v10733_v8  ;;  %v10782_v7 = vld [vmem:[%s13785_s1 + $0xa08] sm:$0xff]   ;;  %v10797_v33 = vld [vmem:[%s13785_s1 + $0xbf0] sm:$0xff]  }
 0x12f   :  { %v10783_v8 = vld [vmem:[%s13785_s1 + $0xa88] sm:$0xff]  }
 0x130   :  { %9743 = vmatpush3.bf16.msra.mxu0 %v10734_v9  ;;  %v10784_v9 = vld [vmem:[%s13785_s1 + $0xa40] sm:$0xff]  }
 0x131   :  { %9765 = vmatpush3.bf16.msra.mxu1 %v10735_v10  ;;  %9744 = vmatprep.subr.bf16.mxu0 %v10736_v11  ;;  %v10785_v10 = vld [vmem:[%s13785_s1 + $0xac0] sm:$0xff]  }
 0x132   :  { %9766 = vmatprep.subr.bf16.mxu1 %v10737_v12  ;;  %v10786_v11 = vld [vmem:[%s13785_s1 + $0xa00] sm:$0xff]  }
 0x133   :  { %v10787_v12 = vld [vmem:[%s13785_s1 + $0xa80] sm:$0xff]  }
 0x134   :  { %9745 = vmatpush3.bf16.msra.mxu0 %v10738_v13  ;;  %v35_v13 = vld [vmem:[%s13786_s0 + $0xa0] sm:$0xff] }
 0x135   :  { %9767 = vmatpush3.bf16.msra.mxu1 %v10739_v14  ;;  %9746 = vmatprep.subr.bf16.mxu0 %v10740_v15  ;;  %v36_v14 = vld [vmem:[%s13786_s0 + $0xa8] sm:$0xff] }
 0x136   :  { %9768 = vmatprep.subr.bf16.mxu1 %v10741_v16 }
 0x138   :  { %9747 = vmatpush3.bf16.msra.mxu0 %v10742_v17  ;;  %v8516_v17 = vcombine.low %v35_v13, %v35_v13 }
 0x139   :  { %9769 = vmatpush3.bf16.msra.mxu1 %v10743_v18  ;;  %9748 = vmatprep.subr.bf16.mxu0 %v10744_v19  ;;  %v8517_v18 = vcombine.high %v35_v13, %v35_v13  ;;  %v8518_v19 = vcombine.low %v36_v14, %v36_v14 }
 0x13a   :  { %9770 = vmatprep.subr.bf16.mxu1 %v10745_v20  ;;  %v10792_v20 = vld [vmem:[%s13785_s1 + $0xb78] sm:$0xff]  }
 0x13c   :  { %9749 = vmatpush3.bf16.msra.mxu0 %v10746_v21  ;;  %v8519_v21 = vcombine.high %v36_v14, %v36_v14 }
 0x13d   :  { %9771 = vmatpush3.bf16.msra.mxu1 %v10747_v22  ;;  %9750 = vmatprep.subr.bf16.mxu0 %v10748_v23  ;;  %v10793_v22 = vld [vmem:[%s13785_s1 + $0xbf8] sm:$0xff]  }
 0x13e   :  { %9772 = vmatprep.subr.bf16.mxu1 %v10749_v24 }
 0x140   :  { %9751 = vmatpush3.bf16.msra.mxu0 %v10750_v25  ;;  %v10794_v25 = vld [vmem:[%s13785_s1 + $0xb38] sm:$0xff]  }
 0x141   :  { %9773 = vmatpush3.bf16.msra.mxu1 %v10751_v26  ;;  %9780 = vmatprep.subr.bf16.mxu0 %v10756_v35 }
 0x142   :  { %9802 = vmatprep.subr.bf16.mxu1 %v10757_v36 }
 0x143   :  { %v9488_v29 = vpop.f32.mrf.mxu0  ;;  %7303 = vmatmul.mubr.bf16.vlgmr.msra.gmra.mxu0 %v8512_v30 }
 0x144   :  { %v9510_v34 = vpop.f32.mrf.mxu1  ;;  %7343 = vmatmul.mubr.bf16.vlgmr.msra.gmra.mxu1 %v8514_v32  ;;  %9781 = vmatpush3.bf16.msra.mxu0 %v10758_v38  ;;  %v10796_v32 = vld [vmem:[%s13785_s1 + $0xb70] sm:$0xff]  }
 0x145   :  { %v9489_v37 = vpop.f32.mrf.mxu0  ;;  %9803 = vmatpush3.bf16.msra.mxu1 %v10759_v41  ;;  %9782 = vmatprep.subr.bf16.mxu0 %v10760_v46  ;;  %v10799_v38 = vld [vmem:[%s13785_s1 + $0xbb0] sm:$0xff]   ;;  %v10802_v41 = vld [vmem:[%s13785_s1 + $0xb28] sm:$0xff]   ;;  %v10807_v46 = vld [vmem:[%s13785_s1 + $0xba0] sm:$0xff]  }
 0x146   :  { %v9490_v39 = vadd.f32 %v9489_v37, %v9488_v29  ;;  %v9511_v40 = vpop.f32.mrf.mxu1  ;;  %9804 = vmatprep.subr.bf16.mxu1 %v10761_v47  ;;  %7382 = vmatprep.mubr.bf16.mxu0 %v8517_v18  ;;  %v10798_v37 = vld [vmem:[%s13785_s1 + $0xb30] sm:$0xff]   ;;  %v10808_v47 = vld [vmem:[%s13785_s1 + $0xb58] sm:$0xff]  }
 0x147   :  { %v9512_v42 = vadd.f32 %v9511_v40, %v9510_v34  ;;  %v9491_v43 = vpop.f32.mrf.mxu0  ;;  %7422 = vmatprep.mubr.bf16.mxu1 %v8519_v21  ;;  %v10801_v40 = vld [vmem:[%s13785_s1 + $0xbe8] sm:$0xff]   ;;  %v10832_v18 = vld [vmem:[%s13785_s1 + $0xc70] sm:$0xff]  }
 0x148   :  { %v6825_v44 = vadd.f32 %v9490_v39, %v12222_v62  ;;  %v9513_v45 = vpop.f32.mrf.mxu1  ;;  %9783 = vmatpush3.bf16.msra.mxu0 %v10762_v50  ;;  %v10773_v62 = vld [vmem:[%s13785_s1 + $0xad8] sm:$0xff]   ;;  %v10800_v39 = vld [vmem:[%s13785_s1 + $0xb68] sm:$0xff]   ;;  %v10804_v43 = vld [vmem:[%s13785_s1 + $0xb60] sm:$0xff]  }
 0x149   :  { %v9492_v48 = vpop.f32.mrf.mxu0  ;;  %9805 = vmatpush3.bf16.msra.mxu1 %v10763_v52  ;;  %9784 = vmatprep.subr.bf16.mxu0 %v10764_v53  ;;  %v10806_v45 = vld [vmem:[%s13785_s1 + $0xb20] sm:$0xff]   ;;  %v10811_v50 = vld [vmem:[%s13785_s1 + $0xb98] sm:$0xff]   ;;  %v10813_v52 = vld [vmem:[%s13785_s1 + $0xbd0] sm:$0xff]  }
 0x14a   :  { %v12330_v49 = vadd.f32 %v9512_v42, %v6825_v44  ;;  %v9514_v51 = vpop.f32.mrf.mxu1  ;;  %9806 = vmatprep.subr.bf16.mxu1 %v10765_v54  ;;  %v10803_v42 = vld [vmem:[%s13785_s1 + $0xba8] sm:$0xff]   ;;  %v10805_v44 = vld [vmem:[%s13785_s1 + $0xbe0] sm:$0xff]   ;;  %v10809_v48 = vld [vmem:[%s13785_s1 + $0xbd8] sm:$0xff]  }
 0x14b   :  { %v10812_v51 = vld [vmem:[%s13785_s1 + $0xb50] sm:$0xff]  }
 0x14c   :  { %9785 = vmatpush3.bf16.msra.mxu0 %v10766_v55  ;;  %v10814_v53 = vld [vmem:[%s13785_s1 + $0xb10] sm:$0xff]   ;;  %v10816_v55 = vld [vmem:[%s13785_s1 + $0xb48] sm:$0xff]  }
 0x14d   :  { %9807 = vmatpush3.bf16.msra.mxu1 %v10767_v56  ;;  %9786 = vmatprep.subr.bf16.mxu0 %v10768_v57  ;;  %v10815_v54 = vld [vmem:[%s13785_s1 + $0xb90] sm:$0xff]   ;;  %v10817_v56 = vld [vmem:[%s13785_s1 + $0xbc8] sm:$0xff]  }
 0x14e   :  { %9808 = vmatprep.subr.bf16.mxu1 %v10769_v58  ;;  %v10818_v57 = vld [vmem:[%s13785_s1 + $0xb08] sm:$0xff]   ;;  %v10833_v21 = vld [vmem:[%s13785_s1 + $0xcf0] sm:$0xff]  }
 0x14f   :  { %v10819_v58 = vld [vmem:[%s13785_s1 + $0xb88] sm:$0xff]  }
 0x150   :  { %9787 = vmatpush3.bf16.msra.mxu0 %v10770_v59  ;;  %v10820_v59 = vld [vmem:[%s13785_s1 + $0xb40] sm:$0xff]  }
 0x151   :  { %9809 = vmatpush3.bf16.msra.mxu1 %v10771_v60  ;;  %9788 = vmatprep.subr.bf16.mxu0 %v10772_v61  ;;  %v10821_v60 = vld [vmem:[%s13785_s1 + $0xbc0] sm:$0xff]  }
 0x152   :  { %9810 = vmatprep.subr.bf16.mxu1 %v10773_v62  ;;  %v10822_v61 = vld [vmem:[%s13785_s1 + $0xb00] sm:$0xff]  }
 0x153   :  { %v10823_v62 = vld [vmem:[%s13785_s1 + $0xb80] sm:$0xff]  }
 0x154   :  { %9789 = vmatpush3.bf16.msra.mxu0 %v10774_v63  ;;  %v37_v63 = vld [vmem:[%s13786_s0 + $0xb0] sm:$0xff] }
 0x155   :  { %9811 = vmatpush3.bf16.msra.mxu1 %v10775_v0  ;;  %9790 = vmatprep.subr.bf16.mxu0 %v10776_v1  ;;  %v8520_v1 = vcombine.low %v37_v63, %v37_v63 }
 0x156   :  { %9812 = vmatprep.subr.bf16.mxu1 %v10777_v2  ;;  %v8521_v2 = vcombine.high %v37_v63, %v37_v63  ;;  %v10867_v63 = vld [vmem:[%s13785_s1 + $0xdb8] sm:$0xff]  }
 0x158   :  { %9791 = vmatpush3.bf16.msra.mxu0 %v10778_v3  ;;  %v38_v3 = vld [vmem:[%s13786_s0 + $0xb8] sm:$0xff] }
 0x159   :  { %9813 = vmatpush3.bf16.msra.mxu1 %v10779_v4  ;;  %9792 = vmatprep.subr.bf16.mxu0 %v10780_v5  ;;  %v8522_v5 = vcombine.low %v38_v3, %v38_v3 }
 0x15a   :  { %9814 = vmatprep.subr.bf16.mxu1 %v10781_v6  ;;  %v8523_v6 = vcombine.high %v38_v3, %v38_v3 }
 0x15c   :  { %9793 = vmatpush3.bf16.msra.mxu0 %v10782_v7  ;;  %v10828_v7 = vld [vmem:[%s13785_s1 + $0xc78] sm:$0xff]  }
 0x15d   :  { %9815 = vmatpush3.bf16.msra.mxu1 %v10783_v8  ;;  %9794 = vmatprep.subr.bf16.mxu0 %v10784_v9  ;;  %v10829_v9 = vld [vmem:[%s13785_s1 + $0xcf8] sm:$0xff]  }
 0x15e   :  { %9816 = vmatprep.subr.bf16.mxu1 %v10785_v10 }
 0x160   :  { %9795 = vmatpush3.bf16.msra.mxu0 %v10786_v11 }
 0x161   :  { %9817 = vmatpush3.bf16.msra.mxu1 %v10787_v12  ;;  %9824 = vmatprep.subr.bf16.mxu0 %v10792_v20  ;;  %v10830_v12 = vld [vmem:[%s13785_s1 + $0xc38] sm:$0xff]  }
 0x162   :  { %9846 = vmatprep.subr.bf16.mxu1 %v10793_v22 }
 0x163   :  { %v9532_v15 = vpop.f32.mrf.mxu0  ;;  %7383 = vmatmul.mubr.bf16.vlgmr.msra.gmra.mxu0 %v8516_v17 }
 0x164   :  { %v9554_v16 = vpop.f32.mrf.mxu1  ;;  %7423 = vmatmul.mubr.bf16.vlgmr.msra.gmra.mxu1 %v8518_v19  ;;  %9825 = vmatpush3.bf16.msra.mxu0 %v10794_v25  ;;  %v10836_v25 = vld [vmem:[%s13785_s1 + $0xc68] sm:$0xff]  }
 0x165   :  { %v9533_v23 = vpop.f32.mrf.mxu0  ;;  %9847 = vmatpush3.bf16.msra.mxu1 %v10795_v28  ;;  %9826 = vmatprep.subr.bf16.mxu0 %v10796_v32  ;;  %v10839_v28 = vld [vmem:[%s13785_s1 + $0xca8] sm:$0xff]   ;;  %v10843_v32 = vld [vmem:[%s13785_s1 + $0xca0] sm:$0xff]  }
 0x166   :  { %v9555_v24 = vpop.f32.mrf.mxu1  ;;  %v9534_v26 = vadd.f32 %v9533_v23, %v9532_v15  ;;  %9848 = vmatprep.subr.bf16.mxu1 %v10797_v33  ;;  %7462 = vmatprep.mubr.bf16.mxu0 %v8521_v2  ;;  %v10831_v15 = vld [vmem:[%s13785_s1 + $0xcb8] sm:$0xff]   ;;  %v10834_v23 = vld [vmem:[%s13785_s1 + $0xc30] sm:$0xff]  }
 0x167   :  { %v9556_v27 = vadd.f32 %v9555_v24, %v9554_v16  ;;  %v9535_v29 = vpop.f32.mrf.mxu0  ;;  %7502 = vmatprep.mubr.bf16.mxu1 %v8523_v6  ;;  %v10835_v24 = vld [vmem:[%s13785_s1 + $0xcb0] sm:$0xff]   ;;  %v10844_v33 = vld [vmem:[%s13785_s1 + $0xc58] sm:$0xff]  }
 0x168   :  { %v9557_v30 = vpop.f32.mrf.mxu1  ;;  %v6905_v31 = vadd.f32 %v9534_v26, %v12330_v49  ;;  %9827 = vmatpush3.bf16.msra.mxu0 %v10798_v37  ;;  %v10810_v49 = vld [vmem:[%s13785_s1 + $0xb18] sm:$0xff]   ;;  %v10837_v26 = vld [vmem:[%s13785_s1 + $0xce8] sm:$0xff]   ;;  %v10840_v29 = vld [vmem:[%s13785_s1 + $0xc60] sm:$0xff]  }
 0x169   :  { %v9536_v34 = vpop.f32.mrf.mxu0  ;;  %9849 = vmatpush3.bf16.msra.mxu1 %v10799_v38  ;;  %9828 = vmatprep.subr.bf16.mxu0 %v10800_v39  ;;  %v10841_v30 = vld [vmem:[%s13785_s1 + $0xce0] sm:$0xff]   ;;  %v10848_v37 = vld [vmem:[%s13785_s1 + $0xc50] sm:$0xff]  }
 0x16a   :  { %v9558_v35 = vpop.f32.mrf.mxu1  ;;  %v12435_v36 = vadd.f32 %v9556_v27, %v6905_v31  ;;  %9850 = vmatprep.subr.bf16.mxu1 %v10801_v40  ;;  %v10838_v27 = vld [vmem:[%s13785_s1 + $0xc28] sm:$0xff]   ;;  %v10842_v31 = vld [vmem:[%s13785_s1 + $0xc20] sm:$0xff]   ;;  %v10845_v34 = vld [vmem:[%s13785_s1 + $0xcd8] sm:$0xff]  }
 0x16b   :  { %v10846_v35 = vld [vmem:[%s13785_s1 + $0xc18] sm:$0xff]   ;;  %v10849_v38 = vld [vmem:[%s13785_s1 + $0xcd0] sm:$0xff]  }
 0x16c   :  { %9829 = vmatpush3.bf16.msra.mxu0 %v10802_v41  ;;  %v10850_v39 = vld [vmem:[%s13785_s1 + $0xc10] sm:$0xff]   ;;  %v10852_v41 = vld [vmem:[%s13785_s1 + $0xc48] sm:$0xff]  }
 0x16d   :  { %9851 = vmatpush3.bf16.msra.mxu1 %v10803_v42  ;;  %9830 = vmatprep.subr.bf16.mxu0 %v10804_v43  ;;  %v10851_v40 = vld [vmem:[%s13785_s1 + $0xc90] sm:$0xff]   ;;  %v10853_v42 = vld [vmem:[%s13785_s1 + $0xcc8] sm:$0xff]  }
 0x16e   :  { %9852 = vmatprep.subr.bf16.mxu1 %v10805_v44  ;;  %v10854_v43 = vld [vmem:[%s13785_s1 + $0xc08] sm:$0xff]  }
 0x16f   :  { %v10855_v44 = vld [vmem:[%s13785_s1 + $0xc88] sm:$0xff]  }
 0x170   :  { %9831 = vmatpush3.bf16.msra.mxu0 %v10806_v45  ;;  %v10856_v45 = vld [vmem:[%s13785_s1 + $0xc40] sm:$0xff]  }
 0x171   :  { %9853 = vmatpush3.bf16.msra.mxu1 %v10807_v46  ;;  %9832 = vmatprep.subr.bf16.mxu0 %v10808_v47  ;;  %v10857_v46 = vld [vmem:[%s13785_s1 + $0xcc0] sm:$0xff]  }
 0x172   :  { %9854 = vmatprep.subr.bf16.mxu1 %v10809_v48  ;;  %v10858_v47 = vld [vmem:[%s13785_s1 + $0xc00] sm:$0xff]  }
 0x173   :  { %v10859_v48 = vld [vmem:[%s13785_s1 + $0xc80] sm:$0xff]  }
 0x174   :  { %9833 = vmatpush3.bf16.msra.mxu0 %v10810_v49  ;;  %v39_v49 = vld [vmem:[%s13786_s0 + $0xc0] sm:$0xff] }
 0x175   :  { %9855 = vmatpush3.bf16.msra.mxu1 %v10811_v50  ;;  %9834 = vmatprep.subr.bf16.mxu0 %v10812_v51  ;;  %v40_v50 = vld [vmem:[%s13786_s0 + $0xc8] sm:$0xff] }
 0x176   :  { %9856 = vmatprep.subr.bf16.mxu1 %v10813_v52  ;;  %v8524_v52 = vcombine.low %v39_v49, %v39_v49 }
 0x178   :  { %9835 = vmatpush3.bf16.msra.mxu0 %v10814_v53  ;;  %v8525_v53 = vcombine.high %v39_v49, %v39_v49  ;;  %v10903_v49 = vld [vmem:[%s13785_s1 + $0xeb8] sm:$0xff]  }
 0x179   :  { %9857 = vmatpush3.bf16.msra.mxu1 %v10815_v54  ;;  %9836 = vmatprep.subr.bf16.mxu0 %v10816_v55  ;;  %v8526_v54 = vcombine.low %v40_v50, %v40_v50  ;;  %v8527_v55 = vcombine.high %v40_v50, %v40_v50 }
 0x17a   :  { %9858 = vmatprep.subr.bf16.mxu1 %v10817_v56 }
 0x17c   :  { %9837 = vmatpush3.bf16.msra.mxu0 %v10818_v57  ;;  %v10864_v57 = vld [vmem:[%s13785_s1 + $0xd78] sm:$0xff]  }
 0x17d   :  { %9859 = vmatpush3.bf16.msra.mxu1 %v10819_v58  ;;  %9838 = vmatprep.subr.bf16.mxu0 %v10820_v59  ;;  %v10865_v58 = vld [vmem:[%s13785_s1 + $0xdf8] sm:$0xff]  }
 0x17e   :  { %9860 = vmatprep.subr.bf16.mxu1 %v10821_v60  ;;  %v10866_v60 = vld [vmem:[%s13785_s1 + $0xd38] sm:$0xff]  }
 0x180   :  { %9839 = vmatpush3.bf16.msra.mxu0 %v10822_v61 }
 0x181   :  { %9861 = vmatpush3.bf16.msra.mxu1 %v10823_v62  ;;  %9868 = vmatprep.subr.bf16.mxu0 %v10828_v7 }
 0x182   :  { %9890 = vmatprep.subr.bf16.mxu1 %v10829_v9 }
 0x183   :  { %v9576_v0 = vpop.f32.mrf.mxu0  ;;  %7463 = vmatmul.mubr.bf16.vlgmr.msra.gmra.mxu0 %v8520_v1 }
 0x184   :  { %v9598_v4 = vpop.f32.mrf.mxu1  ;;  %7503 = vmatmul.mubr.bf16.vlgmr.msra.gmra.mxu1 %v8522_v5  ;;  %9869 = vmatpush3.bf16.msra.mxu0 %v10830_v12  ;;  %v10869_v5 = vld [vmem:[%s13785_s1 + $0xdf0] sm:$0xff]   ;;  %v10873_v12 = vld [vmem:[%s13785_s1 + $0xde8] sm:$0xff]  }
 0x185   :  { %v9577_v8 = vpop.f32.mrf.mxu0  ;;  %9891 = vmatpush3.bf16.msra.mxu1 %v10831_v15  ;;  %9870 = vmatprep.subr.bf16.mxu0 %v10832_v18  ;;  %v10876_v15 = vld [vmem:[%s13785_s1 + $0xd60] sm:$0xff]  }
 0x186   :  { %v9578_v10 = vadd.f32 %v9577_v8, %v9576_v0  ;;  %v9599_v11 = vpop.f32.mrf.mxu1  ;;  %9892 = vmatprep.subr.bf16.mxu1 %v10833_v21  ;;  %7542 = vmatprep.mubr.bf16.mxu0 %v8525_v53  ;;  %v10870_v8 = vld [vmem:[%s13785_s1 + $0xd30] sm:$0xff]   ;;  %v10879_v18 = vld [vmem:[%s13785_s1 + $0xda0] sm:$0xff]   ;;  %v10882_v21 = vld [vmem:[%s13785_s1 + $0xd18] sm:$0xff]  }
 0x187   :  { %v9600_v13 = vadd.f32 %v9599_v11, %v9598_v4  ;;  %v9579_v14 = vpop.f32.mrf.mxu0  ;;  %7582 = vmatprep.mubr.bf16.mxu1 %v8527_v55  ;;  %v10868_v4 = vld [vmem:[%s13785_s1 + $0xd70] sm:$0xff]   ;;  %v10872_v11 = vld [vmem:[%s13785_s1 + $0xd68] sm:$0xff]  }
 0x188   :  { %v6985_v16 = vadd.f32 %v9578_v10, %v12435_v36  ;;  %v9601_v17 = vpop.f32.mrf.mxu1  ;;  %9871 = vmatpush3.bf16.msra.mxu0 %v10834_v23  ;;  %v10847_v36 = vld [vmem:[%s13785_s1 + $0xc98] sm:$0xff]   ;;  %v10871_v10 = vld [vmem:[%s13785_s1 + $0xdb0] sm:$0xff]   ;;  %v10875_v14 = vld [vmem:[%s13785_s1 + $0xda8] sm:$0xff]  }
 0x189   :  { %v9580_v19 = vpop.f32.mrf.mxu0  ;;  %9893 = vmatpush3.bf16.msra.mxu1 %v10835_v24  ;;  %9872 = vmatprep.subr.bf16.mxu0 %v10836_v25  ;;  %v10878_v17 = vld [vmem:[%s13785_s1 + $0xd20] sm:$0xff]   ;;  %v10884_v23 = vld [vmem:[%s13785_s1 + $0xd50] sm:$0xff]  }
 0x18a   :  { %v12537_v20 = vadd.f32 %v9600_v13, %v6985_v16  ;;  %v9602_v22 = vpop.f32.mrf.mxu1  ;;  %9894 = vmatprep.subr.bf16.mxu1 %v10837_v26  ;;  %v10874_v13 = vld [vmem:[%s13785_s1 + $0xd28] sm:$0xff]   ;;  %v10877_v16 = vld [vmem:[%s13785_s1 + $0xde0] sm:$0xff]   ;;  %v10880_v19 = vld [vmem:[%s13785_s1 + $0xd58] sm:$0xff]  }
 0x18b   :  { %v10883_v22 = vld [vmem:[%s13785_s1 + $0xd98] sm:$0xff]   ;;  %v10885_v24 = vld [vmem:[%s13785_s1 + $0xdd0] sm:$0xff]  }
 0x18c   :  { %9873 = vmatpush3.bf16.msra.mxu0 %v10838_v27  ;;  %v10886_v25 = vld [vmem:[%s13785_s1 + $0xd10] sm:$0xff]   ;;  %v10888_v27 = vld [vmem:[%s13785_s1 + $0xd48] sm:$0xff]  }
 0x18d   :  { %9895 = vmatpush3.bf16.msra.mxu1 %v10839_v28  ;;  %9874 = vmatprep.subr.bf16.mxu0 %v10840_v29  ;;  %v10887_v26 = vld [vmem:[%s13785_s1 + $0xd90] sm:$0xff]   ;;  %v10889_v28 = vld [vmem:[%s13785_s1 + $0xdc8] sm:$0xff]  }
 0x18e   :  { %9896 = vmatprep.subr.bf16.mxu1 %v10841_v30  ;;  %v10890_v29 = vld [vmem:[%s13785_s1 + $0xd08] sm:$0xff]   ;;  %v10905_v55 = vld [vmem:[%s13785_s1 + $0xef0] sm:$0xff]  }
 0x18f   :  { %v10891_v30 = vld [vmem:[%s13785_s1 + $0xd88] sm:$0xff]  }
 0x190   :  { %9875 = vmatpush3.bf16.msra.mxu0 %v10842_v31  ;;  %v10892_v31 = vld [vmem:[%s13785_s1 + $0xd40] sm:$0xff]  }
 0x191   :  { %9897 = vmatpush3.bf16.msra.mxu1 %v10843_v32  ;;  %9876 = vmatprep.subr.bf16.mxu0 %v10844_v33  ;;  %v10893_v32 = vld [vmem:[%s13785_s1 + $0xdc0] sm:$0xff]  }
 0x192   :  { %9898 = vmatprep.subr.bf16.mxu1 %v10845_v34  ;;  %v10894_v33 = vld [vmem:[%s13785_s1 + $0xd00] sm:$0xff]  }
 0x193   :  { %v10895_v34 = vld [vmem:[%s13785_s1 + $0xd80] sm:$0xff]  }
 0x194   :  { %9877 = vmatpush3.bf16.msra.mxu0 %v10846_v35  ;;  %v41_v35 = vld [vmem:[%s13786_s0 + $0xd0] sm:$0xff] }
 0x195   :  { %9899 = vmatpush3.bf16.msra.mxu1 %v10847_v36  ;;  %9878 = vmatprep.subr.bf16.mxu0 %v10848_v37  ;;  %v42_v36 = vld [vmem:[%s13786_s0 + $0xd8] sm:$0xff] }
 0x196   :  { %9900 = vmatprep.subr.bf16.mxu1 %v10849_v38  ;;  %v8528_v38 = vcombine.low %v41_v35, %v41_v35 }
 0x198   :  { %9879 = vmatpush3.bf16.msra.mxu0 %v10850_v39  ;;  %v8529_v39 = vcombine.high %v41_v35, %v41_v35 }
 0x199   :  { %9901 = vmatpush3.bf16.msra.mxu1 %v10851_v40  ;;  %9880 = vmatprep.subr.bf16.mxu0 %v10852_v41  ;;  %v8530_v40 = vcombine.low %v42_v36, %v42_v36 }
 0x19a   :  { %9902 = vmatprep.subr.bf16.mxu1 %v10853_v42  ;;  %v10900_v42 = vld [vmem:[%s13785_s1 + $0xe78] sm:$0xff]  }
 0x19c   :  { %9881 = vmatpush3.bf16.msra.mxu0 %v10854_v43  ;;  %v8531_v43 = vcombine.high %v42_v36, %v42_v36  ;;  %v10939_v36 = vld [vmem:[%s13785_s1 + $0xfb8] sm:$0xff]  }
 0x19d   :  { %9903 = vmatpush3.bf16.msra.mxu1 %v10855_v44  ;;  %9882 = vmatprep.subr.bf16.mxu0 %v10856_v45  ;;  %v10901_v44 = vld [vmem:[%s13785_s1 + $0xef8] sm:$0xff]  }
 0x19e   :  { %9904 = vmatprep.subr.bf16.mxu1 %v10857_v46  ;;  %v10902_v46 = vld [vmem:[%s13785_s1 + $0xe38] sm:$0xff]  }
 0x1a0   :  { %9883 = vmatpush3.bf16.msra.mxu0 %v10858_v47 }
 0x1a1   :  { %9905 = vmatpush3.bf16.msra.mxu1 %v10859_v48  ;;  %9912 = vmatprep.subr.bf16.mxu0 %v10864_v57 }
 0x1a2   :  { %9934 = vmatprep.subr.bf16.mxu1 %v10865_v58  ;;  %v10906_v58 = vld [vmem:[%s13785_s1 + $0xe30] sm:$0xff]  }
 0x1a3   :  { %v9620_v51 = vpop.f32.mrf.mxu0  ;;  %7543 = vmatmul.mubr.bf16.vlgmr.msra.gmra.mxu0 %v8524_v52 }
 0x1a4   :  { %v9642_v56 = vpop.f32.mrf.mxu1  ;;  %7583 = vmatmul.mubr.bf16.vlgmr.msra.gmra.mxu1 %v8526_v54  ;;  %9913 = vmatpush3.bf16.msra.mxu0 %v10866_v60  ;;  %v10904_v54 = vld [vmem:[%s13785_s1 + $0xe70] sm:$0xff]  }
 0x1a5   :  { %v9621_v59 = vpop.f32.mrf.mxu0  ;;  %9935 = vmatpush3.bf16.msra.mxu1 %v10867_v63  ;;  %9914 = vmatprep.subr.bf16.mxu0 %v10868_v4  ;;  %v10907_v60 = vld [vmem:[%s13785_s1 + $0xeb0] sm:$0xff]   ;;  %v10910_v63 = vld [vmem:[%s13785_s1 + $0xe28] sm:$0xff]   ;;  %v10915_v4 = vld [vmem:[%s13785_s1 + $0xea0] sm:$0xff]  }
 0x1a6   :  { %v9622_v61 = vadd.f32 %v9621_v59, %v9620_v51  ;;  %v9643_v62 = vpop.f32.mrf.mxu1  ;;  %9936 = vmatprep.subr.bf16.mxu1 %v10869_v5  ;;  %7622 = vmatprep.mubr.bf16.mxu0 %v8529_v39  ;;  %v10916_v5 = vld [vmem:[%s13785_s1 + $0xe58] sm:$0xff]  }
 0x1a7   :  { %v9644_v0 = vadd.f32 %v9643_v62, %v9642_v56  ;;  %v9623_v1 = vpop.f32.mrf.mxu0  ;;  %7662 = vmatprep.mubr.bf16.mxu1 %v8531_v43  ;;  %v10909_v62 = vld [vmem:[%s13785_s1 + $0xee8] sm:$0xff]  }
 0x1a8   :  { %v7065_v2 = vadd.f32 %v9622_v61, %v12537_v20  ;;  %v9645_v3 = vpop.f32.mrf.mxu1  ;;  %9915 = vmatpush3.bf16.msra.mxu0 %v10870_v8  ;;  %v10881_v20 = vld [vmem:[%s13785_s1 + $0xdd8] sm:$0xff]   ;;  %v10908_v61 = vld [vmem:[%s13785_s1 + $0xe68] sm:$0xff]   ;;  %v10912_v1 = vld [vmem:[%s13785_s1 + $0xe60] sm:$0xff]  }
 0x1a9   :  { %v9624_v6 = vpop.f32.mrf.mxu0  ;;  %9937 = vmatpush3.bf16.msra.mxu1 %v10871_v10  ;;  %9916 = vmatprep.subr.bf16.mxu0 %v10872_v11  ;;  %v10914_v3 = vld [vmem:[%s13785_s1 + $0xe20] sm:$0xff]   ;;  %v10919_v8 = vld [vmem:[%s13785_s1 + $0xe98] sm:$0xff]   ;;  %v10921_v10 = vld [vmem:[%s13785_s1 + $0xed0] sm:$0xff]  }
 0x1aa   :  { %v12645_v7 = vadd.f32 %v9644_v0, %v7065_v2  ;;  %v9646_v9 = vpop.f32.mrf.mxu1  ;;  %9938 = vmatprep.subr.bf16.mxu1 %v10873_v12  ;;  %v10911_v0 = vld [vmem:[%s13785_s1 + $0xea8] sm:$0xff]   ;;  %v10913_v2 = vld [vmem:[%s13785_s1 + $0xee0] sm:$0xff]   ;;  %v10917_v6 = vld [vmem:[%s13785_s1 + $0xed8] sm:$0xff]  }
 0x1ab   :  { %v10920_v9 = vld [vmem:[%s13785_s1 + $0xe50] sm:$0xff]  }
 0x1ac   :  { %9917 = vmatpush3.bf16.msra.mxu0 %v10874_v13  ;;  %v10922_v11 = vld [vmem:[%s13785_s1 + $0xe10] sm:$0xff]   ;;  %v10924_v13 = vld [vmem:[%s13785_s1 + $0xe48] sm:$0xff]  }
 0x1ad   :  { %9939 = vmatpush3.bf16.msra.mxu1 %v10875_v14  ;;  %9918 = vmatprep.subr.bf16.mxu0 %v10876_v15  ;;  %v10923_v12 = vld [vmem:[%s13785_s1 + $0xe90] sm:$0xff]   ;;  %v10925_v14 = vld [vmem:[%s13785_s1 + $0xec8] sm:$0xff]  }
 0x1ae   :  { %9940 = vmatprep.subr.bf16.mxu1 %v10877_v16  ;;  %v10926_v15 = vld [vmem:[%s13785_s1 + $0xe08] sm:$0xff]  }
 0x1af   :  { %v10927_v16 = vld [vmem:[%s13785_s1 + $0xe88] sm:$0xff]  }
 0x1b0   :  { %9919 = vmatpush3.bf16.msra.mxu0 %v10878_v17  ;;  %v10928_v17 = vld [vmem:[%s13785_s1 + $0xe40] sm:$0xff]  }
 0x1b1   :  { %9941 = vmatpush3.bf16.msra.mxu1 %v10879_v18  ;;  %9920 = vmatprep.subr.bf16.mxu0 %v10880_v19  ;;  %v10929_v18 = vld [vmem:[%s13785_s1 + $0xec0] sm:$0xff]  }
 0x1b2   :  { %9942 = vmatprep.subr.bf16.mxu1 %v10881_v20  ;;  %v10930_v19 = vld [vmem:[%s13785_s1 + $0xe00] sm:$0xff]  }
 0x1b3   :  { %v10931_v20 = vld [vmem:[%s13785_s1 + $0xe80] sm:$0xff]  }
 0x1b4   :  { %9921 = vmatpush3.bf16.msra.mxu0 %v10882_v21  ;;  %v43_v21 = vld [vmem:[%s13786_s0 + $0xe0] sm:$0xff] }
 0x1b5   :  { %9943 = vmatpush3.bf16.msra.mxu1 %v10883_v22  ;;  %9922 = vmatprep.subr.bf16.mxu0 %v10884_v23  ;;  %v8532_v22 = vcombine.low %v43_v21, %v43_v21  ;;  %v8533_v23 = vcombine.high %v43_v21, %v43_v21  ;;  %v10975_v21 = vld [vmem:[%s13785_s1 + $0x10b8] sm:$0xff]  }
 0x1b6   :  { %9944 = vmatprep.subr.bf16.mxu1 %v10885_v24  ;;  %v44_v24 = vld [vmem:[%s13786_s0 + $0xe8] sm:$0xff] }
 0x1b8   :  { %9923 = vmatpush3.bf16.msra.mxu0 %v10886_v25 }
 0x1b9   :  { %9945 = vmatpush3.bf16.msra.mxu1 %v10887_v26  ;;  %9924 = vmatprep.subr.bf16.mxu0 %v10888_v27  ;;  %v8534_v27 = vcombine.low %v44_v24, %v44_v24 }
 0x1ba   :  { %9946 = vmatprep.subr.bf16.mxu1 %v10889_v28  ;;  %v8535_v28 = vcombine.high %v44_v24, %v44_v24 }
 0x1bc   :  { %9925 = vmatpush3.bf16.msra.mxu0 %v10890_v29  ;;  %v10936_v29 = vld [vmem:[%s13785_s1 + $0xf78] sm:$0xff]  }
 0x1bd   :  { %9947 = vmatpush3.bf16.msra.mxu1 %v10891_v30  ;;  %9926 = vmatprep.subr.bf16.mxu0 %v10892_v31  ;;  %v10937_v30 = vld [vmem:[%s13785_s1 + $0xff8] sm:$0xff]  }
 0x1be   :  { %9948 = vmatprep.subr.bf16.mxu1 %v10893_v32 }
 0x1c0   :  { %9927 = vmatpush3.bf16.msra.mxu0 %v10894_v33  ;;  %v10938_v33 = vld [vmem:[%s13785_s1 + $0xf38] sm:$0xff]  }
 0x1c1   :  { %9949 = vmatpush3.bf16.msra.mxu1 %v10895_v34  ;;  %9956 = vmatprep.subr.bf16.mxu0 %v10900_v42 }
 0x1c2   :  { %9978 = vmatprep.subr.bf16.mxu1 %v10901_v44 }
 0x1c3   :  { %v9664_v37 = vpop.f32.mrf.mxu0  ;;  %7623 = vmatmul.mubr.bf16.vlgmr.msra.gmra.mxu0 %v8528_v38 }
 0x1c4   :  { %v9686_v41 = vpop.f32.mrf.mxu1  ;;  %7663 = vmatmul.mubr.bf16.vlgmr.msra.gmra.mxu1 %v8530_v40  ;;  %9957 = vmatpush3.bf16.msra.mxu0 %v10902_v46  ;;  %v10940_v40 = vld [vmem:[%s13785_s1 + $0xf70] sm:$0xff]  }
 0x1c5   :  { %v9665_v45 = vpop.f32.mrf.mxu0  ;;  %9979 = vmatpush3.bf16.msra.mxu1 %v10903_v49  ;;  %9958 = vmatprep.subr.bf16.mxu0 %v10904_v54  ;;  %v10943_v46 = vld [vmem:[%s13785_s1 + $0xfb0] sm:$0xff]   ;;  %v10946_v49 = vld [vmem:[%s13785_s1 + $0xf28] sm:$0xff]   ;;  %v10951_v54 = vld [vmem:[%s13785_s1 + $0xfa0] sm:$0xff]  }
 0x1c6   :  { %v9666_v47 = vadd.f32 %v9665_v45, %v9664_v37  ;;  %v9687_v48 = vpop.f32.mrf.mxu1  ;;  %9980 = vmatprep.subr.bf16.mxu1 %v10905_v55  ;;  %7702 = vmatprep.mubr.bf16.mxu0 %v8533_v23  ;;  %v10942_v45 = vld [vmem:[%s13785_s1 + $0xf30] sm:$0xff]   ;;  %v10952_v55 = vld [vmem:[%s13785_s1 + $0xf58] sm:$0xff]  }
 0x1c7   :  { %v9688_v50 = vadd.f32 %v9687_v48, %v9686_v41  ;;  %v9667_v51 = vpop.f32.mrf.mxu0  ;;  %7742 = vmatprep.mubr.bf16.mxu1 %v8535_v28  ;;  %v10941_v41 = vld [vmem:[%s13785_s1 + $0xff0] sm:$0xff]   ;;  %v10945_v48 = vld [vmem:[%s13785_s1 + $0xfe8] sm:$0xff]  }
 0x1c8   :  { %v7145_v52 = vadd.f32 %v9666_v47, %v12645_v7  ;;  %v9689_v53 = vpop.f32.mrf.mxu1  ;;  %9959 = vmatpush3.bf16.msra.mxu0 %v10906_v58  ;;  %v10918_v7 = vld [vmem:[%s13785_s1 + $0xe18] sm:$0xff]   ;;  %v10944_v47 = vld [vmem:[%s13785_s1 + $0xf68] sm:$0xff]   ;;  %v10948_v51 = vld [vmem:[%s13785_s1 + $0xf60] sm:$0xff]  }
 0x1c9   :  { %v9668_v56 = vpop.f32.mrf.mxu0  ;;  %9981 = vmatpush3.bf16.msra.mxu1 %v10907_v60  ;;  %9960 = vmatprep.subr.bf16.mxu0 %v10908_v61  ;;  %v10950_v53 = vld [vmem:[%s13785_s1 + $0xf20] sm:$0xff]   ;;  %v10955_v58 = vld [vmem:[%s13785_s1 + $0xf98] sm:$0xff]   ;;  %v10957_v60 = vld [vmem:[%s13785_s1 + $0xfd0] sm:$0xff]  }
 0x1ca   :  { %v12750_v57 = vadd.f32 %v9688_v50, %v7145_v52  ;;  %v9690_v59 = vpop.f32.mrf.mxu1  ;;  %9982 = vmatprep.subr.bf16.mxu1 %v10909_v62  ;;  %v10947_v50 = vld [vmem:[%s13785_s1 + $0xfa8] sm:$0xff]   ;;  %v10949_v52 = vld [vmem:[%s13785_s1 + $0xfe0] sm:$0xff]   ;;  %v10953_v56 = vld [vmem:[%s13785_s1 + $0xfd8] sm:$0xff]  }
 0x1cb   :  { %v10956_v59 = vld [vmem:[%s13785_s1 + $0xf50] sm:$0xff]  }
 0x1cc   :  { %9961 = vmatpush3.bf16.msra.mxu0 %v10910_v63  ;;  %v10958_v61 = vld [vmem:[%s13785_s1 + $0xf10] sm:$0xff]   ;;  %v10960_v63 = vld [vmem:[%s13785_s1 + $0xf48] sm:$0xff]  }
 0x1cd   :  { %9983 = vmatpush3.bf16.msra.mxu1 %v10911_v0  ;;  %9962 = vmatprep.subr.bf16.mxu0 %v10912_v1  ;;  %v10959_v62 = vld [vmem:[%s13785_s1 + $0xf90] sm:$0xff]   ;;  %v10961_v0 = vld [vmem:[%s13785_s1 + $0xfc8] sm:$0xff]  }
 0x1ce   :  { %9984 = vmatprep.subr.bf16.mxu1 %v10913_v2  ;;  %v10962_v1 = vld [vmem:[%s13785_s1 + $0xf08] sm:$0xff]  }
 0x1cf   :  { %v10963_v2 = vld [vmem:[%s13785_s1 + $0xf88] sm:$0xff]  }
 0x1d0   :  { %9963 = vmatpush3.bf16.msra.mxu0 %v10914_v3  ;;  %v10964_v3 = vld [vmem:[%s13785_s1 + $0xf40] sm:$0xff]  }
 0x1d1   :  { %9985 = vmatpush3.bf16.msra.mxu1 %v10915_v4  ;;  %9964 = vmatprep.subr.bf16.mxu0 %v10916_v5  ;;  %v10965_v4 = vld [vmem:[%s13785_s1 + $0xfc0] sm:$0xff]  }
 0x1d2   :  { %9986 = vmatprep.subr.bf16.mxu1 %v10917_v6  ;;  %v10966_v5 = vld [vmem:[%s13785_s1 + $0xf00] sm:$0xff]  }
 0x1d3   :  { %v10967_v6 = vld [vmem:[%s13785_s1 + $0xf80] sm:$0xff]  }
 0x1d4   :  { %9965 = vmatpush3.bf16.msra.mxu0 %v10918_v7  ;;  %v45_v7 = vld [vmem:[%s13786_s0 + $0xf0] sm:$0xff] }
 0x1d5   :  { %9987 = vmatpush3.bf16.msra.mxu1 %v10919_v8  ;;  %9966 = vmatprep.subr.bf16.mxu0 %v10920_v9  ;;  %v46_v8 = vld [vmem:[%s13786_s0 + $0xf8] sm:$0xff] }
 0x1d6   :  { %9988 = vmatprep.subr.bf16.mxu1 %v10921_v10  ;;  %v8536_v10 = vcombine.low %v45_v7, %v45_v7 }
 0x1d8   :  { %9967 = vmatpush3.bf16.msra.mxu0 %v10922_v11  ;;  %v8537_v11 = vcombine.high %v45_v7, %v45_v7  ;;  %v11011_v7 = vld [vmem:[%s13785_s1 + $0x11b8] sm:$0xff]  }
 0x1d9   :  { %9989 = vmatpush3.bf16.msra.mxu1 %v10923_v12  ;;  %9968 = vmatprep.subr.bf16.mxu0 %v10924_v13  ;;  %v8538_v12 = vcombine.low %v46_v8, %v46_v8  ;;  %v8539_v13 = vcombine.high %v46_v8, %v46_v8 }
 0x1da   :  { %9990 = vmatprep.subr.bf16.mxu1 %v10925_v14 }
 0x1dc   :  { %9969 = vmatpush3.bf16.msra.mxu0 %v10926_v15  ;;  %v10972_v15 = vld [vmem:[%s13785_s1 + $0x1078] sm:$0xff]  }
 0x1dd   :  { %9991 = vmatpush3.bf16.msra.mxu1 %v10927_v16  ;;  %9970 = vmatprep.subr.bf16.mxu0 %v10928_v17  ;;  %v10973_v16 = vld [vmem:[%s13785_s1 + $0x10f8] sm:$0xff]  }
 0x1de   :  { %9992 = vmatprep.subr.bf16.mxu1 %v10929_v18  ;;  %v10974_v18 = vld [vmem:[%s13785_s1 + $0x1038] sm:$0xff]  }
 0x1e0   :  { %9971 = vmatpush3.bf16.msra.mxu0 %v10930_v19 }
 0x1e1   :  { %9993 = vmatpush3.bf16.msra.mxu1 %v10931_v20  ;;  %10000 = vmatprep.subr.bf16.mxu0 %v10936_v29 }
 0x1e2   :  { %10022 = vmatprep.subr.bf16.mxu1 %v10937_v30  ;;  %v10978_v30 = vld [vmem:[%s13785_s1 + $0x1030] sm:$0xff]  }
 0x1e3   :  { %v9708_v25 = vpop.f32.mrf.mxu0  ;;  %7703 = vmatmul.mubr.bf16.vlgmr.msra.gmra.mxu0 %v8532_v22 }
 0x1e4   :  { %v9730_v26 = vpop.f32.mrf.mxu1  ;;  %7743 = vmatmul.mubr.bf16.vlgmr.msra.gmra.mxu1 %v8534_v27  ;;  %10001 = vmatpush3.bf16.msra.mxu0 %v10938_v33  ;;  %v10977_v27 = vld [vmem:[%s13785_s1 + $0x10f0] sm:$0xff]   ;;  %v10980_v33 = vld [vmem:[%s13785_s1 + $0x1068] sm:$0xff]  }
 0x1e5   :  { %v9709_v31 = vpop.f32.mrf.mxu0  ;;  %10023 = vmatpush3.bf16.msra.mxu1 %v10939_v36  ;;  %10002 = vmatprep.subr.bf16.mxu0 %v10940_v40  ;;  %v10983_v36 = vld [vmem:[%s13785_s1 + $0x10a8] sm:$0xff]   ;;  %v10987_v40 = vld [vmem:[%s13785_s1 + $0x10a0] sm:$0xff]  }
 0x1e6   :  { %v9731_v32 = vpop.f32.mrf.mxu1  ;;  %v9710_v34 = vadd.f32 %v9709_v31, %v9708_v25  ;;  %10024 = vmatprep.subr.bf16.mxu1 %v10941_v41  ;;  %7782 = vmatprep.mubr.bf16.mxu0 %v8537_v11  ;;  %v10988_v41 = vld [vmem:[%s13785_s1 + $0x1058] sm:$0xff]  }
 0x1e7   :  { %v9732_v35 = vadd.f32 %v9731_v32, %v9730_v26  ;;  %v9711_v37 = vpop.f32.mrf.mxu0  ;;  %7822 = vmatprep.mubr.bf16.mxu1 %v8539_v13  ;;  %v10976_v26 = vld [vmem:[%s13785_s1 + $0x1070] sm:$0xff]  }
 0x1e8   :  { %v9733_v38 = vpop.f32.mrf.mxu1  ;;  %v7225_v39 = vadd.f32 %v9710_v34, %v12750_v57  ;;  %10003 = vmatpush3.bf16.msra.mxu0 %v10942_v45  ;;  %v10954_v57 = vld [vmem:[%s13785_s1 + $0xf18] sm:$0xff]   ;;  %v10979_v32 = vld [vmem:[%s13785_s1 + $0x10b0] sm:$0xff]   ;;  %v10981_v34 = vld [vmem:[%s13785_s1 + $0x10e8] sm:$0xff]  }
 0x1e9   :  { %v9712_v42 = vpop.f32.mrf.mxu0  ;;  %10025 = vmatpush3.bf16.msra.mxu1 %v10943_v46  ;;  %10004 = vmatprep.subr.bf16.mxu0 %v10944_v47  ;;  %v10984_v37 = vld [vmem:[%s13785_s1 + $0x1060] sm:$0xff]   ;;  %v10992_v45 = vld [vmem:[%s13785_s1 + $0x1050] sm:$0xff]  }
 0x1ea   :  { %v9734_v43 = vpop.f32.mrf.mxu1  ;;  %v12855_v44 = vadd.f32 %v9732_v35, %v7225_v39  ;;  %10026 = vmatprep.subr.bf16.mxu1 %v10945_v48  ;;  %v10982_v35 = vld [vmem:[%s13785_s1 + $0x1028] sm:$0xff]   ;;  %v10985_v38 = vld [vmem:[%s13785_s1 + $0x10e0] sm:$0xff]   ;;  %v10989_v42 = vld [vmem:[%s13785_s1 + $0x10d8] sm:$0xff]  }
 0x1eb   :  { %v10986_v39 = vld [vmem:[%s13785_s1 + $0x1020] sm:$0xff]   ;;  %v10990_v43 = vld [vmem:[%s13785_s1 + $0x1018] sm:$0xff]   ;;  %v10993_v46 = vld [vmem:[%s13785_s1 + $0x10d0] sm:$0xff]  }
 0x1ec   :  { %10005 = vmatpush3.bf16.msra.mxu0 %v10946_v49  ;;  %v10994_v47 = vld [vmem:[%s13785_s1 + $0x1010] sm:$0xff]   ;;  %v10996_v49 = vld [vmem:[%s13785_s1 + $0x1048] sm:$0xff]  }
 0x1ed   :  { %10027 = vmatpush3.bf16.msra.mxu1 %v10947_v50  ;;  %10006 = vmatprep.subr.bf16.mxu0 %v10948_v51  ;;  %v10995_v48 = vld [vmem:[%s13785_s1 + $0x1090] sm:$0xff]   ;;  %v10997_v50 = vld [vmem:[%s13785_s1 + $0x10c8] sm:$0xff]  }
 0x1ee   :  { %10028 = vmatprep.subr.bf16.mxu1 %v10949_v52  ;;  %v10998_v51 = vld [vmem:[%s13785_s1 + $0x1008] sm:$0xff]   ;;  %v11013_v13 = vld [vmem:[%s13785_s1 + $0x11f0] sm:$0xff]  }
 0x1ef   :  { %v10999_v52 = vld [vmem:[%s13785_s1 + $0x1088] sm:$0xff]  }
 0x1f0   :  { %10007 = vmatpush3.bf16.msra.mxu0 %v10950_v53  ;;  %v11000_v53 = vld [vmem:[%s13785_s1 + $0x1040] sm:$0xff]  }
 0x1f1   :  { %10029 = vmatpush3.bf16.msra.mxu1 %v10951_v54  ;;  %10008 = vmatprep.subr.bf16.mxu0 %v10952_v55  ;;  %v11001_v54 = vld [vmem:[%s13785_s1 + $0x10c0] sm:$0xff]  }
 0x1f2   :  { %10030 = vmatprep.subr.bf16.mxu1 %v10953_v56  ;;  %v11002_v55 = vld [vmem:[%s13785_s1 + $0x1000] sm:$0xff]  }
 0x1f3   :  { %v11003_v56 = vld [vmem:[%s13785_s1 + $0x1080] sm:$0xff]  }
 0x1f4   :  { %10009 = vmatpush3.bf16.msra.mxu0 %v10954_v57  ;;  %v47_v57 = vld [vmem:[%s13786_s0 + $0x100] sm:$0xff] }
 0x1f5   :  { %10031 = vmatpush3.bf16.msra.mxu1 %v10955_v58  ;;  %10010 = vmatprep.subr.bf16.mxu0 %v10956_v59  ;;  %v48_v58 = vld [vmem:[%s13786_s0 + $0x108] sm:$0xff] }
 0x1f6   :  { %10032 = vmatprep.subr.bf16.mxu1 %v10957_v60  ;;  %v8540_v60 = vcombine.low %v47_v57, %v47_v57 }
 0x1f8   :  { %10011 = vmatpush3.bf16.msra.mxu0 %v10958_v61  ;;  %v8541_v61 = vcombine.high %v47_v57, %v47_v57 }
 0x1f9   :  { %10033 = vmatpush3.bf16.msra.mxu1 %v10959_v62  ;;  %10012 = vmatprep.subr.bf16.mxu0 %v10960_v63  ;;  %v8542_v62 = vcombine.low %v48_v58, %v48_v58 }
 0x1fa   :  { %10034 = vmatprep.subr.bf16.mxu1 %v10961_v0  ;;  %v11008_v0 = vld [vmem:[%s13785_s1 + $0x1178] sm:$0xff]  }
 0x1fc   :  { %10013 = vmatpush3.bf16.msra.mxu0 %v10962_v1  ;;  %v8543_v1 = vcombine.high %v48_v58, %v48_v58  ;;  %v11047_v58 = vld [vmem:[%s13785_s1 + $0x12b8] sm:$0xff]  }
 0x1fd   :  { %10035 = vmatpush3.bf16.msra.mxu1 %v10963_v2  ;;  %10014 = vmatprep.subr.bf16.mxu0 %v10964_v3  ;;  %v11009_v2 = vld [vmem:[%s13785_s1 + $0x11f8] sm:$0xff]  }
 0x1fe   :  { %10036 = vmatprep.subr.bf16.mxu1 %v10965_v4  ;;  %v11010_v4 = vld [vmem:[%s13785_s1 + $0x1138] sm:$0xff]  }
 0x200   :  { %10015 = vmatpush3.bf16.msra.mxu0 %v10966_v5 }
 0x201   :  { %10037 = vmatpush3.bf16.msra.mxu1 %v10967_v6  ;;  %10044 = vmatprep.subr.bf16.mxu0 %v10972_v15 }
 0x202   :  { %10066 = vmatprep.subr.bf16.mxu1 %v10973_v16  ;;  %v11014_v16 = vld [vmem:[%s13785_s1 + $0x1130] sm:$0xff]  }
 0x203   :  { %v9752_v9 = vpop.f32.mrf.mxu0  ;;  %7783 = vmatmul.mubr.bf16.vlgmr.msra.gmra.mxu0 %v8536_v10 }
 0x204   :  { %v9774_v14 = vpop.f32.mrf.mxu1  ;;  %7823 = vmatmul.mubr.bf16.vlgmr.msra.gmra.mxu1 %v8538_v12  ;;  %10045 = vmatpush3.bf16.msra.mxu0 %v10974_v18  ;;  %v11012_v12 = vld [vmem:[%s13785_s1 + $0x1170] sm:$0xff]  }
 0x205   :  { %v9753_v17 = vpop.f32.mrf.mxu0  ;;  %10067 = vmatpush3.bf16.msra.mxu1 %v10975_v21  ;;  %10046 = vmatprep.subr.bf16.mxu0 %v10976_v26  ;;  %v11015_v18 = vld [vmem:[%s13785_s1 + $0x11b0] sm:$0xff]   ;;  %v11018_v21 = vld [vmem:[%s13785_s1 + $0x1128] sm:$0xff]   ;;  %v11023_v26 = vld [vmem:[%s13785_s1 + $0x11a0] sm:$0xff]  }
 0x206   :  { %v9754_v19 = vadd.f32 %v9753_v17, %v9752_v9  ;;  %v9775_v20 = vpop.f32.mrf.mxu1  ;;  %10068 = vmatprep.subr.bf16.mxu1 %v10977_v27  ;;  %7862 = vmatprep.mubr.bf16.mxu0 %v8541_v61  ;;  %v11024_v27 = vld [vmem:[%s13785_s1 + $0x1158] sm:$0xff]  }
 0x207   :  { %v9776_v22 = vadd.f32 %v9775_v20, %v9774_v14  ;;  %v9755_v23 = vpop.f32.mrf.mxu0  ;;  %7902 = vmatprep.mubr.bf16.mxu1 %v8543_v1  ;;  %v11017_v20 = vld [vmem:[%s13785_s1 + $0x11e8] sm:$0xff]  }
 0x208   :  { %v7305_v24 = vadd.f32 %v9754_v19, %v12855_v44  ;;  %v9777_v25 = vpop.f32.mrf.mxu1  ;;  %10047 = vmatpush3.bf16.msra.mxu0 %v10978_v30  ;;  %v10991_v44 = vld [vmem:[%s13785_s1 + $0x1098] sm:$0xff]   ;;  %v11016_v19 = vld [vmem:[%s13785_s1 + $0x1168] sm:$0xff]   ;;  %v11020_v23 = vld [vmem:[%s13785_s1 + $0x1160] sm:$0xff]  }
 0x209   :  { %v9756_v28 = vpop.f32.mrf.mxu0  ;;  %10069 = vmatpush3.bf16.msra.mxu1 %v10979_v32  ;;  %10048 = vmatprep.subr.bf16.mxu0 %v10980_v33  ;;  %v11022_v25 = vld [vmem:[%s13785_s1 + $0x1120] sm:$0xff]   ;;  %v11027_v30 = vld [vmem:[%s13785_s1 + $0x1198] sm:$0xff]   ;;  %v11029_v32 = vld [vmem:[%s13785_s1 + $0x11d0] sm:$0xff]  }
 0x20a   :  { %v12960_v29 = vadd.f32 %v9776_v22, %v7305_v24  ;;  %v9778_v31 = vpop.f32.mrf.mxu1  ;;  %10070 = vmatprep.subr.bf16.mxu1 %v10981_v34  ;;  %v11019_v22 = vld [vmem:[%s13785_s1 + $0x11a8] sm:$0xff]   ;;  %v11021_v24 = vld [vmem:[%s13785_s1 + $0x11e0] sm:$0xff]   ;;  %v11025_v28 = vld [vmem:[%s13785_s1 + $0x11d8] sm:$0xff]  }
 0x20b   :  { %v11028_v31 = vld [vmem:[%s13785_s1 + $0x1150] sm:$0xff]  }
 0x20c   :  { %10049 = vmatpush3.bf16.msra.mxu0 %v10982_v35  ;;  %v11030_v33 = vld [vmem:[%s13785_s1 + $0x1110] sm:$0xff]   ;;  %v11032_v35 = vld [vmem:[%s13785_s1 + $0x1148] sm:$0xff]  }
 0x20d   :  { %10071 = vmatpush3.bf16.msra.mxu1 %v10983_v36  ;;  %10050 = vmatprep.subr.bf16.mxu0 %v10984_v37  ;;  %v11031_v34 = vld [vmem:[%s13785_s1 + $0x1190] sm:$0xff]   ;;  %v11033_v36 = vld [vmem:[%s13785_s1 + $0x11c8] sm:$0xff]  }
 0x20e   :  { %10072 = vmatprep.subr.bf16.mxu1 %v10985_v38  ;;  %v11034_v37 = vld [vmem:[%s13785_s1 + $0x1108] sm:$0xff]  }
 0x20f   :  { %v11035_v38 = vld [vmem:[%s13785_s1 + $0x1188] sm:$0xff]  }
 0x210   :  { %10051 = vmatpush3.bf16.msra.mxu0 %v10986_v39  ;;  %v11036_v39 = vld [vmem:[%s13785_s1 + $0x1140] sm:$0xff]  }
 0x211   :  { %10073 = vmatpush3.bf16.msra.mxu1 %v10987_v40  ;;  %10052 = vmatprep.subr.bf16.mxu0 %v10988_v41  ;;  %v11037_v40 = vld [vmem:[%s13785_s1 + $0x11c0] sm:$0xff]  }
 0x212   :  { %10074 = vmatprep.subr.bf16.mxu1 %v10989_v42  ;;  %v11038_v41 = vld [vmem:[%s13785_s1 + $0x1100] sm:$0xff]  }
 0x213   :  { %v11039_v42 = vld [vmem:[%s13785_s1 + $0x1180] sm:$0xff]  }
 0x214   :  { %10053 = vmatpush3.bf16.msra.mxu0 %v10990_v43  ;;  %v49_v43 = vld [vmem:[%s13786_s0 + $0x110] sm:$0xff] }
 0x215   :  { %10075 = vmatpush3.bf16.msra.mxu1 %v10991_v44  ;;  %10054 = vmatprep.subr.bf16.mxu0 %v10992_v45  ;;  %v8544_v44 = vcombine.low %v49_v43, %v49_v43  ;;  %v8545_v45 = vcombine.high %v49_v43, %v49_v43  ;;  %v11083_v43 = vld [vmem:[%s13785_s1 + $0x13b8] sm:$0xff]  }
 0x216   :  { %10076 = vmatprep.subr.bf16.mxu1 %v10993_v46  ;;  %v50_v46 = vld [vmem:[%s13786_s0 + $0x118] sm:$0xff] }
 0x218   :  { %10055 = vmatpush3.bf16.msra.mxu0 %v10994_v47 }
 0x219   :  { %10077 = vmatpush3.bf16.msra.mxu1 %v10995_v48  ;;  %10056 = vmatprep.subr.bf16.mxu0 %v10996_v49  ;;  %v8546_v49 = vcombine.low %v50_v46, %v50_v46 }
 0x21a   :  { %10078 = vmatprep.subr.bf16.mxu1 %v10997_v50  ;;  %v8547_v50 = vcombine.high %v50_v46, %v50_v46 }
 0x21c   :  { %10057 = vmatpush3.bf16.msra.mxu0 %v10998_v51  ;;  %v11044_v51 = vld [vmem:[%s13785_s1 + $0x1278] sm:$0xff]  }
 0x21d   :  { %10079 = vmatpush3.bf16.msra.mxu1 %v10999_v52  ;;  %10058 = vmatprep.subr.bf16.mxu0 %v11000_v53  ;;  %v11045_v52 = vld [vmem:[%s13785_s1 + $0x12f8] sm:$0xff]  }
 0x21e   :  { %10080 = vmatprep.subr.bf16.mxu1 %v11001_v54 }
 0x220   :  { %10059 = vmatpush3.bf16.msra.mxu0 %v11002_v55  ;;  %v11046_v55 = vld [vmem:[%s13785_s1 + $0x1238] sm:$0xff]  }
 0x221   :  { %10081 = vmatpush3.bf16.msra.mxu1 %v11003_v56  ;;  %10088 = vmatprep.subr.bf16.mxu0 %v11008_v0 }
 0x222   :  { %10110 = vmatprep.subr.bf16.mxu1 %v11009_v2 }
 0x223   :  { %v9796_v59 = vpop.f32.mrf.mxu0  ;;  %7863 = vmatmul.mubr.bf16.vlgmr.msra.gmra.mxu0 %v8540_v60 }
 0x224   :  { %v9818_v63 = vpop.f32.mrf.mxu1  ;;  %7903 = vmatmul.mubr.bf16.vlgmr.msra.gmra.mxu1 %v8542_v62  ;;  %10089 = vmatpush3.bf16.msra.mxu0 %v11010_v4  ;;  %v11048_v62 = vld [vmem:[%s13785_s1 + $0x1270] sm:$0xff]  }
 0x225   :  { %v9797_v3 = vpop.f32.mrf.mxu0  ;;  %10111 = vmatpush3.bf16.msra.mxu1 %v11011_v7  ;;  %10090 = vmatprep.subr.bf16.mxu0 %v11012_v12  ;;  %v11051_v4 = vld [vmem:[%s13785_s1 + $0x12b0] sm:$0xff]   ;;  %v11054_v7 = vld [vmem:[%s13785_s1 + $0x1228] sm:$0xff]   ;;  %v11059_v12 = vld [vmem:[%s13785_s1 + $0x12a0] sm:$0xff]  }
 0x226   :  { %v9798_v5 = vadd.f32 %v9797_v3, %v9796_v59  ;;  %v9819_v6 = vpop.f32.mrf.mxu1  ;;  %10112 = vmatprep.subr.bf16.mxu1 %v11013_v13  ;;  %7942 = vmatprep.mubr.bf16.mxu0 %v8545_v45  ;;  %v11050_v3 = vld [vmem:[%s13785_s1 + $0x1230] sm:$0xff]   ;;  %v11060_v13 = vld [vmem:[%s13785_s1 + $0x1258] sm:$0xff]  }
 0x227   :  { %v9820_v8 = vadd.f32 %v9819_v6, %v9818_v63  ;;  %v9799_v9 = vpop.f32.mrf.mxu0  ;;  %7982 = vmatprep.mubr.bf16.mxu1 %v8547_v50  ;;  %v11049_v63 = vld [vmem:[%s13785_s1 + $0x12f0] sm:$0xff]   ;;  %v11053_v6 = vld [vmem:[%s13785_s1 + $0x12e8] sm:$0xff]  }
 0x228   :  { %v7385_v10 = vadd.f32 %v9798_v5, %v12960_v29  ;;  %v9821_v11 = vpop.f32.mrf.mxu1  ;;  %10091 = vmatpush3.bf16.msra.mxu0 %v11014_v16  ;;  %v11026_v29 = vld [vmem:[%s13785_s1 + $0x1118] sm:$0xff]   ;;  %v11052_v5 = vld [vmem:[%s13785_s1 + $0x1268] sm:$0xff]   ;;  %v11056_v9 = vld [vmem:[%s13785_s1 + $0x1260] sm:$0xff]  }
 0x229   :  { %v9800_v14 = vpop.f32.mrf.mxu0  ;;  %10113 = vmatpush3.bf16.msra.mxu1 %v11015_v18  ;;  %10092 = vmatprep.subr.bf16.mxu0 %v11016_v19  ;;  %v11058_v11 = vld [vmem:[%s13785_s1 + $0x1220] sm:$0xff]   ;;  %v11063_v16 = vld [vmem:[%s13785_s1 + $0x1298] sm:$0xff]   ;;  %v11065_v18 = vld [vmem:[%s13785_s1 + $0x12d0] sm:$0xff]  }
 0x22a   :  { %v13065_v15 = vadd.f32 %v9820_v8, %v7385_v10  ;;  %v9822_v17 = vpop.f32.mrf.mxu1  ;;  %10114 = vmatprep.subr.bf16.mxu1 %v11017_v20  ;;  %v11055_v8 = vld [vmem:[%s13785_s1 + $0x12a8] sm:$0xff]   ;;  %v11057_v10 = vld [vmem:[%s13785_s1 + $0x12e0] sm:$0xff]   ;;  %v11061_v14 = vld [vmem:[%s13785_s1 + $0x12d8] sm:$0xff]  }
 0x22b   :  { %v11064_v17 = vld [vmem:[%s13785_s1 + $0x1250] sm:$0xff]  }
 0x22c   :  { %10093 = vmatpush3.bf16.msra.mxu0 %v11018_v21  ;;  %v11066_v19 = vld [vmem:[%s13785_s1 + $0x1210] sm:$0xff]   ;;  %v11068_v21 = vld [vmem:[%s13785_s1 + $0x1248] sm:$0xff]  }
 0x22d   :  { %10115 = vmatpush3.bf16.msra.mxu1 %v11019_v22  ;;  %10094 = vmatprep.subr.bf16.mxu0 %v11020_v23  ;;  %v11067_v20 = vld [vmem:[%s13785_s1 + $0x1290] sm:$0xff]   ;;  %v11069_v22 = vld [vmem:[%s13785_s1 + $0x12c8] sm:$0xff]  }
 0x22e   :  { %10116 = vmatprep.subr.bf16.mxu1 %v11021_v24  ;;  %v11070_v23 = vld [vmem:[%s13785_s1 + $0x1208] sm:$0xff]  }
 0x22f   :  { %v11071_v24 = vld [vmem:[%s13785_s1 + $0x1288] sm:$0xff]  }
 0x230   :  { %10095 = vmatpush3.bf16.msra.mxu0 %v11022_v25  ;;  %v11072_v25 = vld [vmem:[%s13785_s1 + $0x1240] sm:$0xff]  }
 0x231   :  { %10117 = vmatpush3.bf16.msra.mxu1 %v11023_v26  ;;  %10096 = vmatprep.subr.bf16.mxu0 %v11024_v27  ;;  %v11073_v26 = vld [vmem:[%s13785_s1 + $0x12c0] sm:$0xff]  }
 0x232   :  { %10118 = vmatprep.subr.bf16.mxu1 %v11025_v28  ;;  %v11074_v27 = vld [vmem:[%s13785_s1 + $0x1200] sm:$0xff]  }
 0x233   :  { %v11075_v28 = vld [vmem:[%s13785_s1 + $0x1280] sm:$0xff]  }
 0x234   :  { %10097 = vmatpush3.bf16.msra.mxu0 %v11026_v29  ;;  %v51_v29 = vld [vmem:[%s13786_s0 + $0x120] sm:$0xff] }
 0x235   :  { %10119 = vmatpush3.bf16.msra.mxu1 %v11027_v30  ;;  %10098 = vmatprep.subr.bf16.mxu0 %v11028_v31  ;;  %v52_v30 = vld [vmem:[%s13786_s0 + $0x128] sm:$0xff] }
 0x236   :  { %10120 = vmatprep.subr.bf16.mxu1 %v11029_v32  ;;  %v8548_v32 = vcombine.low %v51_v29, %v51_v29 }
 0x238   :  { %10099 = vmatpush3.bf16.msra.mxu0 %v11030_v33  ;;  %v8549_v33 = vcombine.high %v51_v29, %v51_v29  ;;  %v11119_v29 = vld [vmem:[%s13785_s1 + $0x14b8] sm:$0xff]  }
 0x239   :  { %10121 = vmatpush3.bf16.msra.mxu1 %v11031_v34  ;;  %10100 = vmatprep.subr.bf16.mxu0 %v11032_v35  ;;  %v8550_v34 = vcombine.low %v52_v30, %v52_v30  ;;  %v8551_v35 = vcombine.high %v52_v30, %v52_v30 }
 0x23a   :  { %10122 = vmatprep.subr.bf16.mxu1 %v11033_v36 }
 0x23c   :  { %10101 = vmatpush3.bf16.msra.mxu0 %v11034_v37  ;;  %v11080_v37 = vld [vmem:[%s13785_s1 + $0x1378] sm:$0xff]  }
 0x23d   :  { %10123 = vmatpush3.bf16.msra.mxu1 %v11035_v38  ;;  %10102 = vmatprep.subr.bf16.mxu0 %v11036_v39  ;;  %v11081_v38 = vld [vmem:[%s13785_s1 + $0x13f8] sm:$0xff]  }
 0x23e   :  { %10124 = vmatprep.subr.bf16.mxu1 %v11037_v40  ;;  %v11082_v40 = vld [vmem:[%s13785_s1 + $0x1338] sm:$0xff]  }
 0x240   :  { %10103 = vmatpush3.bf16.msra.mxu0 %v11038_v41 }
 0x241   :  { %10125 = vmatpush3.bf16.msra.mxu1 %v11039_v42  ;;  %10132 = vmatprep.subr.bf16.mxu0 %v11044_v51 }
 0x242   :  { %10154 = vmatprep.subr.bf16.mxu1 %v11045_v52  ;;  %v11086_v52 = vld [vmem:[%s13785_s1 + $0x1330] sm:$0xff]  }
 0x243   :  { %v9840_v47 = vpop.f32.mrf.mxu0  ;;  %7943 = vmatmul.mubr.bf16.vlgmr.msra.gmra.mxu0 %v8544_v44 }
 0x244   :  { %v9862_v48 = vpop.f32.mrf.mxu1  ;;  %7983 = vmatmul.mubr.bf16.vlgmr.msra.gmra.mxu1 %v8546_v49  ;;  %10133 = vmatpush3.bf16.msra.mxu0 %v11046_v55  ;;  %v11085_v49 = vld [vmem:[%s13785_s1 + $0x13f0] sm:$0xff]   ;;  %v11088_v55 = vld [vmem:[%s13785_s1 + $0x1368] sm:$0xff]  }
 0x245   :  { %v9841_v53 = vpop.f32.mrf.mxu0  ;;  %10155 = vmatpush3.bf16.msra.mxu1 %v11047_v58  ;;  %10134 = vmatprep.subr.bf16.mxu0 %v11048_v62  ;;  %v11091_v58 = vld [vmem:[%s13785_s1 + $0x13a8] sm:$0xff]   ;;  %v11095_v62 = vld [vmem:[%s13785_s1 + $0x13a0] sm:$0xff]  }
 0x246   :  { %v9863_v54 = vpop.f32.mrf.mxu1  ;;  %v9842_v56 = vadd.f32 %v9841_v53, %v9840_v47  ;;  %10156 = vmatprep.subr.bf16.mxu1 %v11049_v63  ;;  %8022 = vmatprep.mubr.bf16.mxu0 %v8549_v33  ;;  %v11096_v63 = vld [vmem:[%s13785_s1 + $0x1358] sm:$0xff]  }
 0x247   :  { %v9864_v57 = vadd.f32 %v9863_v54, %v9862_v48  ;;  %v9843_v59 = vpop.f32.mrf.mxu0  ;;  %8062 = vmatprep.mubr.bf16.mxu1 %v8551_v35  ;;  %v11084_v48 = vld [vmem:[%s13785_s1 + $0x1370] sm:$0xff]  }
 0x248   :  { %v9865_v60 = vpop.f32.mrf.mxu1  ;;  %v7465_v61 = vadd.f32 %v9842_v56, %v13065_v15  ;;  %10135 = vmatpush3.bf16.msra.mxu0 %v11050_v3  ;;  %v11062_v15 = vld [vmem:[%s13785_s1 + $0x1218] sm:$0xff]   ;;  %v11087_v54 = vld [vmem:[%s13785_s1 + $0x13b0] sm:$0xff]   ;;  %v11089_v56 = vld [vmem:[%s13785_s1 + $0x13e8] sm:$0xff]  }
 0x249   :  { %v9844_v0 = vpop.f32.mrf.mxu0  ;;  %10157 = vmatpush3.bf16.msra.mxu1 %v11051_v4  ;;  %10136 = vmatprep.subr.bf16.mxu0 %v11052_v5  ;;  %v11092_v59 = vld [vmem:[%s13785_s1 + $0x1360] sm:$0xff]   ;;  %v11100_v3 = vld [vmem:[%s13785_s1 + $0x1350] sm:$0xff]  }
 0x24a   :  { %v9866_v1 = vpop.f32.mrf.mxu1  ;;  %v13170_v2 = vadd.f32 %v9864_v57, %v7465_v61  ;;  %10158 = vmatprep.subr.bf16.mxu1 %v11053_v6  ;;  %v11090_v57 = vld [vmem:[%s13785_s1 + $0x1328] sm:$0xff]   ;;  %v11093_v60 = vld [vmem:[%s13785_s1 + $0x13e0] sm:$0xff]   ;;  %v11097_v0 = vld [vmem:[%s13785_s1 + $0x13d8] sm:$0xff]  }
 0x24b   :  { %v11094_v61 = vld [vmem:[%s13785_s1 + $0x1320] sm:$0xff]   ;;  %v11098_v1 = vld [vmem:[%s13785_s1 + $0x1318] sm:$0xff]   ;;  %v11101_v4 = vld [vmem:[%s13785_s1 + $0x13d0] sm:$0xff]  }
 0x24c   :  { %10137 = vmatpush3.bf16.msra.mxu0 %v11054_v7  ;;  %v11102_v5 = vld [vmem:[%s13785_s1 + $0x1310] sm:$0xff]   ;;  %v11104_v7 = vld [vmem:[%s13785_s1 + $0x1348] sm:$0xff]  }
 0x24d   :  { %10159 = vmatpush3.bf16.msra.mxu1 %v11055_v8  ;;  %10138 = vmatprep.subr.bf16.mxu0 %v11056_v9  ;;  %v11103_v6 = vld [vmem:[%s13785_s1 + $0x1390] sm:$0xff]   ;;  %v11105_v8 = vld [vmem:[%s13785_s1 + $0x13c8] sm:$0xff]  }
 0x24e   :  { %10160 = vmatprep.subr.bf16.mxu1 %v11057_v10  ;;  %v11106_v9 = vld [vmem:[%s13785_s1 + $0x1308] sm:$0xff]   ;;  %v11121_v35 = vld [vmem:[%s13785_s1 + $0x14f0] sm:$0xff]  }
 0x24f   :  { %v11107_v10 = vld [vmem:[%s13785_s1 + $0x1388] sm:$0xff]  }
 0x250   :  { %10139 = vmatpush3.bf16.msra.mxu0 %v11058_v11  ;;  %v11108_v11 = vld [vmem:[%s13785_s1 + $0x1340] sm:$0xff]  }
 0x251   :  { %10161 = vmatpush3.bf16.msra.mxu1 %v11059_v12  ;;  %10140 = vmatprep.subr.bf16.mxu0 %v11060_v13  ;;  %v11109_v12 = vld [vmem:[%s13785_s1 + $0x13c0] sm:$0xff]  }
 0x252   :  { %10162 = vmatprep.subr.bf16.mxu1 %v11061_v14  ;;  %v11110_v13 = vld [vmem:[%s13785_s1 + $0x1300] sm:$0xff]  }
 0x253   :  { %v11111_v14 = vld [vmem:[%s13785_s1 + $0x1380] sm:$0xff]  }
 0x254   :  { %10141 = vmatpush3.bf16.msra.mxu0 %v11062_v15  ;;  %v53_v15 = vld [vmem:[%s13786_s0 + $0x130] sm:$0xff] }
 0x255   :  { %10163 = vmatpush3.bf16.msra.mxu1 %v11063_v16  ;;  %10142 = vmatprep.subr.bf16.mxu0 %v11064_v17  ;;  %v54_v16 = vld [vmem:[%s13786_s0 + $0x138] sm:$0xff] }
 0x256   :  { %10164 = vmatprep.subr.bf16.mxu1 %v11065_v18  ;;  %v8552_v18 = vcombine.low %v53_v15, %v53_v15 }
 0x258   :  { %10143 = vmatpush3.bf16.msra.mxu0 %v11066_v19  ;;  %v8553_v19 = vcombine.high %v53_v15, %v53_v15 }
 0x259   :  { %10165 = vmatpush3.bf16.msra.mxu1 %v11067_v20  ;;  %10144 = vmatprep.subr.bf16.mxu0 %v11068_v21  ;;  %v8554_v20 = vcombine.low %v54_v16, %v54_v16 }
 0x25a   :  { %10166 = vmatprep.subr.bf16.mxu1 %v11069_v22  ;;  %v11116_v22 = vld [vmem:[%s13785_s1 + $0x1478] sm:$0xff]  }
 0x25c   :  { %10145 = vmatpush3.bf16.msra.mxu0 %v11070_v23  ;;  %v8555_v23 = vcombine.high %v54_v16, %v54_v16  ;;  %v11155_v16 = vld [vmem:[%s13785_s1 + $0x15b8] sm:$0xff]  }
 0x25d   :  { %10167 = vmatpush3.bf16.msra.mxu1 %v11071_v24  ;;  %10146 = vmatprep.subr.bf16.mxu0 %v11072_v25  ;;  %v11117_v24 = vld [vmem:[%s13785_s1 + $0x14f8] sm:$0xff]  }
 0x25e   :  { %10168 = vmatprep.subr.bf16.mxu1 %v11073_v26  ;;  %v11118_v26 = vld [vmem:[%s13785_s1 + $0x1438] sm:$0xff]  }
 0x260   :  { %10147 = vmatpush3.bf16.msra.mxu0 %v11074_v27 }
 0x261   :  { %10169 = vmatpush3.bf16.msra.mxu1 %v11075_v28  ;;  %10176 = vmatprep.subr.bf16.mxu0 %v11080_v37 }
 0x262   :  { %10198 = vmatprep.subr.bf16.mxu1 %v11081_v38  ;;  %v11122_v38 = vld [vmem:[%s13785_s1 + $0x1430] sm:$0xff]  }
 0x263   :  { %v9884_v31 = vpop.f32.mrf.mxu0  ;;  %8023 = vmatmul.mubr.bf16.vlgmr.msra.gmra.mxu0 %v8548_v32 }
 0x264   :  { %v9906_v36 = vpop.f32.mrf.mxu1  ;;  %8063 = vmatmul.mubr.bf16.vlgmr.msra.gmra.mxu1 %v8550_v34  ;;  %10177 = vmatpush3.bf16.msra.mxu0 %v11082_v40  ;;  %v11120_v34 = vld [vmem:[%s13785_s1 + $0x1470] sm:$0xff]  }
 0x265   :  { %v9885_v39 = vpop.f32.mrf.mxu0  ;;  %10199 = vmatpush3.bf16.msra.mxu1 %v11083_v43  ;;  %10178 = vmatprep.subr.bf16.mxu0 %v11084_v48  ;;  %v11123_v40 = vld [vmem:[%s13785_s1 + $0x14b0] sm:$0xff]   ;;  %v11126_v43 = vld [vmem:[%s13785_s1 + $0x1428] sm:$0xff]   ;;  %v11131_v48 = vld [vmem:[%s13785_s1 + $0x14a0] sm:$0xff]  }
 0x266   :  { %v9886_v41 = vadd.f32 %v9885_v39, %v9884_v31  ;;  %v9907_v42 = vpop.f32.mrf.mxu1  ;;  %10200 = vmatprep.subr.bf16.mxu1 %v11085_v49  ;;  %8102 = vmatprep.mubr.bf16.mxu0 %v8553_v19  ;;  %v11132_v49 = vld [vmem:[%s13785_s1 + $0x1458] sm:$0xff]  }
 0x267   :  { %v9908_v44 = vadd.f32 %v9907_v42, %v9906_v36  ;;  %v9887_v45 = vpop.f32.mrf.mxu0  ;;  %8142 = vmatprep.mubr.bf16.mxu1 %v8555_v23  ;;  %v11125_v42 = vld [vmem:[%s13785_s1 + $0x14e8] sm:$0xff]  }
 0x268   :  { %v7545_v46 = vadd.f32 %v9886_v41, %v13170_v2  ;;  %v9909_v47 = vpop.f32.mrf.mxu1  ;;  %10179 = vmatpush3.bf16.msra.mxu0 %v11086_v52  ;;  %v11099_v2 = vld [vmem:[%s13785_s1 + $0x1398] sm:$0xff]   ;;  %v11124_v41 = vld [vmem:[%s13785_s1 + $0x1468] sm:$0xff]   ;;  %v11128_v45 = vld [vmem:[%s13785_s1 + $0x1460] sm:$0xff]  }
 0x269   :  { %v9888_v50 = vpop.f32.mrf.mxu0  ;;  %10201 = vmatpush3.bf16.msra.mxu1 %v11087_v54  ;;  %10180 = vmatprep.subr.bf16.mxu0 %v11088_v55  ;;  %v11130_v47 = vld [vmem:[%s13785_s1 + $0x1420] sm:$0xff]   ;;  %v11135_v52 = vld [vmem:[%s13785_s1 + $0x1498] sm:$0xff]   ;;  %v11137_v54 = vld [vmem:[%s13785_s1 + $0x14d0] sm:$0xff]  }
 0x26a   :  { %v13275_v51 = vadd.f32 %v9908_v44, %v7545_v46  ;;  %v9910_v53 = vpop.f32.mrf.mxu1  ;;  %10202 = vmatprep.subr.bf16.mxu1 %v11089_v56  ;;  %v11127_v44 = vld [vmem:[%s13785_s1 + $0x14a8] sm:$0xff]   ;;  %v11129_v46 = vld [vmem:[%s13785_s1 + $0x14e0] sm:$0xff]   ;;  %v11133_v50 = vld [vmem:[%s13785_s1 + $0x14d8] sm:$0xff]  }
 0x26b   :  { %v11136_v53 = vld [vmem:[%s13785_s1 + $0x1450] sm:$0xff]  }
 0x26c   :  { %10181 = vmatpush3.bf16.msra.mxu0 %v11090_v57  ;;  %v11138_v55 = vld [vmem:[%s13785_s1 + $0x1410] sm:$0xff]   ;;  %v11140_v57 = vld [vmem:[%s13785_s1 + $0x1448] sm:$0xff]  }
 0x26d   :  { %10203 = vmatpush3.bf16.msra.mxu1 %v11091_v58  ;;  %10182 = vmatprep.subr.bf16.mxu0 %v11092_v59  ;;  %v11139_v56 = vld [vmem:[%s13785_s1 + $0x1490] sm:$0xff]   ;;  %v11141_v58 = vld [vmem:[%s13785_s1 + $0x14c8] sm:$0xff]  }
 0x26e   :  { %10204 = vmatprep.subr.bf16.mxu1 %v11093_v60  ;;  %v11142_v59 = vld [vmem:[%s13785_s1 + $0x1408] sm:$0xff]  }
 0x26f   :  { %v11143_v60 = vld [vmem:[%s13785_s1 + $0x1488] sm:$0xff]  }
 0x270   :  { %10183 = vmatpush3.bf16.msra.mxu0 %v11094_v61  ;;  %v11144_v61 = vld [vmem:[%s13785_s1 + $0x1440] sm:$0xff]  }
 0x271   :  { %10205 = vmatpush3.bf16.msra.mxu1 %v11095_v62  ;;  %10184 = vmatprep.subr.bf16.mxu0 %v11096_v63  ;;  %v11145_v62 = vld [vmem:[%s13785_s1 + $0x14c0] sm:$0xff]  }
 0x272   :  { %10206 = vmatprep.subr.bf16.mxu1 %v11097_v0  ;;  %v11146_v63 = vld [vmem:[%s13785_s1 + $0x1400] sm:$0xff]  }
 0x273   :  { %v11147_v0 = vld [vmem:[%s13785_s1 + $0x1480] sm:$0xff]  }
 0x274   :  { %10185 = vmatpush3.bf16.msra.mxu0 %v11098_v1  ;;  %v55_v1 = vld [vmem:[%s13786_s0 + $0x140] sm:$0xff] }
 0x275   :  { %10207 = vmatpush3.bf16.msra.mxu1 %v11099_v2  ;;  %10186 = vmatprep.subr.bf16.mxu0 %v11100_v3  ;;  %v8556_v2 = vcombine.low %v55_v1, %v55_v1  ;;  %v8557_v3 = vcombine.high %v55_v1, %v55_v1  ;;  %v11191_v1 = vld [vmem:[%s13785_s1 + $0x16b8] sm:$0xff]  }
 0x276   :  { %10208 = vmatprep.subr.bf16.mxu1 %v11101_v4  ;;  %v56_v4 = vld [vmem:[%s13786_s0 + $0x148] sm:$0xff] }
 0x278   :  { %10187 = vmatpush3.bf16.msra.mxu0 %v11102_v5 }
 0x279   :  { %10209 = vmatpush3.bf16.msra.mxu1 %v11103_v6  ;;  %10188 = vmatprep.subr.bf16.mxu0 %v11104_v7  ;;  %v8558_v7 = vcombine.low %v56_v4, %v56_v4 }
 0x27a   :  { %10210 = vmatprep.subr.bf16.mxu1 %v11105_v8  ;;  %v8559_v8 = vcombine.high %v56_v4, %v56_v4 }
 0x27c   :  { %10189 = vmatpush3.bf16.msra.mxu0 %v11106_v9  ;;  %v11152_v9 = vld [vmem:[%s13785_s1 + $0x1578] sm:$0xff]  }
 0x27d   :  { %10211 = vmatpush3.bf16.msra.mxu1 %v11107_v10  ;;  %10190 = vmatprep.subr.bf16.mxu0 %v11108_v11  ;;  %v11153_v10 = vld [vmem:[%s13785_s1 + $0x15f8] sm:$0xff]  }
 0x27e   :  { %10212 = vmatprep.subr.bf16.mxu1 %v11109_v12 }
 0x280   :  { %10191 = vmatpush3.bf16.msra.mxu0 %v11110_v13  ;;  %v11154_v13 = vld [vmem:[%s13785_s1 + $0x1538] sm:$0xff]  }
 0x281   :  { %10213 = vmatpush3.bf16.msra.mxu1 %v11111_v14  ;;  %10220 = vmatprep.subr.bf16.mxu0 %v11116_v22 }
 0x282   :  { %10242 = vmatprep.subr.bf16.mxu1 %v11117_v24 }
 0x283   :  { %v9928_v17 = vpop.f32.mrf.mxu0  ;;  %8103 = vmatmul.mubr.bf16.vlgmr.msra.gmra.mxu0 %v8552_v18 }
 0x284   :  { %v9950_v21 = vpop.f32.mrf.mxu1  ;;  %8143 = vmatmul.mubr.bf16.vlgmr.msra.gmra.mxu1 %v8554_v20  ;;  %10221 = vmatpush3.bf16.msra.mxu0 %v11118_v26  ;;  %v11156_v20 = vld [vmem:[%s13785_s1 + $0x1570] sm:$0xff]  }
 0x285   :  { %v9929_v25 = vpop.f32.mrf.mxu0  ;;  %10243 = vmatpush3.bf16.msra.mxu1 %v11119_v29  ;;  %10222 = vmatprep.subr.bf16.mxu0 %v11120_v34  ;;  %v11159_v26 = vld [vmem:[%s13785_s1 + $0x15b0] sm:$0xff]   ;;  %v11162_v29 = vld [vmem:[%s13785_s1 + $0x1528] sm:$0xff]   ;;  %v11167_v34 = vld [vmem:[%s13785_s1 + $0x15a0] sm:$0xff]  }
 0x286   :  { %v9930_v27 = vadd.f32 %v9929_v25, %v9928_v17  ;;  %v9951_v28 = vpop.f32.mrf.mxu1  ;;  %10244 = vmatprep.subr.bf16.mxu1 %v11121_v35  ;;  %8182 = vmatprep.mubr.bf16.mxu0 %v8557_v3  ;;  %v11158_v25 = vld [vmem:[%s13785_s1 + $0x1530] sm:$0xff]   ;;  %v11168_v35 = vld [vmem:[%s13785_s1 + $0x1558] sm:$0xff]  }
 0x287   :  { %v9952_v30 = vadd.f32 %v9951_v28, %v9950_v21  ;;  %v9931_v31 = vpop.f32.mrf.mxu0  ;;  %8222 = vmatprep.mubr.bf16.mxu1 %v8559_v8  ;;  %v11157_v21 = vld [vmem:[%s13785_s1 + $0x15f0] sm:$0xff]   ;;  %v11161_v28 = vld [vmem:[%s13785_s1 + $0x15e8] sm:$0xff]  }
 0x288   :  { %v7625_v32 = vadd.f32 %v9930_v27, %v13275_v51  ;;  %v9953_v33 = vpop.f32.mrf.mxu1  ;;  %10223 = vmatpush3.bf16.msra.mxu0 %v11122_v38  ;;  %v11134_v51 = vld [vmem:[%s13785_s1 + $0x1418] sm:$0xff]   ;;  %v11160_v27 = vld [vmem:[%s13785_s1 + $0x1568] sm:$0xff]   ;;  %v11164_v31 = vld [vmem:[%s13785_s1 + $0x1560] sm:$0xff]  }
 0x289   :  { %v9932_v36 = vpop.f32.mrf.mxu0  ;;  %10245 = vmatpush3.bf16.msra.mxu1 %v11123_v40  ;;  %10224 = vmatprep.subr.bf16.mxu0 %v11124_v41  ;;  %v11166_v33 = vld [vmem:[%s13785_s1 + $0x1520] sm:$0xff]   ;;  %v11171_v38 = vld [vmem:[%s13785_s1 + $0x1598] sm:$0xff]   ;;  %v11173_v40 = vld [vmem:[%s13785_s1 + $0x15d0] sm:$0xff]  }
 0x28a   :  { %v13380_v37 = vadd.f32 %v9952_v30, %v7625_v32  ;;  %v9954_v39 = vpop.f32.mrf.mxu1  ;;  %10246 = vmatprep.subr.bf16.mxu1 %v11125_v42  ;;  %v11163_v30 = vld [vmem:[%s13785_s1 + $0x15a8] sm:$0xff]   ;;  %v11165_v32 = vld [vmem:[%s13785_s1 + $0x15e0] sm:$0xff]   ;;  %v11169_v36 = vld [vmem:[%s13785_s1 + $0x15d8] sm:$0xff]  }
 0x28b   :  { %v11172_v39 = vld [vmem:[%s13785_s1 + $0x1550] sm:$0xff]  }
 0x28c   :  { %10225 = vmatpush3.bf16.msra.mxu0 %v11126_v43  ;;  %v11174_v41 = vld [vmem:[%s13785_s1 + $0x1510] sm:$0xff]   ;;  %v11176_v43 = vld [vmem:[%s13785_s1 + $0x1548] sm:$0xff]  }
 0x28d   :  { %10247 = vmatpush3.bf16.msra.mxu1 %v11127_v44  ;;  %10226 = vmatprep.subr.bf16.mxu0 %v11128_v45  ;;  %v11175_v42 = vld [vmem:[%s13785_s1 + $0x1590] sm:$0xff]   ;;  %v11177_v44 = vld [vmem:[%s13785_s1 + $0x15c8] sm:$0xff]  }
 0x28e   :  { %10248 = vmatprep.subr.bf16.mxu1 %v11129_v46  ;;  %v11178_v45 = vld [vmem:[%s13785_s1 + $0x1508] sm:$0xff]  }
 0x28f   :  { %v11179_v46 = vld [vmem:[%s13785_s1 + $0x1588] sm:$0xff]  }
 0x290   :  { %10227 = vmatpush3.bf16.msra.mxu0 %v11130_v47  ;;  %v11180_v47 = vld [vmem:[%s13785_s1 + $0x1540] sm:$0xff]  }
 0x291   :  { %10249 = vmatpush3.bf16.msra.mxu1 %v11131_v48  ;;  %10228 = vmatprep.subr.bf16.mxu0 %v11132_v49  ;;  %v11181_v48 = vld [vmem:[%s13785_s1 + $0x15c0] sm:$0xff]  }
 0x292   :  { %10250 = vmatprep.subr.bf16.mxu1 %v11133_v50  ;;  %v11182_v49 = vld [vmem:[%s13785_s1 + $0x1500] sm:$0xff]  }
 0x293   :  { %v11183_v50 = vld [vmem:[%s13785_s1 + $0x1580] sm:$0xff]  }
 0x294   :  { %10229 = vmatpush3.bf16.msra.mxu0 %v11134_v51  ;;  %v57_v51 = vld [vmem:[%s13786_s0 + $0x150] sm:$0xff] }
 0x295   :  { %10251 = vmatpush3.bf16.msra.mxu1 %v11135_v52  ;;  %10230 = vmatprep.subr.bf16.mxu0 %v11136_v53  ;;  %v58_v52 = vld [vmem:[%s13786_s0 + $0x158] sm:$0xff] }
 0x296   :  { %10252 = vmatprep.subr.bf16.mxu1 %v11137_v54  ;;  %v8560_v54 = vcombine.low %v57_v51, %v57_v51 }
 0x298   :  { %10231 = vmatpush3.bf16.msra.mxu0 %v11138_v55  ;;  %v8561_v55 = vcombine.high %v57_v51, %v57_v51  ;;  %v11227_v51 = vld [vmem:[%s13785_s1 + $0x17b8] sm:$0xff]  }
 0x299   :  { %10253 = vmatpush3.bf16.msra.mxu1 %v11139_v56  ;;  %10232 = vmatprep.subr.bf16.mxu0 %v11140_v57  ;;  %v8562_v56 = vcombine.low %v58_v52, %v58_v52  ;;  %v8563_v57 = vcombine.high %v58_v52, %v58_v52 }
 0x29a   :  { %10254 = vmatprep.subr.bf16.mxu1 %v11141_v58 }
 0x29c   :  { %10233 = vmatpush3.bf16.msra.mxu0 %v11142_v59  ;;  %v11188_v59 = vld [vmem:[%s13785_s1 + $0x1678] sm:$0xff]  }
 0x29d   :  { %10255 = vmatpush3.bf16.msra.mxu1 %v11143_v60  ;;  %10234 = vmatprep.subr.bf16.mxu0 %v11144_v61  ;;  %v11189_v60 = vld [vmem:[%s13785_s1 + $0x16f8] sm:$0xff]  }
 0x29e   :  { %10256 = vmatprep.subr.bf16.mxu1 %v11145_v62  ;;  %v11190_v62 = vld [vmem:[%s13785_s1 + $0x1638] sm:$0xff]  }
 0x2a0   :  { %10235 = vmatpush3.bf16.msra.mxu0 %v11146_v63 }
 0x2a1   :  { %10257 = vmatpush3.bf16.msra.mxu1 %v11147_v0  ;;  %10264 = vmatprep.subr.bf16.mxu0 %v11152_v9 }
 0x2a2   :  { %10286 = vmatprep.subr.bf16.mxu1 %v11153_v10  ;;  %v11194_v10 = vld [vmem:[%s13785_s1 + $0x1630] sm:$0xff]  }
 0x2a3   :  { %v9972_v5 = vpop.f32.mrf.mxu0  ;;  %8183 = vmatmul.mubr.bf16.vlgmr.msra.gmra.mxu0 %v8556_v2 }
 0x2a4   :  { %v9994_v6 = vpop.f32.mrf.mxu1  ;;  %8223 = vmatmul.mubr.bf16.vlgmr.msra.gmra.mxu1 %v8558_v7  ;;  %10265 = vmatpush3.bf16.msra.mxu0 %v11154_v13  ;;  %v11193_v7 = vld [vmem:[%s13785_s1 + $0x16f0] sm:$0xff]   ;;  %v11196_v13 = vld [vmem:[%s13785_s1 + $0x1668] sm:$0xff]  }
 0x2a5   :  { %v9973_v11 = vpop.f32.mrf.mxu0  ;;  %10287 = vmatpush3.bf16.msra.mxu1 %v11155_v16  ;;  %10266 = vmatprep.subr.bf16.mxu0 %v11156_v20  ;;  %v11199_v16 = vld [vmem:[%s13785_s1 + $0x16a8] sm:$0xff]   ;;  %v11203_v20 = vld [vmem:[%s13785_s1 + $0x16a0] sm:$0xff]  }
 0x2a6   :  { %v9995_v12 = vpop.f32.mrf.mxu1  ;;  %v9974_v14 = vadd.f32 %v9973_v11, %v9972_v5  ;;  %10288 = vmatprep.subr.bf16.mxu1 %v11157_v21  ;;  %8262 = vmatprep.mubr.bf16.mxu0 %v8561_v55  ;;  %v11204_v21 = vld [vmem:[%s13785_s1 + $0x1658] sm:$0xff]  }
 0x2a7   :  { %v9996_v15 = vadd.f32 %v9995_v12, %v9994_v6  ;;  %v9975_v17 = vpop.f32.mrf.mxu0  ;;  %8302 = vmatprep.mubr.bf16.mxu1 %v8563_v57  ;;  %v11192_v6 = vld [vmem:[%s13785_s1 + $0x1670] sm:$0xff]  }
 0x2a8   :  { %v9997_v18 = vpop.f32.mrf.mxu1  ;;  %v7705_v19 = vadd.f32 %v9974_v14, %v13380_v37  ;;  %10267 = vmatpush3.bf16.msra.mxu0 %v11158_v25  ;;  %v11170_v37 = vld [vmem:[%s13785_s1 + $0x1518] sm:$0xff]   ;;  %v11195_v12 = vld [vmem:[%s13785_s1 + $0x16b0] sm:$0xff]   ;;  %v11197_v14 = vld [vmem:[%s13785_s1 + $0x16e8] sm:$0xff]  }
 0x2a9   :  { %v9976_v22 = vpop.f32.mrf.mxu0  ;;  %10289 = vmatpush3.bf16.msra.mxu1 %v11159_v26  ;;  %10268 = vmatprep.subr.bf16.mxu0 %v11160_v27  ;;  %v11200_v17 = vld [vmem:[%s13785_s1 + $0x1660] sm:$0xff]   ;;  %v11208_v25 = vld [vmem:[%s13785_s1 + $0x1650] sm:$0xff]  }
 0x2aa   :  { %v9998_v23 = vpop.f32.mrf.mxu1  ;;  %v13485_v24 = vadd.f32 %v9996_v15, %v7705_v19  ;;  %10290 = vmatprep.subr.bf16.mxu1 %v11161_v28  ;;  %v11198_v15 = vld [vmem:[%s13785_s1 + $0x1628] sm:$0xff]   ;;  %v11201_v18 = vld [vmem:[%s13785_s1 + $0x16e0] sm:$0xff]   ;;  %v11205_v22 = vld [vmem:[%s13785_s1 + $0x16d8] sm:$0xff]  }
 0x2ab   :  { %v11202_v19 = vld [vmem:[%s13785_s1 + $0x1620] sm:$0xff]   ;;  %v11206_v23 = vld [vmem:[%s13785_s1 + $0x1618] sm:$0xff]   ;;  %v11209_v26 = vld [vmem:[%s13785_s1 + $0x16d0] sm:$0xff]  }
 0x2ac   :  { %10269 = vmatpush3.bf16.msra.mxu0 %v11162_v29  ;;  %v11210_v27 = vld [vmem:[%s13785_s1 + $0x1610] sm:$0xff]   ;;  %v11212_v29 = vld [vmem:[%s13785_s1 + $0x1648] sm:$0xff]  }
 0x2ad   :  { %10291 = vmatpush3.bf16.msra.mxu1 %v11163_v30  ;;  %10270 = vmatprep.subr.bf16.mxu0 %v11164_v31  ;;  %v11211_v28 = vld [vmem:[%s13785_s1 + $0x1690] sm:$0xff]   ;;  %v11213_v30 = vld [vmem:[%s13785_s1 + $0x16c8] sm:$0xff]  }
 0x2ae   :  { %10292 = vmatprep.subr.bf16.mxu1 %v11165_v32  ;;  %v11214_v31 = vld [vmem:[%s13785_s1 + $0x1608] sm:$0xff]   ;;  %v11229_v57 = vld [vmem:[%s13785_s1 + $0x17f0] sm:$0xff]  }
 0x2af   :  { %v11215_v32 = vld [vmem:[%s13785_s1 + $0x1688] sm:$0xff]  }
 0x2b0   :  { %10271 = vmatpush3.bf16.msra.mxu0 %v11166_v33  ;;  %v11216_v33 = vld [vmem:[%s13785_s1 + $0x1640] sm:$0xff]  }
 0x2b1   :  { %10293 = vmatpush3.bf16.msra.mxu1 %v11167_v34  ;;  %10272 = vmatprep.subr.bf16.mxu0 %v11168_v35  ;;  %v11217_v34 = vld [vmem:[%s13785_s1 + $0x16c0] sm:$0xff]  }
 0x2b2   :  { %10294 = vmatprep.subr.bf16.mxu1 %v11169_v36  ;;  %v11218_v35 = vld [vmem:[%s13785_s1 + $0x1600] sm:$0xff]  }
 0x2b3   :  { %v11219_v36 = vld [vmem:[%s13785_s1 + $0x1680] sm:$0xff]  }
 0x2b4   :  { %10273 = vmatpush3.bf16.msra.mxu0 %v11170_v37  ;;  %v59_v37 = vld [vmem:[%s13786_s0 + $0x160] sm:$0xff] }
 0x2b5   :  { %10295 = vmatpush3.bf16.msra.mxu1 %v11171_v38  ;;  %10274 = vmatprep.subr.bf16.mxu0 %v11172_v39  ;;  %v60_v38 = vld [vmem:[%s13786_s0 + $0x168] sm:$0xff] }
 0x2b6   :  { %10296 = vmatprep.subr.bf16.mxu1 %v11173_v40  ;;  %v8564_v40 = vcombine.low %v59_v37, %v59_v37 }
 0x2b8   :  { %10275 = vmatpush3.bf16.msra.mxu0 %v11174_v41  ;;  %v8565_v41 = vcombine.high %v59_v37, %v59_v37 }
 0x2b9   :  { %10297 = vmatpush3.bf16.msra.mxu1 %v11175_v42  ;;  %10276 = vmatprep.subr.bf16.mxu0 %v11176_v43  ;;  %v8566_v42 = vcombine.low %v60_v38, %v60_v38 }
 0x2ba   :  { %10298 = vmatprep.subr.bf16.mxu1 %v11177_v44  ;;  %v11224_v44 = vld [vmem:[%s13785_s1 + $0x1778] sm:$0xff]  }
 0x2bc   :  { %10277 = vmatpush3.bf16.msra.mxu0 %v11178_v45  ;;  %v8567_v45 = vcombine.high %v60_v38, %v60_v38 }
 0x2bd   :  { %10299 = vmatpush3.bf16.msra.mxu1 %v11179_v46  ;;  %10278 = vmatprep.subr.bf16.mxu0 %v11180_v47  ;;  %v11225_v46 = vld [vmem:[%s13785_s1 + $0x17f8] sm:$0xff]  }
 0x2be   :  { %10300 = vmatprep.subr.bf16.mxu1 %v11181_v48  ;;  %v11226_v48 = vld [vmem:[%s13785_s1 + $0x1738] sm:$0xff]  }
 0x2c0   :  { %10279 = vmatpush3.bf16.msra.mxu0 %v11182_v49 }
 0x2c1   :  { %10301 = vmatpush3.bf16.msra.mxu1 %v11183_v50  ;;  %10308 = vmatprep.subr.bf16.mxu0 %v11188_v59 }
 0x2c2   :  { %10330 = vmatprep.subr.bf16.mxu1 %v11189_v60  ;;  %v11230_v60 = vld [vmem:[%s13785_s1 + $0x1730] sm:$0xff]  }
 0x2c3   :  { %v10016_v53 = vpop.f32.mrf.mxu0  ;;  %8263 = vmatmul.mubr.bf16.vlgmr.msra.gmra.mxu0 %v8560_v54 }
 0x2c4   :  { %v10038_v58 = vpop.f32.mrf.mxu1  ;;  %8303 = vmatmul.mubr.bf16.vlgmr.msra.gmra.mxu1 %v8562_v56  ;;  %10309 = vmatpush3.bf16.msra.mxu0 %v11190_v62  ;;  %v11228_v56 = vld [vmem:[%s13785_s1 + $0x1770] sm:$0xff]  }
 0x2c5   :  { %v10017_v61 = vpop.f32.mrf.mxu0  ;;  %10331 = vmatpush3.bf16.msra.mxu1 %v11191_v1  ;;  %10310 = vmatprep.subr.bf16.mxu0 %v11192_v6  ;;  %v11231_v62 = vld [vmem:[%s13785_s1 + $0x17b0] sm:$0xff]   ;;  %v11234_v1 = vld [vmem:[%s13785_s1 + $0x1728] sm:$0xff]   ;;  %v11239_v6 = vld [vmem:[%s13785_s1 + $0x17a0] sm:$0xff]  }
 0x2c6   :  { %v10018_v63 = vadd.f32 %v10017_v61, %v10016_v53  ;;  %v10039_v0 = vpop.f32.mrf.mxu1  ;;  %10332 = vmatprep.subr.bf16.mxu1 %v11193_v7  ;;  %8342 = vmatprep.mubr.bf16.mxu0 %v8565_v41  ;;  %v11240_v7 = vld [vmem:[%s13785_s1 + $0x1758] sm:$0xff]  }
 0x2c7   :  { %v10040_v2 = vadd.f32 %v10039_v0, %v10038_v58  ;;  %v10019_v3 = vpop.f32.mrf.mxu0  ;;  %8382 = vmatprep.mubr.bf16.mxu1 %v8567_v45  ;;  %v11233_v0 = vld [vmem:[%s13785_s1 + $0x17e8] sm:$0xff]  }
 0x2c8   :  { %v7785_v4 = vadd.f32 %v10018_v63, %v13485_v24  ;;  %v10041_v5 = vpop.f32.mrf.mxu1  ;;  %10311 = vmatpush3.bf16.msra.mxu0 %v11194_v10  ;;  %v11207_v24 = vld [vmem:[%s13785_s1 + $0x1698] sm:$0xff]   ;;  %v11232_v63 = vld [vmem:[%s13785_s1 + $0x1768] sm:$0xff]   ;;  %v11236_v3 = vld [vmem:[%s13785_s1 + $0x1760] sm:$0xff]  }
 0x2c9   :  { %v10020_v8 = vpop.f32.mrf.mxu0  ;;  %10333 = vmatpush3.bf16.msra.mxu1 %v11195_v12  ;;  %10312 = vmatprep.subr.bf16.mxu0 %v11196_v13  ;;  %v11238_v5 = vld [vmem:[%s13785_s1 + $0x1720] sm:$0xff]   ;;  %v11243_v10 = vld [vmem:[%s13785_s1 + $0x1798] sm:$0xff]   ;;  %v11245_v12 = vld [vmem:[%s13785_s1 + $0x17d0] sm:$0xff]  }
 0x2ca   :  { %v13590_v9 = vadd.f32 %v10040_v2, %v7785_v4  ;;  %v10042_v11 = vpop.f32.mrf.mxu1  ;;  %10334 = vmatprep.subr.bf16.mxu1 %v11197_v14  ;;  %v11235_v2 = vld [vmem:[%s13785_s1 + $0x17a8] sm:$0xff]   ;;  %v11237_v4 = vld [vmem:[%s13785_s1 + $0x17e0] sm:$0xff]   ;;  %v11241_v8 = vld [vmem:[%s13785_s1 + $0x17d8] sm:$0xff]  }
 0x2cb   :  { %v11244_v11 = vld [vmem:[%s13785_s1 + $0x1750] sm:$0xff]  }
 0x2cc   :  { %10313 = vmatpush3.bf16.msra.mxu0 %v11198_v15  ;;  %v11246_v13 = vld [vmem:[%s13785_s1 + $0x1710] sm:$0xff]   ;;  %v11248_v15 = vld [vmem:[%s13785_s1 + $0x1748] sm:$0xff]  }
 0x2cd   :  { %10335 = vmatpush3.bf16.msra.mxu1 %v11199_v16  ;;  %10314 = vmatprep.subr.bf16.mxu0 %v11200_v17  ;;  %v11247_v14 = vld [vmem:[%s13785_s1 + $0x1790] sm:$0xff]   ;;  %v11249_v16 = vld [vmem:[%s13785_s1 + $0x17c8] sm:$0xff]  }
 0x2ce   :  { %10336 = vmatprep.subr.bf16.mxu1 %v11201_v18  ;;  %v11250_v17 = vld [vmem:[%s13785_s1 + $0x1708] sm:$0xff]  }
 0x2cf   :  { %v11251_v18 = vld [vmem:[%s13785_s1 + $0x1788] sm:$0xff]  }
 0x2d0   :  { %10315 = vmatpush3.bf16.msra.mxu0 %v11202_v19  ;;  %v11252_v19 = vld [vmem:[%s13785_s1 + $0x1740] sm:$0xff]  }
 0x2d1   :  { %10337 = vmatpush3.bf16.msra.mxu1 %v11203_v20  ;;  %10316 = vmatprep.subr.bf16.mxu0 %v11204_v21  ;;  %v11253_v20 = vld [vmem:[%s13785_s1 + $0x17c0] sm:$0xff]  }
 0x2d2   :  { %10338 = vmatprep.subr.bf16.mxu1 %v11205_v22  ;;  %v11254_v21 = vld [vmem:[%s13785_s1 + $0x1700] sm:$0xff]  }
 0x2d3   :  { %v11255_v22 = vld [vmem:[%s13785_s1 + $0x1780] sm:$0xff]  }
 0x2d4   :  { %10317 = vmatpush3.bf16.msra.mxu0 %v11206_v23  ;;  %v61_v23 = vld [vmem:[%s13786_s0 + $0x170] sm:$0xff] }
 0x2d5   :  { %10339 = vmatpush3.bf16.msra.mxu1 %v11207_v24  ;;  %10318 = vmatprep.subr.bf16.mxu0 %v11208_v25  ;;  %v8568_v24 = vcombine.low %v61_v23, %v61_v23  ;;  %v8569_v25 = vcombine.high %v61_v23, %v61_v23 }
 0x2d6   :  { %10340 = vmatprep.subr.bf16.mxu1 %v11209_v26  ;;  %v62_v26 = vld [vmem:[%s13786_s0 + $0x178] sm:$0xff] }
 0x2d8   :  { %10319 = vmatpush3.bf16.msra.mxu0 %v11210_v27 }
 0x2d9   :  { %10341 = vmatpush3.bf16.msra.mxu1 %v11211_v28  ;;  %10320 = vmatprep.subr.bf16.mxu0 %v11212_v29  ;;  %v8570_v29 = vcombine.low %v62_v26, %v62_v26 }
 0x2da   :  { %10342 = vmatprep.subr.bf16.mxu1 %v11213_v30  ;;  %v8571_v30 = vcombine.high %v62_v26, %v62_v26 }
 0x2dc   :  { %10321 = vmatpush3.bf16.msra.mxu0 %v11214_v31 }
 0x2dd   :  { %10343 = vmatpush3.bf16.msra.mxu1 %v11215_v32  ;;  %10322 = vmatprep.subr.bf16.mxu0 %v11216_v33 }
 0x2de   :  { %10344 = vmatprep.subr.bf16.mxu1 %v11217_v34 }
 0x2e0   :  { %10323 = vmatpush3.bf16.msra.mxu0 %v11218_v35 }
 0x2e1   :  { %10345 = vmatpush3.bf16.msra.mxu1 %v11219_v36  ;;  %10352 = vmatprep.subr.bf16.mxu0 %v11224_v44 }
 0x2e2   :  { %10374 = vmatprep.subr.bf16.mxu1 %v11225_v46 }
 0x2e3   :  { %v10060_v39 = vpop.f32.mrf.mxu0  ;;  %8343 = vmatmul.mubr.bf16.vlgmr.msra.gmra.mxu0 %v8564_v40 }
 0x2e4   :  { %v10082_v43 = vpop.f32.mrf.mxu1  ;;  %8383 = vmatmul.mubr.bf16.vlgmr.msra.gmra.mxu1 %v8566_v42  ;;  %10353 = vmatpush3.bf16.msra.mxu0 %v11226_v48 }
 0x2e5   :  { %v10061_v47 = vpop.f32.mrf.mxu0  ;;  %10375 = vmatpush3.bf16.msra.mxu1 %v11227_v51  ;;  %10354 = vmatprep.subr.bf16.mxu0 %v11228_v56 }
 0x2e6   :  { %v10062_v49 = vadd.f32 %v10061_v47, %v10060_v39  ;;  %v10083_v50 = vpop.f32.mrf.mxu1  ;;  %10376 = vmatprep.subr.bf16.mxu1 %v11229_v57  ;;  %8422 = vmatprep.mubr.bf16.mxu0 %v8569_v25 }
 0x2e7   :  { %v10084_v52 = vadd.f32 %v10083_v50, %v10082_v43  ;;  %v10063_v53 = vpop.f32.mrf.mxu0  ;;  %8462 = vmatprep.mubr.bf16.mxu1 %v8571_v30 }
 0x2e8   :  { %v7865_v54 = vadd.f32 %v10062_v49, %v13590_v9  ;;  %v10085_v55 = vpop.f32.mrf.mxu1  ;;  %10355 = vmatpush3.bf16.msra.mxu0 %v11230_v60  ;;  %v11242_v9 = vld [vmem:[%s13785_s1 + $0x1718] sm:$0xff]  }
 0x2e9   :  { %v10064_v58 = vpop.f32.mrf.mxu0  ;;  %10377 = vmatpush3.bf16.msra.mxu1 %v11231_v62  ;;  %10356 = vmatprep.subr.bf16.mxu0 %v11232_v63 }
 0x2ea   :  { %v13695_v59 = vadd.f32 %v10084_v52, %v7865_v54  ;;  %v10086_v61 = vpop.f32.mrf.mxu1  ;;  %10378 = vmatprep.subr.bf16.mxu1 %v11233_v0 }
 0x2ec   :  { %10357 = vmatpush3.bf16.msra.mxu0 %v11234_v1 }
 0x2ed   :  { %10379 = vmatpush3.bf16.msra.mxu1 %v11235_v2  ;;  %10358 = vmatprep.subr.bf16.mxu0 %v11236_v3 }
 0x2ee   :  { %10380 = vmatprep.subr.bf16.mxu1 %v11237_v4 }
 0x2f0   :  { %10359 = vmatpush3.bf16.msra.mxu0 %v11238_v5 }
 0x2f1   :  { %10381 = vmatpush3.bf16.msra.mxu1 %v11239_v6  ;;  %10360 = vmatprep.subr.bf16.mxu0 %v11240_v7 }
 0x2f2   :  { %10382 = vmatprep.subr.bf16.mxu1 %v11241_v8 }
 0x2f4   :  { %10361 = vmatpush3.bf16.msra.mxu0 %v11242_v9 }
 0x2f5   :  { %10383 = vmatpush3.bf16.msra.mxu1 %v11243_v10  ;;  %10362 = vmatprep.subr.bf16.mxu0 %v11244_v11 }
 0x2f6   :  { %10384 = vmatprep.subr.bf16.mxu1 %v11245_v12 }
 0x2f8   :  { %10363 = vmatpush3.bf16.msra.mxu0 %v11246_v13 }
 0x2f9   :  { %10385 = vmatpush3.bf16.msra.mxu1 %v11247_v14  ;;  %10364 = vmatprep.subr.bf16.mxu0 %v11248_v15 }
 0x2fa   :  { %10386 = vmatprep.subr.bf16.mxu1 %v11249_v16 }
 0x2fc   :  { %10365 = vmatpush3.bf16.msra.mxu0 %v11250_v17 }
 0x2fd   :  { %10387 = vmatpush3.bf16.msra.mxu1 %v11251_v18  ;;  %10366 = vmatprep.subr.bf16.mxu0 %v11252_v19 }
 0x2fe   :  { %10388 = vmatprep.subr.bf16.mxu1 %v11253_v20 }
 0x300   :  { %10367 = vmatpush3.bf16.msra.mxu0 %v11254_v21 }
 0x301   :  { %10389 = vmatpush3.bf16.msra.mxu1 %v11255_v22 }
 0x303   :  { %v10104_v27 = vpop.f32.mrf.mxu0  ;;  %8423 = vmatmul.mubr.bf16.vlgmr.msra.gmra.mxu0 %v8568_v24 }
 0x304   :  { %v10126_v28 = vpop.f32.mrf.mxu1  ;;  %8463 = vmatmul.mubr.bf16.vlgmr.msra.gmra.mxu1 %v8570_v29 }
 0x305   :  { %v10105_v31 = vpop.f32.mrf.mxu0 }
 0x306   :  { %v10127_v32 = vpop.f32.mrf.mxu1  ;;  %v10106_v33 = vadd.f32 %v10105_v31, %v10104_v27 }
 0x307   :  { %v10128_v34 = vadd.f32 %v10127_v32, %v10126_v28  ;;  %v10107_v35 = vpop.f32.mrf.mxu0 }
 0x308   :  { %v10129_v36 = vpop.f32.mrf.mxu1  ;;  %v7945_v37 = vadd.f32 %v10106_v33, %v13695_v59 }
 0x309   :  { %v10108_v38 = vpop.f32.mrf.mxu0 }
 0x30a   :  { %v10130_v39 = vpop.f32.mrf.mxu1  ;;  %v7985_v40 = vadd.f32 %v10128_v34, %v7945_v37 }
 0x323   :  { %v10148_v41 = vpop.f32.mrf.mxu0 }
 0x324   :  { %v10170_v42 = vpop.f32.mrf.mxu1 }
 0x325   :  { %v10149_v43 = vpop.f32.mrf.mxu0 }
 0x326   :  { %v10150_v44 = vadd.f32 %v10149_v43, %v10148_v41  ;;  %v10171_v45 = vpop.f32.mrf.mxu1 }
 0x327   :  { %v10172_v46 = vadd.f32 %v10171_v45, %v10170_v42  ;;  %v10151_v47 = vpop.f32.mrf.mxu0 }
 0x328   :  { %v8025_v48 = vadd.f32 %v10150_v44, %v7985_v40  ;;  %v10173_v49 = vpop.f32.mrf.mxu1 }
 0x329   :  { %v10152_v50 = vpop.f32.mrf.mxu0 }
 0x32a   :  { %v8065_v51 = vadd.f32 %v10172_v46, %v8025_v48  ;;  %v10174_v52 = vpop.f32.mrf.mxu1 }
 0x343   :  { %v10192_v53 = vpop.f32.mrf.mxu0 }
 0x344   :  { %v10214_v54 = vpop.f32.mrf.mxu1 }
 0x345   :  { %v10193_v55 = vpop.f32.mrf.mxu0 }
 0x346   :  { %v10194_v56 = vadd.f32 %v10193_v55, %v10192_v53  ;;  %v10215_v57 = vpop.f32.mrf.mxu1 }
 0x347   :  { %v10216_v58 = vadd.f32 %v10215_v57, %v10214_v54  ;;  %v10195_v59 = vpop.f32.mrf.mxu0 }
 0x348   :  { %v8105_v60 = vadd.f32 %v10194_v56, %v8065_v51  ;;  %v10217_v61 = vpop.f32.mrf.mxu1 }
 0x349   :  { %v10196_v62 = vpop.f32.mrf.mxu0 }
 0x34a   :  { %v8145_v63 = vadd.f32 %v10216_v58, %v8105_v60  ;;  %v10218_v0 = vpop.f32.mrf.mxu1 }
 0x363   :  { %v10236_v1 = vpop.f32.mrf.mxu0 }
 0x364   :  { %v10258_v2 = vpop.f32.mrf.mxu1 }
 0x365   :  { %v10237_v3 = vpop.f32.mrf.mxu0 }
 0x366   :  { %v10259_v4 = vpop.f32.mrf.mxu1  ;;  %v10238_v5 = vadd.f32 %v10237_v3, %v10236_v1 }
 0x367   :  { %v10260_v6 = vadd.f32 %v10259_v4, %v10258_v2  ;;  %v10239_v7 = vpop.f32.mrf.mxu0 }
 0x368   :  { %v10261_v8 = vpop.f32.mrf.mxu1  ;;  %v8185_v9 = vadd.f32 %v10238_v5, %v8145_v63 }
 0x369   :  { %v10240_v10 = vpop.f32.mrf.mxu0 }
 0x36a   :  { %v10262_v11 = vpop.f32.mrf.mxu1  ;;  %v8225_v12 = vadd.f32 %v10260_v6, %v8185_v9 }
 0x383   :  { %v10280_v13 = vpop.f32.mrf.mxu0 }
 0x384   :  { %v10302_v14 = vpop.f32.mrf.mxu1 }
 0x385   :  { %v10281_v15 = vpop.f32.mrf.mxu0 }
 0x386   :  { %v10303_v16 = vpop.f32.mrf.mxu1  ;;  %v10282_v29 = vadd.f32 %v10281_v15, %v10280_v13 }
 0x387   :  { %v10283_v17 = vpop.f32.mrf.mxu0  ;;  %v10304_v31 = vadd.f32 %v10303_v16, %v10302_v14 }
 0x388   :  { %v10305_v18 = vpop.f32.mrf.mxu1  ;;  %v8265_v30 = vadd.f32 %v10282_v29, %v8225_v12 }
 0x389   :  { %v10284_v19 = vpop.f32.mrf.mxu0 }
 0x38a   :  { %v10306_v20 = vpop.f32.mrf.mxu1  ;;  %v8305_v33 = vadd.f32 %v10304_v31, %v8265_v30 }
 0x3a3   :  { %v10324_v21 = vpop.f32.mrf.mxu0 }
 0x3a4   :  { %v10346_v22 = vpop.f32.mrf.mxu1 }
 0x3a5   :  { %v10325_v23 = vpop.f32.mrf.mxu0 }
 0x3a6   :  { %v10347_v24 = vpop.f32.mrf.mxu1  ;;  %v10326_v32 = vadd.f32 %v10325_v23, %v10324_v21 }
 0x3a7   :  { %v10327_v25 = vpop.f32.mrf.mxu0  ;;  %v10348_v35 = vadd.f32 %v10347_v24, %v10346_v22 }
 0x3a8   :  { %v10349_v26 = vpop.f32.mrf.mxu1  ;;  %v8345_v34 = vadd.f32 %v10326_v32, %v8305_v33 }
 0x3a9   :  { %v10328_v27 = vpop.f32.mrf.mxu0 }
 0x3aa   :  { %v10350_v28 = vpop.f32.mrf.mxu1  ;;  %v8385_v40 = vadd.f32 %v10348_v35, %v8345_v34 }
 0x3c3   :  { %v10368_v36 = vpop.f32.mrf.mxu0 }
 0x3c4   :  { %v10390_v37 = vpop.f32.mrf.mxu1 }
 0x3c5   :  { %v10369_v38 = vpop.f32.mrf.mxu0 }
 0x3c6   :  { %v10391_v39 = vpop.f32.mrf.mxu1  ;;  %v10370_v41 = vadd.f32 %v10369_v38, %v10368_v36 }
 0x3c7   :  { %v10371_v42 = vpop.f32.mrf.mxu0  ;;  %v10392_v45 = vadd.f32 %v10391_v39, %v10390_v37 }
 0x3c8   :  { %v10393_v43 = vpop.f32.mrf.mxu1  ;;  %v8425_v44 = vadd.f32 %v10370_v41, %v8385_v40 }
 0x3c9   :  { %v10372_v46 = vpop.f32.mrf.mxu0 }
 0x3ca   :  { %v10394_v47 = vpop.f32.mrf.mxu1  ;;  %v8465_v48 = vadd.f32 %v10392_v45, %v8425_v44 }
 0x3cc   :  { %8470 = vst [vmem:[%s13788_s3] sm:$0xff] %v8465_v48 }

</bundles_post_ra>
